<compile_context>
chip_gen: v7x
topology: tpu7x:2x2x1
jax: 0.10.0
libtpu: 0.0.40
codegen_flags: <defaults>
</compile_context>

<pallas_src>
import jax
import jax.numpy as jnp
from jax import lax
from jax.experimental import pallas as pl
from jax.experimental.pallas import tpu as pltpu

_MASK_VALUE = -1e30
_VMEM = pl.BlockSpec(memory_space=pltpu.MemorySpace.VMEM)


# --------------------------------------------------------------------------
# In-kernel helpers (traced inside the Pallas kernels).
# --------------------------------------------------------------------------
def _dense_adjacency(edge_dst_row, edge_src_col, n, remaining_self_loops):
    """Dense (n, n) edge-multiplicity matrix adj[i, j] = #edges j -> i.

    Built from the COO edge list via one-hot matmuls (MXU). Self loops follow
    PyG semantics:
      remaining_self_loops=True  -> add_remaining_self_loops (keep existing count)
      remaining_self_loops=False -> remove_self_loops + add_self_loops (diag := 1)
    """
    nnz = edge_src_col.shape[0]
    dst_onehot = (lax.broadcasted_iota(jnp.int32, (n, nnz), 0)
                  == edge_dst_row).astype(jnp.float32)                      # (n, E)
    src_onehot = (edge_src_col
                  == lax.broadcasted_iota(jnp.int32, (nnz, n), 1)).astype(jnp.float32)  # (E, n)
    counts = jnp.dot(dst_onehot, src_onehot, preferred_element_type=jnp.float32)        # (n, n)
    eye = (lax.broadcasted_iota(jnp.int32, (n, n), 0)
           == lax.broadcasted_iota(jnp.int32, (n, n), 1))
    if remaining_self_loops:
        return jnp.where(eye, jnp.maximum(counts, 1.0), counts)
    return jnp.where(eye, 1.0, counts)


def _attention_aggregate(xw, s_dst, s_src_t, adj, heads, f_out, negative_slope):
    """Multi-head GAT attention + aggregation on dense (n, n) masked scores."""
    outs = []
    for h in range(heads):                                     # static unroll (heads is small)
        e = s_dst[:, h:h + 1] + s_src_t[h:h + 1, :]            # (n, n)
        e = jnp.where(e >= 0, e, negative_slope * e)           # LeakyReLU
        e = jnp.where(adj > 0.0, e, _MASK_VALUE)               # mask non-edges
        m = jnp.max(e, axis=-1, keepdims=True)
        p = jnp.exp(e - m) * adj                               # duplicate edges weighted exactly
        alpha = p / jnp.sum(p, axis=-1, keepdims=True)         # every node has a self loop
        outs.append(jnp.dot(alpha, xw[:, h * f_out:(h + 1) * f_out],
                            preferred_element_type=jnp.float32))
    return jnp.concatenate(outs, axis=-1) if heads > 1 else outs[0]


# --------------------------------------------------------------------------
# Kernels.
# --------------------------------------------------------------------------
def make_conv1_kernel(heads, f_out, negative_slope):
    def kernel(arow_ref, acol_ref, edst_ref, esrc_ref,
               w_ref, attd_ref, attst_ref, b_ref, out_ref):
        n = out_ref.shape[0]
        d = w_ref.shape[0]
        nnz_a = acol_ref.shape[0]

        # --- SpMM  XW = A @ W1  (binary attribute matrix given in COO form) ---
        col_onehot = (acol_ref[...]
                      == lax.broadcasted_iota(jnp.int32, (nnz_a, d), 1)).astype(jnp.float32)
        gathered = jnp.dot(col_onehot, w_ref[...],
                           preferred_element_type=jnp.float32)              # W1[col[k], :]
        row_scatter = (lax.broadcasted_iota(jnp.int32, (n, nnz_a), 0)
                       == arow_ref[...]).astype(jnp.float32)
        xw = jnp.dot(row_scatter, gathered,
                     preferred_element_type=jnp.float32)                    # (n, H*F)

        # --- dense adjacency (add_remaining_self_loops) ---
        adj = _dense_adjacency(edst_ref[...], esrc_ref[...], n,
                               remaining_self_loops=True)

        # --- attention scores ---
        s_dst = jnp.dot(xw, attd_ref[...], preferred_element_type=jnp.float32)      # (n, H)
        s_src_t = jnp.dot(attst_ref[...], xw.T, preferred_element_type=jnp.float32)  # (H, n)

        y = _attention_aggregate(xw, s_dst, s_src_t, adj, heads, f_out, negative_slope)
        y = y + b_ref[...]                                       # bias folded, single pass
        out_ref[...] = jnp.where(y > 0, y, jnp.exp(y) - 1.0)     # fused ELU, lane-dense store
    return kernel


def make_conv2_kernel(negative_slope):
    def kernel(x_ref, edst_ref, esrc_ref, w_ref, pdst_ref, psrct_ref, b_ref, out_ref):
        n, n_cls = out_ref.shape
        x = x_ref[...]
        xw = jnp.dot(x, w_ref[...], preferred_element_type=jnp.float32)     # (n, C)

        adj = _dense_adjacency(edst_ref[...], esrc_ref[...], n,
                               remaining_self_loops=False)

        # scores computed from x with (W2 @ att) folded into the params so the
        # in-kernel transpose keeps the wide (n, F_in) shape.
        s_dst = jnp.dot(x, pdst_ref[...], preferred_element_type=jnp.float32)        # (n, 1)
        s_src_t = jnp.dot(psrct_ref[...], x.T, preferred_element_type=jnp.float32)   # (1, n)

        y = _attention_aggregate(xw, s_dst, s_src_t, adj, 1, n_cls, negative_slope)
        y = y + b_ref[...]
        # log_softmax over classes, fused into the final store
        z = y - jnp.max(y, axis=-1, keepdims=True)
        out_ref[...] = z - jnp.log(jnp.sum(jnp.exp(z), axis=-1, keepdims=True))
    return kernel


# --------------------------------------------------------------------------
# Wrappers.
# --------------------------------------------------------------------------
def _head_block_diag(att_half):
    """(H, F) per-head attention vector -> block-diagonal (H*F, H) matrix."""
    h, f = att_half.shape
    eye = jnp.eye(h, dtype=att_half.dtype)
    return (att_half[:, :, None] * eye[:, None, :]).reshape(h * f, h)


def gat_conv1_forward(attr_idx, edge_idx, n, d, w1, att1, b1, *,
                      heads, f_hidden, negative_slope=0.2):
    nnz_a = attr_idx.shape[1]
    nnz_e = edge_idx.shape[1]
    hf = heads * f_hidden
    arow = attr_idx[0].astype(jnp.int32).reshape(1, nnz_a)
    acol = attr_idx[1].astype(jnp.int32).reshape(nnz_a, 1)
    esrc = edge_idx[0].astype(jnp.int32).reshape(nnz_e, 1)
    edst = edge_idx[1].astype(jnp.int32).reshape(1, nnz_e)
    att_dst_mat = _head_block_diag(att1[:, :f_hidden]).astype(jnp.float32)   # (H*F, H)
    att_src_t = _head_block_diag(att1[:, f_hidden:]).T.astype(jnp.float32)   # (H, H*F)
    return pl.pallas_call(
        make_conv1_kernel(heads, f_hidden, negative_slope),
        out_shape=jax.ShapeDtypeStruct((n, hf), jnp.float32),
        in_specs=[_VMEM] * 8,
        out_specs=_VMEM,
    )(arow, acol, edst, esrc,
      w1.astype(jnp.float32), att_dst_mat, att_src_t,
      b1.reshape(1, hf).astype(jnp.float32))


def gat_conv2_forward(x, edge_idx, w2, att2, b2, *, negative_slope=0.2):
    n, _ = x.shape
    n_cls = w2.shape[1]
    nnz_e = edge_idx.shape[1]
    esrc = edge_idx[0].astype(jnp.int32).reshape(nnz_e, 1)
    edst = edge_idx[1].astype(jnp.int32).reshape(1, nnz_e)
    proj_dst = jnp.dot(w2, att2[:, :n_cls].reshape(n_cls, 1))   # (F_in, 1)
    proj_src_t = jnp.dot(att2[:, n_cls:], w2.T)                 # (1, F_in)
    return pl.pallas_call(
        make_conv2_kernel(negative_slope),
        out_shape=jax.ShapeDtypeStruct((n, n_cls), jnp.float32),
        in_specs=[_VMEM] * 7,
        out_specs=_VMEM,
    )(x.astype(jnp.float32), edst, esrc, w2.astype(jnp.float32),
      proj_dst.astype(jnp.float32), proj_src_t.astype(jnp.float32),
      b2.reshape(1, n_cls).astype(jnp.float32))


def gat_forward(attr_idx, edge_idx, n, d, params, *, heads, f_hidden,
                negative_slope=0.2):
    """GAT.forward(attr_idx, edge_idx, n, d) in eval mode."""
    w1, att1, b1, w2, att2, b2 = params
    x = gat_conv1_forward(attr_idx, edge_idx, n, d, w1, att1, b1,
                          heads=heads, f_hidden=f_hidden,
                          negative_slope=negative_slope)
    x = gat_conv2_forward(x, edge_idx, w2, att2, b2,
                          negative_slope=negative_slope)
    return x


# --------------------------------------------------------------------------
# Pure-JAX (edge-list / segment-op) reference for the correctness check.
# --------------------------------------------------------------------------
def _ref_gat_layer(xw, att, bias, e_src, e_dst, n, heads, f_out, negative_slope=0.2):
    x3 = xw.reshape(n, heads, f_out)
    s_dst = jnp.einsum('nhf,hf->nh', x3, att[:, :f_out])
    s_src = jnp.einsum('nhf,hf->nh', x3, att[:, f_out:])
    e = s_dst[e_dst] + s_src[e_src]
    e = jnp.where(e >= 0, e, negative_slope * e)
    m = jax.ops.segment_max(e, e_dst, num_segments=n)
    p = jnp.exp(e - m[e_dst])
    denom = jax.ops.segment_sum(p, e_dst, num_segments=n)
    alpha = p / denom[e_dst]
    msg = alpha[:, :, None] * x3[e_src]
    out = jax.ops.segment_sum(msg, e_dst, num_segments=n).reshape(n, heads * f_out)
    return out + bias[None, :]


def _ref_gat_forward(attr_idx, edge_idx, n, d, params, heads, f_hidden):
    w1, att1, b1, w2, att2, b2 = params
    n_cls = w2.shape[1]
    a_dense = jnp.zeros((n, d), jnp.float32).at[attr_idx[0], attr_idx[1]].add(1.0)
    loops = jnp.arange(n, dtype=jnp.int32)
    e_src = jnp.concatenate([edge_idx[0].astype(jnp.int32), loops])
    e_dst = jnp.concatenate([edge_idx[1].astype(jnp.int32), loops])
    x = _ref_gat_layer(a_dense @ w1, att1, b1, e_src, e_dst, n, heads, f_hidden)
    x = jnp.where(x > 0, x, jnp.exp(x) - 1.0)                    # ELU
    x = _ref_gat_layer(x @ w2, att2, b2, e_src, e_dst, n, 1, n_cls)
    return jax.nn.log_softmax(x, axis=1)


if __name__ == "__main__":
    # Small, module-consistent shapes.
    n = 128          # nodes
    d = 64           # sparse attribute dimension
    nnz_a = 512      # attribute nonzeros (duplicates allowed -> accumulated)
    heads = 4
    f_hidden = 32    # per-head hidden -> concat width 128 (lane-dense output)
    n_classes = 8

    key = jax.random.PRNGKey(0)
    k_ar, k_ac, k_w1, k_a1, k_b1, k_w2, k_a2, k_b2 = jax.random.split(key, 8)

    # Sparse node-attribute matrix in COO form, values are implicitly ones.
    arow = jax.random.randint(k_ar, (nnz_a,), 0, n, dtype=jnp.int32)
    acol = jax.random.randint(k_ac, (nnz_a,), 0, d, dtype=jnp.int32)
    attr_idx = jnp.stack([arow, acol], axis=0)                   # [2, nnz_a]

    # Deterministic simple graph: 4 chord offsets -> no self loops / no dup edges.
    base = jnp.arange(n, dtype=jnp.int32)
    offsets = (1, 3, 7, 12)
    e_src = jnp.concatenate([base for _ in offsets])
    e_dst = jnp.concatenate([(base + o) % n for o in offsets]).astype(jnp.int32)
    edge_idx = jnp.stack([e_src, e_dst], axis=0)                 # [2, nnz_e]

    # Parameters (PyG GATConv layout: weight (F_in, H*F_out), att (H, 2*F_out), bias (H*F_out,)).
    w1 = 0.2 * jax.random.normal(k_w1, (d, heads * f_hidden), jnp.float32)
    att1 = 0.2 * jax.random.normal(k_a1, (heads, 2 * f_hidden), jnp.float32)
    b1 = 0.1 * jax.random.normal(k_b1, (heads * f_hidden,), jnp.float32)
    w2 = 0.2 * jax.random.normal(k_w2, (heads * f_hidden, n_classes), jnp.float32)
    att2 = 0.2 * jax.random.normal(k_a2, (1, 2 * n_classes), jnp.float32)
    b2 = 0.1 * jax.random.normal(k_b2, (n_classes,), jnp.float32)
    params = (w1, att1, b1, w2, att2, b2)

    out = gat_forward(attr_idx, edge_idx, n, d, params,
                      heads=heads, f_hidden=f_hidden)
    out = jax.block_until_ready(out)

    ref = _ref_gat_forward(attr_idx, edge_idx, n, d, params, heads, f_hidden)

    assert out.shape == (n, n_classes)
    assert bool(jnp.all(jnp.isfinite(out)))
    assert bool(jnp.allclose(out, ref, atol=1e-3, rtol=1e-3)), "mismatch vs reference"

    print("KERNEL_OK")
</pallas_src>

<mosaic_0001>
module attributes {stable_mosaic.version = 11 : i64} {
  func.func @kernel(%arg0: memref<1x512xi32, #tpu.memory_space<vmem>>, %arg1: memref<512x1xi32, #tpu.memory_space<vmem>>, %arg2: memref<1x512xi32, #tpu.memory_space<vmem>>, %arg3: memref<512x1xi32, #tpu.memory_space<vmem>>, %arg4: memref<64x128xf32, #tpu.memory_space<vmem>>, %arg5: memref<128x4xf32, #tpu.memory_space<vmem>>, %arg6: memref<4x128xf32, #tpu.memory_space<vmem>>, %arg7: memref<1x128xf32, #tpu.memory_space<vmem>>, %arg8: memref<128x128xf32, #tpu.memory_space<vmem>>) attributes {dimension_semantics = [], scalar_prefetch = 0 : i64, scratch_operands = 0 : i64, tpu.core_type = #tpu.core_type<tc>} {
    %c0 = arith.constant 0 : index
    %c0_0 = arith.constant 0 : index
    %0 = vector.load %arg1[%c0, %c0_0] : memref<512x1xi32, #tpu.memory_space<vmem>>, vector<512x1xi32>
    %1 = tpu.iota {dimensions = array<i32: 1>} : vector<512x64xi32>
    %2 = vector.broadcast %0 : vector<512x1xi32> to vector<512x64xi32>
    %3 = arith.cmpi eq, %2, %1 : vector<512x64xi32>
    %4 = arith.extui %3 : vector<512x64xi1> to vector<512x64xi32>
    %5 = arith.sitofp %4 : vector<512x64xi32> to vector<512x64xf32>
    %c0_1 = arith.constant 0 : index
    %c0_2 = arith.constant 0 : index
    %6 = vector.load %arg4[%c0_1, %c0_2] : memref<64x128xf32, #tpu.memory_space<vmem>>, vector<64x128xf32>
    %cst = arith.constant dense<0.000000e+00> : vector<512x128xf32>
    %7 = tpu.matmul %5, %6, %cst {dimension_numbers = #tpu.dot_dimension_numbers<[1], [0], [0], [1], [0, 0, 1, 1], [], []>} : vector<512x64xf32>, vector<64x128xf32>, vector<512x128xf32> -> vector<512x128xf32>
    %8 = tpu.iota {dimensions = array<i32: 0>} : vector<128x512xi32>
    %c0_3 = arith.constant 0 : index
    %c0_4 = arith.constant 0 : index
    %9 = vector.load %arg0[%c0_3, %c0_4] : memref<1x512xi32, #tpu.memory_space<vmem>>, vector<1x512xi32>
    %10 = vector.broadcast %9 : vector<1x512xi32> to vector<128x512xi32>
    %11 = arith.cmpi eq, %8, %10 : vector<128x512xi32>
    %12 = arith.extui %11 : vector<128x512xi1> to vector<128x512xi32>
    %13 = arith.sitofp %12 : vector<128x512xi32> to vector<128x512xf32>
    %cst_5 = arith.constant dense<0.000000e+00> : vector<128x128xf32>
    %14 = tpu.matmul %13, %7, %cst_5 {dimension_numbers = #tpu.dot_dimension_numbers<[1], [0], [0], [1], [0, 0, 1, 1], [], []>} : vector<128x512xf32>, vector<512x128xf32>, vector<128x128xf32> -> vector<128x128xf32>
    %c0_6 = arith.constant 0 : index
    %c0_7 = arith.constant 0 : index
    %15 = vector.load %arg2[%c0_6, %c0_7] : memref<1x512xi32, #tpu.memory_space<vmem>>, vector<1x512xi32>
    %c0_8 = arith.constant 0 : index
    %c0_9 = arith.constant 0 : index
    %16 = vector.load %arg3[%c0_8, %c0_9] : memref<512x1xi32, #tpu.memory_space<vmem>>, vector<512x1xi32>
    %17 = tpu.iota {dimensions = array<i32: 0>} : vector<128x512xi32>
    %18 = vector.broadcast %15 : vector<1x512xi32> to vector<128x512xi32>
    %19 = arith.cmpi eq, %17, %18 : vector<128x512xi32>
    %20 = arith.extui %19 : vector<128x512xi1> to vector<128x512xi32>
    %21 = arith.sitofp %20 : vector<128x512xi32> to vector<128x512xf32>
    %22 = tpu.iota {dimensions = array<i32: 1>} : vector<512x128xi32>
    %23 = vector.broadcast %16 : vector<512x1xi32> to vector<512x128xi32>
    %24 = arith.cmpi eq, %23, %22 : vector<512x128xi32>
    %25 = arith.extui %24 : vector<512x128xi1> to vector<512x128xi32>
    %26 = arith.sitofp %25 : vector<512x128xi32> to vector<512x128xf32>
    %cst_10 = arith.constant dense<0.000000e+00> : vector<128x128xf32>
    %27 = tpu.matmul %21, %26, %cst_10 {dimension_numbers = #tpu.dot_dimension_numbers<[1], [0], [0], [1], [0, 0, 1, 1], [], []>} : vector<128x512xf32>, vector<512x128xf32>, vector<128x128xf32> -> vector<128x128xf32>
    %28 = tpu.iota {dimensions = array<i32: 0>} : vector<128x128xi32>
    %29 = tpu.iota {dimensions = array<i32: 1>} : vector<128x128xi32>
    %30 = arith.cmpi eq, %28, %29 : vector<128x128xi32>
    %cst_11 = arith.constant 1.000000e+00 : f32
    %31 = vector.broadcast %cst_11 : f32 to vector<128x128xf32>
    %32 = arith.maximumf %27, %31 : vector<128x128xf32>
    %33 = arith.select %30, %32, %27 : vector<128x128xi1>, vector<128x128xf32>
    %c0_12 = arith.constant 0 : index
    %c0_13 = arith.constant 0 : index
    %34 = vector.load %arg5[%c0_12, %c0_13] : memref<128x4xf32, #tpu.memory_space<vmem>>, vector<128x4xf32>
    %cst_14 = arith.constant dense<0.000000e+00> : vector<128x4xf32>
    %35 = tpu.matmul %14, %34, %cst_14 {dimension_numbers = #tpu.dot_dimension_numbers<[1], [0], [0], [1], [0, 0, 1, 1], [], []>} : vector<128x128xf32>, vector<128x4xf32>, vector<128x4xf32> -> vector<128x4xf32>
    %c0_15 = arith.constant 0 : index
    %c0_16 = arith.constant 0 : index
    %36 = vector.load %arg6[%c0_15, %c0_16] : memref<4x128xf32, #tpu.memory_space<vmem>>, vector<4x128xf32>
    %37 = tpu.transpose %14, [1, 0] : vector<128x128xf32> -> vector<128x128xf32>
    %cst_17 = arith.constant dense<0.000000e+00> : vector<4x128xf32>
    %38 = tpu.matmul %36, %37, %cst_17 {dimension_numbers = #tpu.dot_dimension_numbers<[1], [0], [0], [1], [0, 0, 1, 1], [], []>} : vector<4x128xf32>, vector<128x128xf32>, vector<4x128xf32> -> vector<4x128xf32>
    %39 = vector.extract_strided_slice %35 {offsets = [0, 0], sizes = [128, 1], strides = [1, 1]} : vector<128x4xf32> to vector<128x1xf32>
    %40 = vector.extract_strided_slice %38 {offsets = [0, 0], sizes = [1, 128], strides = [1, 1]} : vector<4x128xf32> to vector<1x128xf32>
    %41 = vector.broadcast %39 : vector<128x1xf32> to vector<128x128xf32>
    %42 = vector.broadcast %40 : vector<1x128xf32> to vector<128x128xf32>
    %43 = arith.addf %41, %42 : vector<128x128xf32>
    %cst_18 = arith.constant 0.000000e+00 : f32
    %44 = vector.broadcast %cst_18 : f32 to vector<128x128xf32>
    %45 = arith.cmpf oge, %43, %44 : vector<128x128xf32>
    %cst_19 = arith.constant 2.000000e-01 : f32
    %46 = vector.broadcast %cst_19 : f32 to vector<128x128xf32>
    %47 = arith.mulf %46, %43 : vector<128x128xf32>
    %48 = arith.select %45, %43, %47 : vector<128x128xi1>, vector<128x128xf32>
    %cst_20 = arith.constant 0.000000e+00 : f32
    %49 = vector.broadcast %cst_20 : f32 to vector<128x128xf32>
    %50 = arith.cmpf ogt, %33, %49 : vector<128x128xf32>
    %cst_21 = arith.constant -1.000000e+30 : f32
    %51 = vector.broadcast %cst_21 : f32 to vector<128x128xf32>
    %52 = arith.select %50, %48, %51 : vector<128x128xi1>, vector<128x128xf32>
    %cst_22 = arith.constant dense<0xFF800000> : vector<128xf32>
    %53 = vector.multi_reduction <maximumf>, %52, %cst_22 [1] : vector<128x128xf32> to vector<128xf32>
    %54 = vector.shape_cast %53 : vector<128xf32> to vector<128x1xf32>
    %55 = vector.broadcast %54 : vector<128x1xf32> to vector<128x128xf32>
    %56 = arith.subf %52, %55 : vector<128x128xf32>
    %57 = math.exp %56 : vector<128x128xf32>
    %58 = arith.mulf %57, %33 : vector<128x128xf32>
    %cst_23 = arith.constant dense<0.000000e+00> : vector<128xf32>
    %59 = vector.multi_reduction <add>, %58, %cst_23 [1] : vector<128x128xf32> to vector<128xf32>
    %60 = vector.shape_cast %59 : vector<128xf32> to vector<128x1xf32>
    %61 = vector.broadcast %60 : vector<128x1xf32> to vector<128x128xf32>
    %62 = arith.divf %58, %61 : vector<128x128xf32>
    %63 = vector.extract_strided_slice %14 {offsets = [0, 0], sizes = [128, 32], strides = [1, 1]} : vector<128x128xf32> to vector<128x32xf32>
    %cst_24 = arith.constant dense<0.000000e+00> : vector<128x32xf32>
    %64 = tpu.matmul %62, %63, %cst_24 {dimension_numbers = #tpu.dot_dimension_numbers<[1], [0], [0], [1], [0, 0, 1, 1], [], []>} : vector<128x128xf32>, vector<128x32xf32>, vector<128x32xf32> -> vector<128x32xf32>
    %65 = vector.extract_strided_slice %35 {offsets = [0, 1], sizes = [128, 1], strides = [1, 1]} : vector<128x4xf32> to vector<128x1xf32>
    %66 = vector.extract_strided_slice %38 {offsets = [1, 0], sizes = [1, 128], strides = [1, 1]} : vector<4x128xf32> to vector<1x128xf32>
    %67 = vector.broadcast %65 : vector<128x1xf32> to vector<128x128xf32>
    %68 = vector.broadcast %66 : vector<1x128xf32> to vector<128x128xf32>
    %69 = arith.addf %67, %68 : vector<128x128xf32>
    %cst_25 = arith.constant 0.000000e+00 : f32
    %70 = vector.broadcast %cst_25 : f32 to vector<128x128xf32>
    %71 = arith.cmpf oge, %69, %70 : vector<128x128xf32>
    %cst_26 = arith.constant 2.000000e-01 : f32
    %72 = vector.broadcast %cst_26 : f32 to vector<128x128xf32>
    %73 = arith.mulf %72, %69 : vector<128x128xf32>
    %74 = arith.select %71, %69, %73 : vector<128x128xi1>, vector<128x128xf32>
    %cst_27 = arith.constant 0.000000e+00 : f32
    %75 = vector.broadcast %cst_27 : f32 to vector<128x128xf32>
    %76 = arith.cmpf ogt, %33, %75 : vector<128x128xf32>
    %cst_28 = arith.constant -1.000000e+30 : f32
    %77 = vector.broadcast %cst_28 : f32 to vector<128x128xf32>
    %78 = arith.select %76, %74, %77 : vector<128x128xi1>, vector<128x128xf32>
    %cst_29 = arith.constant dense<0xFF800000> : vector<128xf32>
    %79 = vector.multi_reduction <maximumf>, %78, %cst_29 [1] : vector<128x128xf32> to vector<128xf32>
    %80 = vector.shape_cast %79 : vector<128xf32> to vector<128x1xf32>
    %81 = vector.broadcast %80 : vector<128x1xf32> to vector<128x128xf32>
    %82 = arith.subf %78, %81 : vector<128x128xf32>
    %83 = math.exp %82 : vector<128x128xf32>
    %84 = arith.mulf %83, %33 : vector<128x128xf32>
    %cst_30 = arith.constant dense<0.000000e+00> : vector<128xf32>
    %85 = vector.multi_reduction <add>, %84, %cst_30 [1] : vector<128x128xf32> to vector<128xf32>
    %86 = vector.shape_cast %85 : vector<128xf32> to vector<128x1xf32>
    %87 = vector.broadcast %86 : vector<128x1xf32> to vector<128x128xf32>
    %88 = arith.divf %84, %87 : vector<128x128xf32>
    %89 = vector.extract_strided_slice %14 {offsets = [0, 32], sizes = [128, 32], strides = [1, 1]} : vector<128x128xf32> to vector<128x32xf32>
    %cst_31 = arith.constant dense<0.000000e+00> : vector<128x32xf32>
    %90 = tpu.matmul %88, %89, %cst_31 {dimension_numbers = #tpu.dot_dimension_numbers<[1], [0], [0], [1], [0, 0, 1, 1], [], []>} : vector<128x128xf32>, vector<128x32xf32>, vector<128x32xf32> -> vector<128x32xf32>
    %91 = vector.extract_strided_slice %35 {offsets = [0, 2], sizes = [128, 1], strides = [1, 1]} : vector<128x4xf32> to vector<128x1xf32>
    %92 = vector.extract_strided_slice %38 {offsets = [2, 0], sizes = [1, 128], strides = [1, 1]} : vector<4x128xf32> to vector<1x128xf32>
    %93 = vector.broadcast %91 : vector<128x1xf32> to vector<128x128xf32>
    %94 = vector.broadcast %92 : vector<1x128xf32> to vector<128x128xf32>
    %95 = arith.addf %93, %94 : vector<128x128xf32>
    %cst_32 = arith.constant 0.000000e+00 : f32
    %96 = vector.broadcast %cst_32 : f32 to vector<128x128xf32>
    %97 = arith.cmpf oge, %95, %96 : vector<128x128xf32>
    %cst_33 = arith.constant 2.000000e-01 : f32
    %98 = vector.broadcast %cst_33 : f32 to vector<128x128xf32>
    %99 = arith.mulf %98, %95 : vector<128x128xf32>
    %100 = arith.select %97, %95, %99 : vector<128x128xi1>, vector<128x128xf32>
    %cst_34 = arith.constant 0.000000e+00 : f32
    %101 = vector.broadcast %cst_34 : f32 to vector<128x128xf32>
    %102 = arith.cmpf ogt, %33, %101 : vector<128x128xf32>
    %cst_35 = arith.constant -1.000000e+30 : f32
    %103 = vector.broadcast %cst_35 : f32 to vector<128x128xf32>
    %104 = arith.select %102, %100, %103 : vector<128x128xi1>, vector<128x128xf32>
    %cst_36 = arith.constant dense<0xFF800000> : vector<128xf32>
    %105 = vector.multi_reduction <maximumf>, %104, %cst_36 [1] : vector<128x128xf32> to vector<128xf32>
    %106 = vector.shape_cast %105 : vector<128xf32> to vector<128x1xf32>
    %107 = vector.broadcast %106 : vector<128x1xf32> to vector<128x128xf32>
    %108 = arith.subf %104, %107 : vector<128x128xf32>
    %109 = math.exp %108 : vector<128x128xf32>
    %110 = arith.mulf %109, %33 : vector<128x128xf32>
    %cst_37 = arith.constant dense<0.000000e+00> : vector<128xf32>
    %111 = vector.multi_reduction <add>, %110, %cst_37 [1] : vector<128x128xf32> to vector<128xf32>
    %112 = vector.shape_cast %111 : vector<128xf32> to vector<128x1xf32>
    %113 = vector.broadcast %112 : vector<128x1xf32> to vector<128x128xf32>
    %114 = arith.divf %110, %113 : vector<128x128xf32>
    %115 = vector.extract_strided_slice %14 {offsets = [0, 64], sizes = [128, 32], strides = [1, 1]} : vector<128x128xf32> to vector<128x32xf32>
    %cst_38 = arith.constant dense<0.000000e+00> : vector<128x32xf32>
    %116 = tpu.matmul %114, %115, %cst_38 {dimension_numbers = #tpu.dot_dimension_numbers<[1], [0], [0], [1], [0, 0, 1, 1], [], []>} : vector<128x128xf32>, vector<128x32xf32>, vector<128x32xf32> -> vector<128x32xf32>
    %117 = vector.extract_strided_slice %35 {offsets = [0, 3], sizes = [128, 1], strides = [1, 1]} : vector<128x4xf32> to vector<128x1xf32>
    %118 = vector.extract_strided_slice %38 {offsets = [3, 0], sizes = [1, 128], strides = [1, 1]} : vector<4x128xf32> to vector<1x128xf32>
    %119 = vector.broadcast %117 : vector<128x1xf32> to vector<128x128xf32>
    %120 = vector.broadcast %118 : vector<1x128xf32> to vector<128x128xf32>
    %121 = arith.addf %119, %120 : vector<128x128xf32>
    %cst_39 = arith.constant 0.000000e+00 : f32
    %122 = vector.broadcast %cst_39 : f32 to vector<128x128xf32>
    %123 = arith.cmpf oge, %121, %122 : vector<128x128xf32>
    %cst_40 = arith.constant 2.000000e-01 : f32
    %124 = vector.broadcast %cst_40 : f32 to vector<128x128xf32>
    %125 = arith.mulf %124, %121 : vector<128x128xf32>
    %126 = arith.select %123, %121, %125 : vector<128x128xi1>, vector<128x128xf32>
    %cst_41 = arith.constant 0.000000e+00 : f32
    %127 = vector.broadcast %cst_41 : f32 to vector<128x128xf32>
    %128 = arith.cmpf ogt, %33, %127 : vector<128x128xf32>
    %cst_42 = arith.constant -1.000000e+30 : f32
    %129 = vector.broadcast %cst_42 : f32 to vector<128x128xf32>
    %130 = arith.select %128, %126, %129 : vector<128x128xi1>, vector<128x128xf32>
    %cst_43 = arith.constant dense<0xFF800000> : vector<128xf32>
    %131 = vector.multi_reduction <maximumf>, %130, %cst_43 [1] : vector<128x128xf32> to vector<128xf32>
    %132 = vector.shape_cast %131 : vector<128xf32> to vector<128x1xf32>
    %133 = vector.broadcast %132 : vector<128x1xf32> to vector<128x128xf32>
    %134 = arith.subf %130, %133 : vector<128x128xf32>
    %135 = math.exp %134 : vector<128x128xf32>
    %136 = arith.mulf %135, %33 : vector<128x128xf32>
    %cst_44 = arith.constant dense<0.000000e+00> : vector<128xf32>
    %137 = vector.multi_reduction <add>, %136, %cst_44 [1] : vector<128x128xf32> to vector<128xf32>
    %138 = vector.shape_cast %137 : vector<128xf32> to vector<128x1xf32>
    %139 = vector.broadcast %138 : vector<128x1xf32> to vector<128x128xf32>
    %140 = arith.divf %136, %139 : vector<128x128xf32>
    %141 = vector.extract_strided_slice %14 {offsets = [0, 96], sizes = [128, 32], strides = [1, 1]} : vector<128x128xf32> to vector<128x32xf32>
    %cst_45 = arith.constant dense<0.000000e+00> : vector<128x32xf32>
    %142 = tpu.matmul %140, %141, %cst_45 {dimension_numbers = #tpu.dot_dimension_numbers<[1], [0], [0], [1], [0, 0, 1, 1], [], []>} : vector<128x128xf32>, vector<128x32xf32>, vector<128x32xf32> -> vector<128x32xf32>
    %143 = tpu.concatenate %64, %90, %116, %142 in 1 : vector<128x32xf32>, vector<128x32xf32>, vector<128x32xf32>, vector<128x32xf32> -> vector<128x128xf32>
    %c0_46 = arith.constant 0 : index
    %c0_47 = arith.constant 0 : index
    %144 = vector.load %arg7[%c0_46, %c0_47] : memref<1x128xf32, #tpu.memory_space<vmem>>, vector<1x128xf32>
    %145 = vector.broadcast %144 : vector<1x128xf32> to vector<128x128xf32>
    %146 = arith.addf %143, %145 : vector<128x128xf32>
    %cst_48 = arith.constant 0.000000e+00 : f32
    %147 = vector.broadcast %cst_48 : f32 to vector<128x128xf32>
    %148 = arith.cmpf ogt, %146, %147 : vector<128x128xf32>
    %149 = math.exp %146 : vector<128x128xf32>
    %cst_49 = arith.constant 1.000000e+00 : f32
    %150 = vector.broadcast %cst_49 : f32 to vector<128x128xf32>
    %151 = arith.subf %149, %150 : vector<128x128xf32>
    %152 = arith.select %148, %146, %151 : vector<128x128xi1>, vector<128x128xf32>
    %c0_50 = arith.constant 0 : index
    %c0_51 = arith.constant 0 : index
    %153 = vector.load %arg8[%c0_50, %c0_51] : memref<128x128xf32, #tpu.memory_space<vmem>>, vector<128x128xf32>
    tpu.vector_store %arg8[%c0_50, %c0_51], %152 {strides = array<i32>} : memref<128x128xf32, #tpu.memory_space<vmem>>, vector<128x128xf32>,
    return
  }
}

</mosaic_0001>

<bundles_post_ra>
// kernel: tpu_custom_call.1
= control target key start
LH: loop header
LB: loop body
LE: loop exit
PB: predicated region body
PF: predicated region fallthrough
CT: control target
= control target key end

     0   :  { %v10775_v2 = vmov 0   ;;  %s10766_s0 = inlined_call_operand.vmem [shape: s32[1,512], index: 0, kind: input, shape index: {}]   ;;  %s10767_s1 = inlined_call_operand.vmem [shape: s32[512,1], index: 1, kind: input, shape index: {}]   ;;  %s10768_s2 = inlined_call_operand.vmem [shape: s32[1,512], index: 2, kind: input, shape index: {}]   ;;  %s10769_s3 = inlined_call_operand.vmem [shape: s32[512,1], index: 3, kind: input, shape index: {}]   ;;  %s10770_s4 = inlined_call_operand.vmem [shape: f32[64,128], index: 4, kind: input, shape index: {}]   ;;  %s10771_s5 = inlined_call_operand.vmem [shape: f32[128,4], index: 5, kind: input, shape index: {}]   ;;  %s10772_s6 = inlined_call_operand.vmem [shape: f32[4,128], index: 6, kind: input, shape index: {}]   ;;  %s10773_s7 = inlined_call_operand.vmem [shape: f32[1,128], index: 7, kind: input, shape index: {}]   ;;  %s10774_s8 = inlined_call_operand.hbm [shape: f32[128,128], index: 8, kind: output, shape index: {}]  }
   0x1   :  { %v32_v0 = vld [vmem:[%s10767_s1 + $0x10] sm:$0xff]  ;;  %v30_v1 = vld [vmem:[%s10767_s1] sm:$0xff]  ;;  %7075 = vset.pattern.permute.xlu1 %v10775_v2  ;;  %7074 = vset.pattern.permute.xlu0 %v10775_v2  ;;  %v33_v3 = vld [vmem:[%s10767_s1 + $0x18] sm:$0xff] }
   0x2   :  { %103 = vperm.xlu1 %7075, %v32_v0   ;;  %97 = vperm.xlu0 %7074, %v30_v1   ;;  %v31_v4 = vld [vmem:[%s10767_s1 + $0x8] sm:$0xff]  ;;  %v34_v6 = vld [vmem:[%s10767_s1 + $0x20] sm:$0xff]  ;;  %v37_v7 = vld [vmem:[%s10767_s1 + $0x38] sm:$0xff] }
   0x3   :  { %v35_v5 = vld [vmem:[%s10767_s1 + $0x28] sm:$0xff]  ;;  %v36_v8 = vld [vmem:[%s10767_s1 + $0x30] sm:$0xff]  ;;  %v38_v10 = vld [vmem:[%s10767_s1 + $0x40] sm:$0xff] }
   0x4   :  { %v39_v9 = vld [vmem:[%s10767_s1 + $0x48] sm:$0xff]  ;;  %v41_v11 = vld [vmem:[%s10767_s1 + $0x58] sm:$0xff]  ;;  %v40_v12 = vld [vmem:[%s10767_s1 + $0x50] sm:$0xff] }
   0x5   :  { %v480_v13 = vld [vmem:[%s10770_s4] sm:$0xff]  ;;  %v481_v14 = vld [vmem:[%s10770_s4 + $0x8] sm:$0xff]  ;;  %v482_v16 = vld [vmem:[%s10770_s4 + $0x10] sm:$0xff] }
   0x6   :  { %106 = vperm.xlu1 %7075, %v33_v3   ;;  %100 = vperm.xlu0 %7074, %v31_v4   ;;  %v6715_v15 = vpack.c.bf16 %v481_v14, %v480_v13  ;;  %v483_v17 = vld [vmem:[%s10770_s4 + $0x18] sm:$0xff]  ;;  %v484_v19 = vld [vmem:[%s10770_s4 + $0x20] sm:$0xff]  ;;  %v43_v20 = vld [vmem:[%s10767_s1 + $0x68] sm:$0xff] }
   0x7   :  { %v6719_v18 = vpack.c.bf16 %v483_v17, %v482_v16  ;;  %v42_v21 = vld [vmem:[%s10767_s1 + $0x60] sm:$0xff]  ;;  %v485_v22 = vld [vmem:[%s10770_s4 + $0x28] sm:$0xff]  ;;  %v486_v24 = vld [vmem:[%s10770_s4 + $0x30] sm:$0xff] }
   0x8   :  { %6716 = vmatprep.subr.bf16.mxu0 %v6715_v15  ;;  %v6723_v23 = vpack.c.bf16 %v485_v22, %v484_v19  ;;  %v487_v25 = vld [vmem:[%s10770_s4 + $0x38] sm:$0xff]  ;;  %v44_v27 = vld [vmem:[%s10767_s1 + $0x70] sm:$0xff] }
   0x9   :  { %6718 = vmatpush3.bf16.msra.mxu0 %v6715_v15  ;;  %v45_v26 = vld [vmem:[%s10767_s1 + $0x78] sm:$0xff] }
   0xa   :  { %112 = vperm.xlu1 %7075, %v35_v5   ;;  %109 = vperm.xlu0 %7074, %v34_v6  }
   0xb   :  { %6720 = vmatprep.subr.bf16.mxu0 %v6719_v18 }
   0xd   :  { %6722 = vmatpush3.bf16.msra.mxu0 %v6719_v18 }
   0xe   :  { %118 = vperm.xlu1 %7075, %v37_v7   ;;  %115 = vperm.xlu0 %7074, %v36_v8  }
  0x12   :  { %124 = vperm.xlu1 %7075, %v39_v9   ;;  %121 = vperm.xlu0 %7074, %v38_v10  }
  0x16   :  { %130 = vperm.xlu1 %7075, %v41_v11   ;;  %127 = vperm.xlu0 %7074, %v40_v12  }
  0x1a   :  { %136 = vperm.xlu1 %7075, %v43_v20   ;;  %133 = vperm.xlu0 %7074, %v42_v21  }
  0x1b   :  { %13 = vsyncpa [#allocation3], 0  ;;  %6724 = vmatprep.subr.bf16.mxu0 %v6723_v23  ;;  %v6727_v28 = vpack.c.bf16 %v487_v25, %v486_v24  ;;  %v47_v29 = vld [vmem:[%s10767_s1 + $0x88] sm:$0xff]  ;;  %v46_v30 = vld [vmem:[%s10767_s1 + $0x80] sm:$0xff]  ;;  %v94_v12 = vlaneseq  ;;  %vm488_vm0 = vcmask 523264   ;;  %v10777_v20 = vmov 0.0  }
  0x1c   :  { %6726 = vmatpush3.bf16.msra.mxu0 %v6723_v23  ;;  %v49_v31 = vld [vmem:[%s10767_s1 + $0x98] sm:$0xff]  ;;  %v48_v32 = vld [vmem:[%s10767_s1 + $0x90] sm:$0xff]  ;;  %v51_v33 = vld [vmem:[%s10767_s1 + $0xa8] sm:$0xff]  ;;  %s7574_s25 = smov 96   ;;  %s7575_s26 = smov 32  }
  0x1d   :  { %6728 = vmatprep.subr.bf16.mxu0 %v6727_v28  ;;  %v50_v34 = vld [vmem:[%s10767_s1 + $0xa0] sm:$0xff]  ;;  %v53_v35 = vld [vmem:[%s10767_s1 + $0xb8] sm:$0xff]  ;;  %v52_v36 = vld [vmem:[%s10767_s1 + $0xb0] sm:$0xff]  ;;  %v7846_v15 = vand.u32 127, %v94_v12 }
  0x1e   :  { %142 = vperm.xlu1 %7075, %v45_v26   ;;  %139 = vperm.xlu0 %7074, %v44_v27   ;;  %v55_v37 = vld [vmem:[%s10767_s1 + $0xc8] sm:$0xff]  ;;  %v54_v38 = vld [vmem:[%s10767_s1 + $0xc0] sm:$0xff]  ;;  %v57_v39 = vld [vmem:[%s10767_s1 + $0xd8] sm:$0xff] }
  0x1f   :  { %v56_v40 = vld [vmem:[%s10767_s1 + $0xd0] sm:$0xff]  ;;  %v59_v41 = vld [vmem:[%s10767_s1 + $0xe8] sm:$0xff]  ;;  %v58_v42 = vld [vmem:[%s10767_s1 + $0xe0] sm:$0xff] }
  0x20   :  { %6730 = vmatpush3.bf16.msra.mxu0 %v6727_v28  ;;  %v61_v43 = vld [vmem:[%s10767_s1 + $0xf8] sm:$0xff]  ;;  %v60_v44 = vld [vmem:[%s10767_s1 + $0xf0] sm:$0xff]  ;;  %v63_v45 = vld [vmem:[%s10767_s1 + $0x108] sm:$0xff] }
  0x21   :  { %v62_v46 = vld [vmem:[%s10767_s1 + $0x100] sm:$0xff]  ;;  %v65_v47 = vld [vmem:[%s10767_s1 + $0x118] sm:$0xff]  ;;  %v64_v48 = vld [vmem:[%s10767_s1 + $0x110] sm:$0xff] }
  0x22   :  { %148 = vperm.xlu1 %7075, %v47_v29   ;;  %145 = vperm.xlu0 %7074, %v46_v30   ;;  %v67_v49 = vld [vmem:[%s10767_s1 + $0x128] sm:$0xff]  ;;  %v66_v50 = vld [vmem:[%s10767_s1 + $0x120] sm:$0xff]  ;;  %v69_v51 = vld [vmem:[%s10767_s1 + $0x138] sm:$0xff] }
  0x23   :  { %v68_v52 = vld [vmem:[%s10767_s1 + $0x130] sm:$0xff]  ;;  %v71_v53 = vld [vmem:[%s10767_s1 + $0x148] sm:$0xff]  ;;  %v70_v54 = vld [vmem:[%s10767_s1 + $0x140] sm:$0xff] }
  0x24   :  { %v73_v55 = vld [vmem:[%s10767_s1 + $0x158] sm:$0xff]  ;;  %v72_v56 = vld [vmem:[%s10767_s1 + $0x150] sm:$0xff]  ;;  %v75_v57 = vld [vmem:[%s10767_s1 + $0x168] sm:$0xff] }
  0x25   :  { %v74_v58 = vld [vmem:[%s10767_s1 + $0x160] sm:$0xff]  ;;  %v77_v59 = vld [vmem:[%s10767_s1 + $0x178] sm:$0xff]  ;;  %v76_v60 = vld [vmem:[%s10767_s1 + $0x170] sm:$0xff] }
  0x26   :  { %154 = vperm.xlu1 %7075, %v49_v31   ;;  %151 = vperm.xlu0 %7074, %v48_v32   ;;  %v79_v61 = vld [vmem:[%s10767_s1 + $0x188] sm:$0xff]  ;;  %v78_v62 = vld [vmem:[%s10767_s1 + $0x180] sm:$0xff]  ;;  %v81_v63 = vld [vmem:[%s10767_s1 + $0x198] sm:$0xff] }
  0x27   :  { %v80_v0 = vld [vmem:[%s10767_s1 + $0x190] sm:$0xff]  ;;  %v83_v1 = vld [vmem:[%s10767_s1 + $0x1a8] sm:$0xff]  ;;  %v82_v3 = vld [vmem:[%s10767_s1 + $0x1a0] sm:$0xff] }
  0x28   :  { %v85_v4 = vld [vmem:[%s10767_s1 + $0x1b8] sm:$0xff]  ;;  %v84_v5 = vld [vmem:[%s10767_s1 + $0x1b0] sm:$0xff]  ;;  %v87_v6 = vld [vmem:[%s10767_s1 + $0x1c8] sm:$0xff] }
  0x29   :  { %v86_v7 = vld [vmem:[%s10767_s1 + $0x1c0] sm:$0xff]  ;;  %v89_v8 = vld [vmem:[%s10767_s1 + $0x1d8] sm:$0xff]  ;;  %v88_v9 = vld [vmem:[%s10767_s1 + $0x1d0] sm:$0xff] }
  0x2a   :  { %160 = vperm.xlu1 %7075, %v51_v33   ;;  %157 = vperm.xlu0 %7074, %v50_v34   ;;  %v91_v10 = vld [vmem:[%s10767_s1 + $0x1e8] sm:$0xff]  ;;  %v90_v11 = vld [vmem:[%s10767_s1 + $0x1e0] sm:$0xff]  ;;  %v93_v13 = vld [vmem:[%s10767_s1 + $0x1f8] sm:$0xff] }
  0x2b   :  { %v92_v14 = vld [vmem:[%s10767_s1 + $0x1f0] sm:$0xff]  ;;  %v1584_v16 = vld [vmem:[%s10769_s3 + $0x8] sm:$0xff]  ;;  %v1583_v17 = vld [vmem:[%s10769_s3] sm:$0xff] }
  0x2c   :  { %v1586_v22 = vld [vmem:[%s10769_s3 + $0x18] sm:$0xff]  ;;  %v1585_v23 = vld [vmem:[%s10769_s3 + $0x10] sm:$0xff]  ;;  %v1588_v28 = vld [vmem:[%s10769_s3 + $0x28] sm:$0xff] }
  0x2d   :  { %v1587_v29 = vld [vmem:[%s10769_s3 + $0x20] sm:$0xff]  ;;  %v1590_v34 = vld [vmem:[%s10769_s3 + $0x38] sm:$0xff] }
  0x2e   :  { %166 = vperm.xlu1 %7075, %v53_v35   ;;  %163 = vperm.xlu0 %7074, %v52_v36   ;;  %v1589_v35 = vld [vmem:[%s10769_s3 + $0x30] sm:$0xff] }
  0x32   :  { %172 = vperm.xlu1 %7075, %v55_v37   ;;  %169 = vperm.xlu0 %7074, %v54_v38  }
  0x36   :  { %178 = vperm.xlu1 %7075, %v57_v39   ;;  %175 = vperm.xlu0 %7074, %v56_v40   ;;  %v1592_v40 = vld [vmem:[%s10769_s3 + $0x48] sm:$0xff] }
  0x3a   :  { %184 = vperm.xlu1 %7075, %v59_v41   ;;  %181 = vperm.xlu0 %7074, %v58_v42   ;;  %v1591_v41 = vld [vmem:[%s10769_s3 + $0x40] sm:$0xff] }
  0x3e   :  { %190 = vperm.xlu1 %7075, %v61_v43   ;;  %187 = vperm.xlu0 %7074, %v60_v44  }
  0x42   :  { %196 = vperm.xlu1 %7075, %v63_v45   ;;  %193 = vperm.xlu0 %7074, %v62_v46   ;;  %v1594_v46 = vld [vmem:[%s10769_s3 + $0x58] sm:$0xff] }
  0x46   :  { %202 = vperm.xlu1 %7075, %v65_v47   ;;  %199 = vperm.xlu0 %7074, %v64_v48   ;;  %v1593_v47 = vld [vmem:[%s10769_s3 + $0x50] sm:$0xff] }
  0x4a   :  { %208 = vperm.xlu1 %7075, %v67_v49   ;;  %205 = vperm.xlu0 %7074, %v66_v50  }
  0x4e   :  { %214 = vperm.xlu1 %7075, %v69_v51   ;;  %211 = vperm.xlu0 %7074, %v68_v52   ;;  %v1596_v52 = vld [vmem:[%s10769_s3 + $0x68] sm:$0xff] }
  0x52   :  { %220 = vperm.xlu1 %7075, %v71_v53   ;;  %217 = vperm.xlu0 %7074, %v70_v54   ;;  %v1595_v53 = vld [vmem:[%s10769_s3 + $0x60] sm:$0xff] }
  0x56   :  { %226 = vperm.xlu1 %7075, %v73_v55   ;;  %223 = vperm.xlu0 %7074, %v72_v56  }
  0x5a   :  { %232 = vperm.xlu1 %7075, %v75_v57   ;;  %229 = vperm.xlu0 %7074, %v74_v58   ;;  %v1598_v58 = vld [vmem:[%s10769_s3 + $0x78] sm:$0xff] }
  0x5e   :  { %238 = vperm.xlu1 %7075, %v77_v59   ;;  %235 = vperm.xlu0 %7074, %v76_v60   ;;  %v1597_v59 = vld [vmem:[%s10769_s3 + $0x70] sm:$0xff] }
  0x62   :  { %244 = vperm.xlu1 %7075, %v79_v61   ;;  %241 = vperm.xlu0 %7074, %v78_v62  }
  0x66   :  { %250 = vperm.xlu1 %7075, %v81_v63   ;;  %247 = vperm.xlu0 %7074, %v80_v0   ;;  %v1600_v0 = vld [vmem:[%s10769_s3 + $0x88] sm:$0xff] }
  0x6a   :  { %256 = vperm.xlu1 %7075, %v83_v1   ;;  %253 = vperm.xlu0 %7074, %v82_v3   ;;  %v1599_v1 = vld [vmem:[%s10769_s3 + $0x80] sm:$0xff] }
  0x6e   :  { %262 = vperm.xlu1 %7075, %v85_v4   ;;  %259 = vperm.xlu0 %7074, %v84_v5  }
  0x72   :  { %268 = vperm.xlu1 %7075, %v87_v6   ;;  %265 = vperm.xlu0 %7074, %v86_v7   ;;  %v1602_v7 = vld [vmem:[%s10769_s3 + $0x98] sm:$0xff] }
  0x76   :  { %274 = vperm.xlu1 %7075, %v89_v8   ;;  %271 = vperm.xlu0 %7074, %v88_v9   ;;  %v1601_v8 = vld [vmem:[%s10769_s3 + $0x90] sm:$0xff] }
  0x7a   :  { %280 = vperm.xlu1 %7075, %v91_v10   ;;  %277 = vperm.xlu0 %7074, %v90_v11  }
  0x7e   :  { %286 = vperm.xlu1 %7075, %v93_v13   ;;  %283 = vperm.xlu0 %7074, %v92_v14   ;;  %v1604_v14 = vld [vmem:[%s10769_s3 + $0xa8] sm:$0xff] }
  0x81   :  { %v104_v18 = vpop.permute.xlu1 %103  ;;  %v98_v19 = vpop.permute.xlu0 %97 }
  0x82   :  { %1859 = vperm.xlu1 %7075, %v1584_v16   ;;  %1856 = vperm.xlu0 %7074, %v1583_v17   ;;  %vm288_vm1 = vcmp.eq.s32.totalorder %v98_v19, %v7846_v15  ;;  %vm290_vm2 = vcmp.eq.s32.totalorder %v104_v18, %v7846_v15  ;;  %v1603_v16 = vld [vmem:[%s10769_s3 + $0xa0] sm:$0xff] }
  0x83   :  { %v5190_v21 = vsel %vm288_vm1, 1.0, %v10777_v20  ;;  %v5192_v26 = vsel %vm290_vm2, 1.0, %v10777_v20 }
  0x84   :  { %6304 = vmatprep.mubr.msk.f32.mxu0 %vm488_vm0, %v5190_v21 }
  0x85   :  { %v107_v24 = vpop.permute.xlu1 %106  ;;  %v101_v25 = vpop.permute.xlu0 %100 }
  0x86   :  { %vm289_vm3 = vcmp.eq.s32.totalorder %v101_v25, %v7846_v15  ;;  %1865 = vperm.xlu1 %7075, %v1586_v22   ;;  %1862 = vperm.xlu0 %7074, %v1585_v23   ;;  %vm291_vm4 = vcmp.eq.s32.totalorder %v107_v24, %v7846_v15  ;;  %v1606_v22 = vld [vmem:[%s10769_s3 + $0xb8] sm:$0xff]  ;;  %v1605_v23 = vld [vmem:[%s10769_s3 + $0xb0] sm:$0xff] }
  0x87   :  { %v5191_v27 = vsel %vm289_vm3, 1.0, %v10777_v20  ;;  %v5193_v32 = vsel %vm291_vm4, 1.0, %v10777_v20 }
  0x88   :  { %6305 = vmatmul.mubr.msk.f32.vlgmr.msra.gmra.mrb[0].mxu0 %vm488_vm0, %v5191_v27 }
  0x89   :  { %v113_v30 = vpop.permute.xlu1 %112  ;;  %6307 = vmatprep.mubr.msk.f32.mxu0 %vm488_vm0, %v5192_v26  ;;  %v110_v31 = vpop.permute.xlu0 %109 }
  0x8a   :  { %vm292_vm5 = vcmp.eq.s32.totalorder %v110_v31, %v7846_v15  ;;  %1871 = vperm.xlu1 %7075, %v1588_v28   ;;  %1868 = vperm.xlu0 %7074, %v1587_v29   ;;  %vm293_vm6 = vcmp.eq.s32.totalorder %v113_v30, %v7846_v15  ;;  %v1608_v28 = vld [vmem:[%s10769_s3 + $0xc8] sm:$0xff]  ;;  %v1607_v29 = vld [vmem:[%s10769_s3 + $0xc0] sm:$0xff] }
  0x8b   :  { %v5194_v33 = vsel %vm292_vm5, 1.0, %v10777_v20  ;;  %v5195_v38 = vsel %vm293_vm6, 1.0, %v10777_v20 }
  0x8c   :  { %6308 = vmatmul.mubr.msk.f32.gmra.mrb[2].mxu0 %vm488_vm0, %v5193_v32 }
  0x8d   :  { %v119_v36 = vpop.permute.xlu1 %118  ;;  %6310 = vmatprep.mubr.msk.f32.mxu0 %vm488_vm0, %v5194_v33  ;;  %v116_v37 = vpop.permute.xlu0 %115 }
  0x8e   :  { %vm294_vm7 = vcmp.eq.s32.totalorder %v116_v37, %v7846_v15  ;;  %1877 = vperm.xlu1 %7075, %v1590_v34   ;;  %1874 = vperm.xlu0 %7074, %v1589_v35   ;;  %vm295_vm8 = vcmp.eq.s32.totalorder %v119_v36, %v7846_v15  ;;  %v1610_v34 = vld [vmem:[%s10769_s3 + $0xd8] sm:$0xff]  ;;  %v1609_v35 = vld [vmem:[%s10769_s3 + $0xd0] sm:$0xff] }
  0x8f   :  { %v5196_v39 = vsel %vm294_vm7, 1.0, %v10777_v20  ;;  %v5197_v44 = vsel %vm295_vm8, 1.0, %v10777_v20 }
  0x90   :  { %6311 = vmatmul.mubr.msk.f32.gmra.mrb[4].mxu0 %vm488_vm0, %v5195_v38 }
  0x91   :  { %v125_v42 = vpop.permute.xlu1 %124  ;;  %6313 = vmatprep.mubr.msk.f32.mxu0 %vm488_vm0, %v5196_v39  ;;  %v122_v43 = vpop.permute.xlu0 %121 }
  0x92   :  { %vm296_vm9 = vcmp.eq.s32.totalorder %v122_v43, %v7846_v15  ;;  %1883 = vperm.xlu1 %7075, %v1592_v40   ;;  %1880 = vperm.xlu0 %7074, %v1591_v41   ;;  %vm297_vm10 = vcmp.eq.s32.totalorder %v125_v42, %v7846_v15  ;;  %v1612_v40 = vld [vmem:[%s10769_s3 + $0xe8] sm:$0xff]  ;;  %v1611_v41 = vld [vmem:[%s10769_s3 + $0xe0] sm:$0xff] }
  0x93   :  { %v5198_v45 = vsel %vm296_vm9, 1.0, %v10777_v20  ;;  %v5199_v50 = vsel %vm297_vm10, 1.0, %v10777_v20 }
  0x94   :  { %6314 = vmatmul.mubr.msk.f32.gmra.mrb[6].mxu0 %vm488_vm0, %v5197_v44 }
  0x95   :  { %v131_v48 = vpop.permute.xlu1 %130  ;;  %6316 = vmatprep.mubr.msk.f32.mxu0 %vm488_vm0, %v5198_v45  ;;  %v128_v49 = vpop.permute.xlu0 %127 }
  0x96   :  { %vm298_vm11 = vcmp.eq.s32.totalorder %v128_v49, %v7846_v15  ;;  %1889 = vperm.xlu1 %7075, %v1594_v46   ;;  %1886 = vperm.xlu0 %7074, %v1593_v47   ;;  %vm299_vm12 = vcmp.eq.s32.totalorder %v131_v48, %v7846_v15  ;;  %v1614_v46 = vld [vmem:[%s10769_s3 + $0xf8] sm:$0xff]  ;;  %v1613_v47 = vld [vmem:[%s10769_s3 + $0xf0] sm:$0xff] }
  0x97   :  { %v5200_v51 = vsel %vm298_vm11, 1.0, %v10777_v20  ;;  %v5201_v56 = vsel %vm299_vm12, 1.0, %v10777_v20 }
  0x98   :  { %6317 = vmatmul.mubr.msk.f32.gmra.mrb[8].mxu0 %vm488_vm0, %v5199_v50 }
  0x99   :  { %v137_v54 = vpop.permute.xlu1 %136  ;;  %6319 = vmatprep.mubr.msk.f32.mxu0 %vm488_vm0, %v5200_v51  ;;  %v134_v55 = vpop.permute.xlu0 %133 }
  0x9a   :  { %vm300_vm13 = vcmp.eq.s32.totalorder %v134_v55, %v7846_v15  ;;  %1895 = vperm.xlu1 %7075, %v1596_v52   ;;  %1892 = vperm.xlu0 %7074, %v1595_v53   ;;  %vm301_vm14 = vcmp.eq.s32.totalorder %v137_v54, %v7846_v15  ;;  %v1616_v52 = vld [vmem:[%s10769_s3 + $0x108] sm:$0xff]  ;;  %v1615_v53 = vld [vmem:[%s10769_s3 + $0x100] sm:$0xff] }
  0x9b   :  { %v5202_v57 = vsel %vm300_vm13, 1.0, %v10777_v20  ;;  %v5203_v62 = vsel %vm301_vm14, 1.0, %v10777_v20 }
  0x9c   :  { %6320 = vmatmul.mubr.msk.f32.gmra.mrb[10].mxu0 %vm488_vm0, %v5201_v56 }
  0x9d   :  { %v143_v60 = vpop.permute.xlu1 %142  ;;  %6322 = vmatprep.mubr.msk.f32.mxu0 %vm488_vm0, %v5202_v57  ;;  %v140_v61 = vpop.permute.xlu0 %139 }
  0x9e   :  { %vm302_vm15 = vcmp.eq.s32.totalorder %v140_v61, %v7846_v15  ;;  %1901 = vperm.xlu1 %7075, %v1598_v58   ;;  %1898 = vperm.xlu0 %7074, %v1597_v59   ;;  %vm303_vm1 = vcmp.eq.s32.totalorder %v143_v60, %v7846_v15  ;;  %v1631_v58 = vld [vmem:[%s10769_s3 + $0x180] sm:$0xff]  ;;  %v1617_v59 = vld [vmem:[%s10769_s3 + $0x110] sm:$0xff] }
  0x9f   :  { %v5204_v63 = vsel %vm302_vm15, 1.0, %v10777_v20  ;;  %v5205_v5 = vsel %vm303_vm1, 1.0, %v10777_v20 }
  0xa0   :  { %6323 = vmatmul.mubr.msk.f32.gmra.mrb[12].mxu0 %vm488_vm0, %v5203_v62 }
  0xa1   :  { %v149_v3 = vpop.permute.xlu1 %148  ;;  %6325 = vmatprep.mubr.msk.f32.mxu0 %vm488_vm0, %v5204_v63  ;;  %v146_v4 = vpop.permute.xlu0 %145 }
  0xa2   :  { %vm304_vm2 = vcmp.eq.s32.totalorder %v146_v4, %v7846_v15  ;;  %1907 = vperm.xlu1 %7075, %v1600_v0   ;;  %1904 = vperm.xlu0 %7074, %v1599_v1   ;;  %vm305_vm3 = vcmp.eq.s32.totalorder %v149_v3, %v7846_v15  ;;  %v1633_v0 = vld [vmem:[%s10769_s3 + $0x190] sm:$0xff]  ;;  %v1632_v1 = vld [vmem:[%s10769_s3 + $0x188] sm:$0xff] }
  0xa3   :  { %v5206_v6 = vsel %vm304_vm2, 1.0, %v10777_v20  ;;  %v5207_v11 = vsel %vm305_vm3, 1.0, %v10777_v20 }
  0xa4   :  { %6326 = vmatmul.mubr.msk.f32.gmra.mrb[14].mxu0 %vm488_vm0, %v5205_v5 }
  0xa5   :  { %v155_v9 = vpop.permute.xlu1 %154  ;;  %6328 = vmatprep.mubr.msk.f32.mxu0 %vm488_vm0, %v5206_v6  ;;  %v152_v10 = vpop.permute.xlu0 %151 }
  0xa6   :  { %vm306_vm4 = vcmp.eq.s32.totalorder %v152_v10, %v7846_v15  ;;  %1913 = vperm.xlu1 %7075, %v1602_v7   ;;  %1910 = vperm.xlu0 %7074, %v1601_v8   ;;  %vm307_vm5 = vcmp.eq.s32.totalorder %v155_v9, %v7846_v15  ;;  %v1618_v7 = vld [vmem:[%s10769_s3 + $0x118] sm:$0xff] }
  0xa7   :  { %v5208_v13 = vsel %vm306_vm4, 1.0, %v10777_v20  ;;  %v5209_v19 = vsel %vm307_vm5, 1.0, %v10777_v20  ;;  %v1634_v8 = vld [vmem:[%s10769_s3 + $0x198] sm:$0xff] }
  0xa8   :  { %6329 = vmatmul.mubr.msk.f32.gmra.mrb[16].mxu0 %vm488_vm0, %v5207_v11 }
  0xa9   :  { %v161_v17 = vpop.permute.xlu1 %160  ;;  %6331 = vmatprep.mubr.msk.f32.mxu0 %vm488_vm0, %v5208_v13  ;;  %v158_v18 = vpop.permute.xlu0 %157 }
  0xaa   :  { %vm308_vm6 = vcmp.eq.s32.totalorder %v158_v18, %v7846_v15  ;;  %1919 = vperm.xlu1 %7075, %v1604_v14   ;;  %1916 = vperm.xlu0 %7074, %v1603_v16   ;;  %vm309_vm7 = vcmp.eq.s32.totalorder %v161_v17, %v7846_v15  ;;  %v1636_v14 = vld [vmem:[%s10769_s3 + $0x1a8] sm:$0xff]  ;;  %v1635_v16 = vld [vmem:[%s10769_s3 + $0x1a0] sm:$0xff] }
  0xab   :  { %v5210_v21 = vsel %vm308_vm6, 1.0, %v10777_v20  ;;  %v5211_v26 = vsel %vm309_vm7, 1.0, %v10777_v20 }
  0xac   :  { %6332 = vmatmul.mubr.msk.f32.gmra.mrb[18].mxu0 %vm488_vm0, %v5209_v19 }
  0xad   :  { %v167_v24 = vpop.permute.xlu1 %166  ;;  %6334 = vmatprep.mubr.msk.f32.mxu0 %vm488_vm0, %v5210_v21  ;;  %v164_v25 = vpop.permute.xlu0 %163 }
  0xae   :  { %vm310_vm8 = vcmp.eq.s32.totalorder %v164_v25, %v7846_v15  ;;  %1925 = vperm.xlu1 %7075, %v1606_v22   ;;  %1922 = vperm.xlu0 %7074, %v1605_v23   ;;  %vm311_vm9 = vcmp.eq.s32.totalorder %v167_v24, %v7846_v15  ;;  %v1620_v22 = vld [vmem:[%s10769_s3 + $0x128] sm:$0xff]  ;;  %v1619_v23 = vld [vmem:[%s10769_s3 + $0x120] sm:$0xff] }
  0xaf   :  { %v5212_v27 = vsel %vm310_vm8, 1.0, %v10777_v20  ;;  %v5213_v32 = vsel %vm311_vm9, 1.0, %v10777_v20 }
  0xb0   :  { %6335 = vmatmul.mubr.msk.f32.gmra.mrb[20].mxu0 %vm488_vm0, %v5211_v26 }
  0xb1   :  { %v173_v30 = vpop.permute.xlu1 %172  ;;  %6337 = vmatprep.mubr.msk.f32.mxu0 %vm488_vm0, %v5212_v27  ;;  %v170_v31 = vpop.permute.xlu0 %169 }
  0xb2   :  { %vm312_vm10 = vcmp.eq.s32.totalorder %v170_v31, %v7846_v15  ;;  %1931 = vperm.xlu1 %7075, %v1608_v28   ;;  %1928 = vperm.xlu0 %7074, %v1607_v29   ;;  %vm313_vm11 = vcmp.eq.s32.totalorder %v173_v30, %v7846_v15  ;;  %v1638_v28 = vld [vmem:[%s10769_s3 + $0x1b8] sm:$0xff]  ;;  %v1637_v29 = vld [vmem:[%s10769_s3 + $0x1b0] sm:$0xff] }
  0xb3   :  { %v5214_v33 = vsel %vm312_vm10, 1.0, %v10777_v20  ;;  %v5215_v38 = vsel %vm313_vm11, 1.0, %v10777_v20 }
  0xb4   :  { %6338 = vmatmul.mubr.msk.f32.gmra.mrb[22].mxu0 %vm488_vm0, %v5213_v32 }
  0xb5   :  { %v179_v36 = vpop.permute.xlu1 %178  ;;  %6340 = vmatprep.mubr.msk.f32.mxu0 %vm488_vm0, %v5214_v33  ;;  %v176_v37 = vpop.permute.xlu0 %175 }
  0xb6   :  { %vm314_vm12 = vcmp.eq.s32.totalorder %v176_v37, %v7846_v15  ;;  %1937 = vperm.xlu1 %7075, %v1610_v34   ;;  %1934 = vperm.xlu0 %7074, %v1609_v35   ;;  %vm315_vm13 = vcmp.eq.s32.totalorder %v179_v36, %v7846_v15  ;;  %v1622_v34 = vld [vmem:[%s10769_s3 + $0x138] sm:$0xff]  ;;  %v1621_v35 = vld [vmem:[%s10769_s3 + $0x130] sm:$0xff] }
  0xb7   :  { %v5216_v39 = vsel %vm314_vm12, 1.0, %v10777_v20  ;;  %v5217_v44 = vsel %vm315_vm13, 1.0, %v10777_v20 }
  0xb8   :  { %6341 = vmatmul.mubr.msk.f32.gmra.mrb[24].mxu0 %vm488_vm0, %v5215_v38 }
  0xb9   :  { %v185_v42 = vpop.permute.xlu1 %184  ;;  %6343 = vmatprep.mubr.msk.f32.mxu0 %vm488_vm0, %v5216_v39  ;;  %v182_v43 = vpop.permute.xlu0 %181 }
  0xba   :  { %vm316_vm14 = vcmp.eq.s32.totalorder %v182_v43, %v7846_v15  ;;  %1943 = vperm.xlu1 %7075, %v1612_v40   ;;  %1940 = vperm.xlu0 %7074, %v1611_v41   ;;  %vm317_vm15 = vcmp.eq.s32.totalorder %v185_v42, %v7846_v15  ;;  %v1640_v40 = vld [vmem:[%s10769_s3 + $0x1c8] sm:$0xff]  ;;  %v1639_v41 = vld [vmem:[%s10769_s3 + $0x1c0] sm:$0xff] }
  0xbb   :  { %v5218_v45 = vsel %vm316_vm14, 1.0, %v10777_v20  ;;  %v5219_v50 = vsel %vm317_vm15, 1.0, %v10777_v20 }
  0xbc   :  { %6344 = vmatmul.mubr.msk.f32.gmra.mrb[26].mxu0 %vm488_vm0, %v5217_v44 }
  0xbd   :  { %v191_v48 = vpop.permute.xlu1 %190  ;;  %6346 = vmatprep.mubr.msk.f32.mxu0 %vm488_vm0, %v5218_v45  ;;  %v188_v49 = vpop.permute.xlu0 %187 }
  0xbe   :  { %vm318_vm1 = vcmp.eq.s32.totalorder %v188_v49, %v7846_v15  ;;  %1949 = vperm.xlu1 %7075, %v1614_v46   ;;  %1946 = vperm.xlu0 %7074, %v1613_v47   ;;  %vm319_vm2 = vcmp.eq.s32.totalorder %v191_v48, %v7846_v15  ;;  %v1624_v46 = vld [vmem:[%s10769_s3 + $0x148] sm:$0xff]  ;;  %v1623_v47 = vld [vmem:[%s10769_s3 + $0x140] sm:$0xff] }
  0xbf   :  { %v5220_v51 = vsel %vm318_vm1, 1.0, %v10777_v20  ;;  %v5221_v56 = vsel %vm319_vm2, 1.0, %v10777_v20 }
  0xc0   :  { %6347 = vmatmul.mubr.msk.f32.gmra.mrb[28].mxu0 %vm488_vm0, %v5219_v50 }
  0xc1   :  { %v197_v54 = vpop.permute.xlu1 %196  ;;  %6349 = vmatprep.mubr.msk.f32.mxu0 %vm488_vm0, %v5220_v51  ;;  %v194_v55 = vpop.permute.xlu0 %193 }
  0xc2   :  { %vm320_vm3 = vcmp.eq.s32.totalorder %v194_v55, %v7846_v15  ;;  %1955 = vperm.xlu1 %7075, %v1616_v52   ;;  %1952 = vperm.xlu0 %7074, %v1615_v53   ;;  %vm321_vm4 = vcmp.eq.s32.totalorder %v197_v54, %v7846_v15  ;;  %v1642_v52 = vld [vmem:[%s10769_s3 + $0x1d8] sm:$0xff]  ;;  %v1641_v53 = vld [vmem:[%s10769_s3 + $0x1d0] sm:$0xff] }
  0xc3   :  { %v5222_v57 = vsel %vm320_vm3, 1.0, %v10777_v20  ;;  %v5223_v62 = vsel %vm321_vm4, 1.0, %v10777_v20 }
  0xc4   :  { %6350 = vmatmul.mubr.msk.f32.gmra.mrb[30].mxu0 %vm488_vm0, %v5221_v56 }
  0xc5   :  { %v203_v60 = vpop.permute.xlu1 %202  ;;  %6352 = vmatprep.mubr.msk.f32.mxu0 %vm488_vm0, %v5222_v57  ;;  %v200_v61 = vpop.permute.xlu0 %199 }
  0xc6   :  { %vm322_vm5 = vcmp.eq.s32.totalorder %v200_v61, %v7846_v15  ;;  %2000 = vperm.xlu1 %7075, %v1631_v58   ;;  %1958 = vperm.xlu0 %7074, %v1617_v59   ;;  %vm323_vm6 = vcmp.eq.s32.totalorder %v203_v60, %v7846_v15  ;;  %v1626_v58 = vld [vmem:[%s10769_s3 + $0x158] sm:$0xff]  ;;  %v1625_v59 = vld [vmem:[%s10769_s3 + $0x150] sm:$0xff] }
  0xc7   :  { %v5224_v63 = vsel %vm322_vm5, 1.0, %v10777_v20  ;;  %v5225_v5 = vsel %vm323_vm6, 1.0, %v10777_v20 }
  0xc8   :  { %6353 = vmatmul.mubr.msk.f32.gmra.mrb[32].mxu0 %vm488_vm0, %v5223_v62 }
  0xc9   :  { %v209_v3 = vpop.permute.xlu1 %208  ;;  %6355 = vmatprep.mubr.msk.f32.mxu0 %vm488_vm0, %v5224_v63  ;;  %v206_v4 = vpop.permute.xlu0 %205 }
  0xca   :  { %vm324_vm7 = vcmp.eq.s32.totalorder %v206_v4, %v7846_v15  ;;  %2006 = vperm.xlu1 %7075, %v1633_v0   ;;  %2003 = vperm.xlu0 %7074, %v1632_v1   ;;  %vm325_vm8 = vcmp.eq.s32.totalorder %v209_v3, %v7846_v15  ;;  %v1644_v0 = vld [vmem:[%s10769_s3 + $0x1e8] sm:$0xff]  ;;  %v1643_v1 = vld [vmem:[%s10769_s3 + $0x1e0] sm:$0xff] }
  0xcb   :  { %v5226_v6 = vsel %vm324_vm7, 1.0, %v10777_v20  ;;  %v5227_v11 = vsel %vm325_vm8, 1.0, %v10777_v20 }
  0xcc   :  { %6356 = vmatmul.mubr.msk.f32.gmra.mrb[34].mxu0 %vm488_vm0, %v5225_v5 }
  0xcd   :  { %v215_v9 = vpop.permute.xlu1 %214  ;;  %6358 = vmatprep.mubr.msk.f32.mxu0 %vm488_vm0, %v5226_v6  ;;  %v212_v10 = vpop.permute.xlu0 %211 }
  0xce   :  { %vm326_vm9 = vcmp.eq.s32.totalorder %v212_v10, %v7846_v15  ;;  %1961 = vperm.xlu1 %7075, %v1618_v7   ;;  %2009 = vperm.xlu0 %7074, %v1634_v8   ;;  %vm327_vm10 = vcmp.eq.s32.totalorder %v215_v9, %v7846_v15  ;;  %v1628_v7 = vld [vmem:[%s10769_s3 + $0x168] sm:$0xff]  ;;  %v1627_v8 = vld [vmem:[%s10769_s3 + $0x160] sm:$0xff] }
  0xcf   :  { %v5228_v13 = vsel %vm326_vm9, 1.0, %v10777_v20  ;;  %v5229_v19 = vsel %vm327_vm10, 1.0, %v10777_v20 }
  0xd0   :  { %6359 = vmatmul.mubr.msk.f32.gmra.mrb[36].mxu0 %vm488_vm0, %v5227_v11 }
  0xd1   :  { %v221_v17 = vpop.permute.xlu1 %220  ;;  %6361 = vmatprep.mubr.msk.f32.mxu0 %vm488_vm0, %v5228_v13  ;;  %v218_v18 = vpop.permute.xlu0 %217 }
  0xd2   :  { %vm328_vm11 = vcmp.eq.s32.totalorder %v218_v18, %v7846_v15  ;;  %2015 = vperm.xlu1 %7075, %v1636_v14   ;;  %2012 = vperm.xlu0 %7074, %v1635_v16   ;;  %vm329_vm12 = vcmp.eq.s32.totalorder %v221_v17, %v7846_v15  ;;  %v1646_v14 = vld [vmem:[%s10769_s3 + $0x1f8] sm:$0xff]  ;;  %v1645_v16 = vld [vmem:[%s10769_s3 + $0x1f0] sm:$0xff] }
  0xd3   :  { %v5230_v21 = vsel %vm328_vm11, 1.0, %v10777_v20  ;;  %v5231_v26 = vsel %vm329_vm12, 1.0, %v10777_v20 }
  0xd4   :  { %6362 = vmatmul.mubr.msk.f32.gmra.mrb[38].mxu0 %vm488_vm0, %v5229_v19 }
  0xd5   :  { %v227_v24 = vpop.permute.xlu1 %226  ;;  %6364 = vmatprep.mubr.msk.f32.mxu0 %vm488_vm0, %v5230_v21  ;;  %v224_v25 = vpop.permute.xlu0 %223 }
  0xd6   :  { %vm330_vm13 = vcmp.eq.s32.totalorder %v224_v25, %v7846_v15  ;;  %1967 = vperm.xlu1 %7075, %v1620_v22   ;;  %1964 = vperm.xlu0 %7074, %v1619_v23   ;;  %vm331_vm14 = vcmp.eq.s32.totalorder %v227_v24, %v7846_v15  ;;  %v1630_v22 = vld [vmem:[%s10769_s3 + $0x178] sm:$0xff]  ;;  %v1629_v23 = vld [vmem:[%s10769_s3 + $0x170] sm:$0xff] }
  0xd7   :  { %v5232_v27 = vsel %vm330_vm13, 1.0, %v10777_v20  ;;  %v5233_v32 = vsel %vm331_vm14, 1.0, %v10777_v20 }
  0xd8   :  { %6365 = vmatmul.mubr.msk.f32.gmra.mrb[40].mxu0 %vm488_vm0, %v5231_v26 }
  0xd9   :  { %v233_v30 = vpop.permute.xlu1 %232  ;;  %6367 = vmatprep.mubr.msk.f32.mxu0 %vm488_vm0, %v5232_v27  ;;  %v230_v31 = vpop.permute.xlu0 %229 }
  0xda   :  { %vm332_vm15 = vcmp.eq.s32.totalorder %v230_v31, %v7846_v15  ;;  %2021 = vperm.xlu1 %7075, %v1638_v28   ;;  %2018 = vperm.xlu0 %7074, %v1637_v29   ;;  %vm333_vm1 = vcmp.eq.s32.totalorder %v233_v30, %v7846_v15 }
  0xdb   :  { %v5234_v33 = vsel %vm332_vm15, 1.0, %v10777_v20  ;;  %v5235_v38 = vsel %vm333_vm1, 1.0, %v10777_v20 }
  0xdc   :  { %6368 = vmatmul.mubr.msk.f32.gmra.mrb[42].mxu0 %vm488_vm0, %v5233_v32 }
  0xdd   :  { %v239_v36 = vpop.permute.xlu1 %238  ;;  %6370 = vmatprep.mubr.msk.f32.mxu0 %vm488_vm0, %v5234_v33  ;;  %v236_v37 = vpop.permute.xlu0 %235 }
  0xde   :  { %vm334_vm2 = vcmp.eq.s32.totalorder %v236_v37, %v7846_v15  ;;  %1973 = vperm.xlu1 %7075, %v1622_v34   ;;  %1970 = vperm.xlu0 %7074, %v1621_v35   ;;  %vm335_vm3 = vcmp.eq.s32.totalorder %v239_v36, %v7846_v15 }
  0xdf   :  { %v5236_v39 = vsel %vm334_vm2, 1.0, %v10777_v20  ;;  %v5237_v44 = vsel %vm335_vm3, 1.0, %v10777_v20 }
  0xe0   :  { %6371 = vmatmul.mubr.msk.f32.gmra.mrb[44].mxu0 %vm488_vm0, %v5235_v38 }
  0xe1   :  { %v245_v42 = vpop.permute.xlu1 %244  ;;  %6373 = vmatprep.mubr.msk.f32.mxu0 %vm488_vm0, %v5236_v39  ;;  %v242_v43 = vpop.permute.xlu0 %241 }
  0xe2   :  { %vm336_vm4 = vcmp.eq.s32.totalorder %v242_v43, %v7846_v15  ;;  %2027 = vperm.xlu1 %7075, %v1640_v40   ;;  %2024 = vperm.xlu0 %7074, %v1639_v41   ;;  %vm337_vm5 = vcmp.eq.s32.totalorder %v245_v42, %v7846_v15  ;;  %v8239_v41 = vshrl.u32 %v94_v12, 7 }
  0xe3   :  { %v5238_v45 = vsel %vm336_vm4, 1.0, %v10777_v20  ;;  %v5239_v50 = vsel %vm337_vm5, 1.0, %v10777_v20 }
  0xe4   :  { %6374 = vmatmul.mubr.msk.f32.gmra.mrb[46].mxu0 %vm488_vm0, %v5237_v44  ;;  %v8246_v44 = vsub.s32 1, %v8239_v41 }
  0xe5   :  { %v251_v48 = vpop.permute.xlu1 %250  ;;  %6376 = vmatprep.mubr.msk.f32.mxu0 %vm488_vm0, %v5238_v45  ;;  %v248_v49 = vpop.permute.xlu0 %247  ;;  %v8251_v45 = vld [vmem:[%s10766_s0] sm:$0xf] }
  0xe6   :  { %vm338_vm6 = vcmp.eq.s32.totalorder %v248_v49, %v7846_v15  ;;  %1979 = vperm.xlu1 %7075, %v1624_v46   ;;  %1976 = vperm.xlu0 %7074, %v1623_v47   ;;  %vm339_vm7 = vcmp.eq.s32.totalorder %v251_v48, %v7846_v15  ;;  %v8255_v46 = vrot.slane %v8251_v45, %v8246_v44  ;;  %v7569_v48 = vmov 1.0  }
  0xe7   :  { %v5240_v51 = vsel %vm338_vm6, 1.0, %v10777_v20  ;;  %v5241_v56 = vsel %vm339_vm7, 1.0, %v10777_v20 }
  0xe8   :  { %6377 = vmatmul.mubr.msk.f32.gmra.mrb[48].mxu0 %vm488_vm0, %v5239_v50  ;;  %vm1101_vm5 = vcmp.eq.s32.totalorder %v8239_v41, %v8255_v46 }
  0xe9   :  { %v257_v54 = vpop.permute.xlu1 %256  ;;  %6379 = vmatprep.mubr.msk.f32.mxu0 %vm488_vm0, %v5240_v51  ;;  %v254_v55 = vpop.permute.xlu0 %253  ;;  %5382 = vmatprep.mubr.msk.f32.mxu1 %vm1101_vm5, %v7569_v48  ;;  %v10778_v51 = vmov 1.0|1.0  }
  0xea   :  { %vm340_vm8 = vcmp.eq.s32.totalorder %v254_v55, %v7846_v15  ;;  %2033 = vperm.xlu1 %7075, %v1642_v52   ;;  %2030 = vperm.xlu0 %7074, %v1641_v53   ;;  %vm341_vm9 = vcmp.eq.s32.totalorder %v257_v54, %v7846_v15 }
  0xeb   :  { %v5242_v57 = vsel %vm340_vm8, 1.0, %v10777_v20  ;;  %v5243_v62 = vsel %vm341_vm9, 1.0, %v10777_v20 }
  0xec   :  { %6380 = vmatmul.mubr.msk.f32.gmra.mrb[50].mxu0 %vm488_vm0, %v5241_v56 }
  0xed   :  { %v263_v60 = vpop.permute.xlu1 %262  ;;  %6382 = vmatprep.mubr.msk.f32.mxu0 %vm488_vm0, %v5242_v57  ;;  %v260_v61 = vpop.permute.xlu0 %259 }
  0xee   :  { %vm342_vm10 = vcmp.eq.s32.totalorder %v260_v61, %v7846_v15  ;;  %1985 = vperm.xlu1 %7075, %v1626_v58   ;;  %1982 = vperm.xlu0 %7074, %v1625_v59   ;;  %vm343_vm11 = vcmp.eq.s32.totalorder %v263_v60, %v7846_v15 }
  0xef   :  { %v5244_v63 = vsel %vm342_vm10, 1.0, %v10777_v20  ;;  %v5245_v5 = vsel %vm343_vm11, 1.0, %v10777_v20 }
  0xf0   :  { %6383 = vmatmul.mubr.msk.f32.gmra.mrb[52].mxu0 %vm488_vm0, %v5243_v62 }
  0xf1   :  { %v269_v3 = vpop.permute.xlu1 %268  ;;  %6385 = vmatprep.mubr.msk.f32.mxu0 %vm488_vm0, %v5244_v63  ;;  %v266_v4 = vpop.permute.xlu0 %265 }
  0xf2   :  { %vm344_vm12 = vcmp.eq.s32.totalorder %v266_v4, %v7846_v15  ;;  %2039 = vperm.xlu1 %7075, %v1644_v0   ;;  %2036 = vperm.xlu0 %7074, %v1643_v1   ;;  %vm345_vm13 = vcmp.eq.s32.totalorder %v269_v3, %v7846_v15 }
  0xf3   :  { %v5246_v6 = vsel %vm344_vm12, 1.0, %v10777_v20  ;;  %v5247_v11 = vsel %vm345_vm13, 1.0, %v10777_v20 }
  0xf4   :  { %6386 = vmatmul.mubr.msk.f32.gmra.mrb[54].mxu0 %vm488_vm0, %v5245_v5 }
  0xf5   :  { %v275_v9 = vpop.permute.xlu1 %274  ;;  %6388 = vmatprep.mubr.msk.f32.mxu0 %vm488_vm0, %v5246_v6  ;;  %v272_v10 = vpop.permute.xlu0 %271 }
  0xf6   :  { %vm346_vm14 = vcmp.eq.s32.totalorder %v272_v10, %v7846_v15  ;;  %1991 = vperm.xlu1 %7075, %v1628_v7   ;;  %1988 = vperm.xlu0 %7074, %v1627_v8   ;;  %vm347_vm15 = vcmp.eq.s32.totalorder %v275_v9, %v7846_v15 }
  0xf7   :  { %v5248_v13 = vsel %vm346_vm14, 1.0, %v10777_v20  ;;  %v5249_v19 = vsel %vm347_vm15, 1.0, %v10777_v20 }
  0xf8   :  { %6389 = vmatmul.mubr.msk.f32.gmra.mrb[56].mxu0 %vm488_vm0, %v5247_v11 }
  0xf9   :  { %v281_v17 = vpop.permute.xlu1 %280  ;;  %6391 = vmatprep.mubr.msk.f32.mxu0 %vm488_vm0, %v5248_v13  ;;  %v278_v18 = vpop.permute.xlu0 %277 }
  0xfa   :  { %vm348_vm1 = vcmp.eq.s32.totalorder %v278_v18, %v7846_v15  ;;  %2045 = vperm.xlu1 %7075, %v1646_v14   ;;  %2042 = vperm.xlu0 %7074, %v1645_v16   ;;  %vm349_vm2 = vcmp.eq.s32.totalorder %v281_v17, %v7846_v15 }
  0xfb   :  { %v5250_v21 = vsel %vm348_vm1, 1.0, %v10777_v20  ;;  %v5251_v26 = vsel %vm349_vm2, 1.0, %v10777_v20 }
  0xfc   :  { %6392 = vmatmul.mubr.msk.f32.gmra.mrb[58].mxu0 %vm488_vm0, %v5249_v19 }
  0xfd   :  { %v287_v24 = vpop.permute.xlu1 %286  ;;  %6394 = vmatprep.mubr.msk.f32.mxu0 %vm488_vm0, %v5250_v21  ;;  %v284_v25 = vpop.permute.xlu0 %283 }
  0xfe   :  { %vm350_vm3 = vcmp.eq.s32.totalorder %v284_v25, %v7846_v15  ;;  %1997 = vperm.xlu1 %7075, %v1630_v22   ;;  %1994 = vperm.xlu0 %7074, %v1629_v23   ;;  %vm351_vm4 = vcmp.eq.s32.totalorder %v287_v24, %v7846_v15 }
  0xff   :  { %v5252_v27 = vsel %vm350_vm3, 1.0, %v10777_v20  ;;  %v5253_v30 = vsel %vm351_vm4, 1.0, %v10777_v20 }
 0x100   :  { %6395 = vmatmul.mubr.msk.f32.gmra.mrb[60].mxu0 %vm488_vm0, %v5251_v26 }
 0x101   :  { %v1860_v28 = vpop.permute.xlu1 %1859  ;;  %6397 = vmatprep.mubr.msk.f32.mxu0 %vm488_vm0, %v5252_v27  ;;  %v1857_v29 = vpop.permute.xlu0 %1856 }
 0x102   :  { %vm2048_vm6 = vcmp.eq.s32.totalorder %v1860_v28, %v7846_v15  ;;  %vm2047_vm7 = vcmp.eq.s32.totalorder %v1857_v29, %v7846_v15 }
 0x103   :  { %vm6797_vm11 = vmpackc.low %vm2048_vm6, %vm2047_vm7 }
 0x104   :  { %6398 = vmatmul.mubr.msk.f32.gmra.mrb[62].mxu0 %vm488_vm0, %v5253_v30 }
 0x105   :  { %v1866_v31 = vpop.permute.xlu1 %1865  ;;  %v1863_v32 = vpop.permute.xlu0 %1862 }
 0x106   :  { %vm2050_vm12 = vcmp.eq.s32.totalorder %v1866_v31, %v7846_v15  ;;  %vm2049_vm13 = vcmp.eq.s32.totalorder %v1863_v32, %v7846_v15 }
 0x107   :  { %vm6801_vm2 = vmpackc.low %vm2050_vm12, %vm2049_vm13 }
 0x109   :  { %v1872_v33 = vpop.permute.xlu1 %1871  ;;  %v1869_v34 = vpop.permute.xlu0 %1868 }
 0x10a   :  { %vm2052_vm3 = vcmp.eq.s32.totalorder %v1872_v33, %v7846_v15  ;;  %vm2051_vm4 = vcmp.eq.s32.totalorder %v1869_v34, %v7846_v15 }
 0x10d   :  { %v1878_v35 = vpop.permute.xlu1 %1877  ;;  %v1875_v36 = vpop.permute.xlu0 %1874 }
 0x111   :  { %v8232_v37 = vpop.permute.xlu1 %1883  ;;  %v1881_v38 = vpop.permute.xlu0 %1880 }
 0x115   :  { %v8234_v39 = vpop.permute.xlu1 %1889  ;;  %v8236_v40 = vpop.permute.xlu0 %1886 }
 0x119   :  { %v8241_v42 = vpop.permute.xlu1 %1895  ;;  %v8243_v43 = vpop.permute.xlu0 %1892 }
 0x11d   :  { %v8257_v47 = vpop.permute.xlu1 %1901  ;;  %v8259_v12 = vpop.permute.xlu0 %1898 }
 0x121   :  { %v1908_v49 = vpop.permute.xlu1 %1907  ;;  %v1905_v50 = vpop.permute.xlu0 %1904 }
 0x122   :  { %vm2064_vm8 = vcmp.eq.s32.totalorder %v1908_v49, %v7846_v15  ;;  %vm2063_vm9 = vcmp.eq.s32.totalorder %v1905_v50, %v7846_v15 }
 0x123   :  { %vm6795_vm10 = vmpackc.low %vm2064_vm8, %vm2063_vm9  ;;  %vm2054_vm9 = vcmp.eq.s32.totalorder %v1878_v35, %v7846_v15 }
 0x124   :  { %6796 = vmatprep.subr.msk.bf16.mxu0 %vm6795_vm10, %v10778_v51  ;;  %vm6805_vm8 = vmpackc.low %vm2052_vm3, %vm2051_vm4  ;;  %vm2053_vm10 = vcmp.eq.s32.totalorder %v1875_v36, %v7846_v15 }
 0x125   :  { %v1914_v52 = vpop.permute.xlu1 %1913  ;;  %6798 = vmatpush3.bf16.msk.msra.mxu0 %vm6797_vm11, %v10778_v51  ;;  %v1911_v53 = vpop.permute.xlu0 %1910 }
 0x126   :  { %vm2066_vm14 = vcmp.eq.s32.totalorder %v1914_v52, %v7846_v15  ;;  %vm2065_vm15 = vcmp.eq.s32.totalorder %v1911_v53, %v7846_v15 }
 0x127   :  { %vm6799_vm1 = vmpackc.low %vm2066_vm14, %vm2065_vm15  ;;  %vm2056_vm15 = vcmp.eq.s32.totalorder %v8232_v37, %v7846_v15 }
 0x128   :  { %6800 = vmatprep.subr.msk.bf16.mxu0 %vm6799_vm1, %v10778_v51  ;;  %vm6809_vm14 = vmpackc.low %vm2054_vm9, %vm2053_vm10  ;;  %vm2055_vm1 = vcmp.eq.s32.totalorder %v1881_v38, %v7846_v15 }
 0x129   :  { %v1920_v54 = vpop.permute.xlu1 %1919  ;;  %6802 = vmatpush3.bf16.msk.msra.mxu0 %vm6801_vm2, %v10778_v51  ;;  %v1917_v55 = vpop.permute.xlu0 %1916 }
 0x12a   :  { %vm2068_vm5 = vcmp.eq.s32.totalorder %v1920_v54, %v7846_v15  ;;  %vm2067_vm6 = vcmp.eq.s32.totalorder %v1917_v55, %v7846_v15  ;;  %v8320_v55 = vsub.s32 0, %v8239_v41 }
 0x12b   :  { %vm6803_vm7 = vmpackc.low %vm2068_vm5, %vm2067_vm6  ;;  %vm2058_vm6 = vcmp.eq.s32.totalorder %v8234_v39, %v7846_v15 }
 0x12c   :  { %6804 = vmatprep.subr.msk.bf16.mxu0 %vm6803_vm7, %v10778_v51  ;;  %vm6813_vm5 = vmpackc.low %vm2056_vm15, %vm2055_vm1  ;;  %vm2057_vm7 = vcmp.eq.s32.totalorder %v8236_v40, %v7846_v15 }
 0x12d   :  { %v1926_v56 = vpop.permute.xlu1 %1925  ;;  %6806 = vmatpush3.bf16.msk.msra.mxu0 %vm6805_vm8, %v10778_v51  ;;  %v1923_v57 = vpop.permute.xlu0 %1922 }
 0x12e   :  { %vm2070_vm11 = vcmp.eq.s32.totalorder %v1926_v56, %v7846_v15  ;;  %vm2069_vm12 = vcmp.eq.s32.totalorder %v1923_v57, %v7846_v15 }
 0x12f   :  { %vm6807_vm13 = vmpackc.low %vm2070_vm11, %vm2069_vm12  ;;  %vm2060_vm12 = vcmp.eq.s32.totalorder %v8241_v42, %v7846_v15 }
 0x130   :  { %6808 = vmatprep.subr.msk.bf16.mxu0 %vm6807_vm13, %v10778_v51  ;;  %vm6817_vm11 = vmpackc.low %vm2058_vm6, %vm2057_vm7  ;;  %vm2059_vm13 = vcmp.eq.s32.totalorder %v8243_v43, %v7846_v15 }
 0x131   :  { %v1932_v58 = vpop.permute.xlu1 %1931  ;;  %6810 = vmatpush3.bf16.msk.msra.mxu0 %vm6809_vm14, %v10778_v51  ;;  %v1929_v59 = vpop.permute.xlu0 %1928 }
 0x132   :  { %vm2072_vm2 = vcmp.eq.s32.totalorder %v1932_v58, %v7846_v15  ;;  %vm2071_vm3 = vcmp.eq.s32.totalorder %v1929_v59, %v7846_v15  ;;  %v8324_v59 = vrot.slane %v8251_v45, %v8320_v55 }
 0x133   :  { %vm6811_vm4 = vmpackc.low %vm2072_vm2, %vm2071_vm3  ;;  %vm2062_vm3 = vcmp.eq.s32.totalorder %v8257_v47, %v7846_v15 }
 0x134   :  { %6812 = vmatprep.subr.msk.bf16.mxu0 %vm6811_vm4, %v10778_v51  ;;  %vm6821_vm2 = vmpackc.low %vm2060_vm12, %vm2059_vm13  ;;  %vm2061_vm4 = vcmp.eq.s32.totalorder %v8259_v12, %v7846_v15 }
 0x135   :  { %v1938_v60 = vpop.permute.xlu1 %1937  ;;  %6814 = vmatpush3.bf16.msk.msra.mxu0 %vm6813_vm5, %v10778_v51  ;;  %v1935_v61 = vpop.permute.xlu0 %1934 }
 0x136   :  { %vm2074_vm8 = vcmp.eq.s32.totalorder %v1938_v60, %v7846_v15  ;;  %vm2073_vm9 = vcmp.eq.s32.totalorder %v1935_v61, %v7846_v15  ;;  %v8327_v61 = vadd.s32 8, %v8239_v41 }
 0x137   :  { %vm6815_vm10 = vmpackc.low %vm2074_vm8, %vm2073_vm9  ;;  %vm1100_vm9 = vcmp.eq.s32.totalorder %v8239_v41, %v8324_v59 }
 0x138   :  { %6816 = vmatprep.subr.msk.bf16.mxu0 %vm6815_vm10, %v10778_v51  ;;  %vm6825_vm8 = vmpackc.low %vm2062_vm3, %vm2061_vm4  ;;  %vm1105_vm10 = vcmp.eq.s32.totalorder %v8327_v61, %v8255_v46 }
 0x139   :  { %v1944_v62 = vpop.permute.xlu1 %1943  ;;  %6818 = vmatpush3.bf16.msk.msra.mxu0 %vm6817_vm11, %v10778_v51  ;;  %v1941_v63 = vpop.permute.xlu0 %1940 }
 0x13a   :  { %vm2076_vm14 = vcmp.eq.s32.totalorder %v1944_v62, %v7846_v15  ;;  %vm2075_vm15 = vcmp.eq.s32.totalorder %v1941_v63, %v7846_v15 }
 0x13b   :  { %vm6819_vm1 = vmpackc.low %vm2076_vm14, %vm2075_vm15  ;;  %vm1104_vm14 = vcmp.eq.s32.totalorder %v8327_v61, %v8324_v59 }
 0x13c   :  { %6820 = vmatprep.subr.msk.bf16.mxu0 %vm6819_vm1, %v10778_v51 }
 0x13d   :  { %v1950_v0 = vpop.permute.xlu1 %1949  ;;  %6822 = vmatpush3.bf16.msk.msra.mxu0 %vm6821_vm2, %v10778_v51  ;;  %v1947_v1 = vpop.permute.xlu0 %1946 }
 0x13e   :  { %vm2078_vm5 = vcmp.eq.s32.totalorder %v1950_v0, %v7846_v15  ;;  %vm2077_vm6 = vcmp.eq.s32.totalorder %v1947_v1, %v7846_v15  ;;  %v8338_v1 = vld [vmem:[%s10768_s2] sm:$0xf] }
 0x13f   :  { %vm6823_vm7 = vmpackc.low %vm2078_vm5, %vm2077_vm6 }
 0x140   :  { %6824 = vmatprep.subr.msk.bf16.mxu0 %vm6823_vm7, %v10778_v51 }
 0x141   :  { %6826 = vmatpush3.bf16.msk.msra.mxu0 %vm6825_vm8, %v10778_v51  ;;  %v8329_v62 = vpop.permute.xlu1 %1955  ;;  %v8331_v63 = vpop.permute.xlu0 %1952 }
 0x15b   :  { %v6306_v3 = vpop.f32.mrb[0].mxu0 }
 0x15c   :  { %v747_v4 = vpop.f32.mrb[1].mxu0 }
 0x15d   :  { %v6733_v5 = vpack.c.bf16 %v6306_v3, %v747_v4  ;;  %v8346_v4 = vrot.slane %v8338_v1, %v8246_v44 }
 0x15f   :  { %v6309_v6 = vpop.f32.mrb[2].mxu0  ;;  %vm1664_vm11 = vcmp.eq.s32.totalorder %v8239_v41, %v8346_v4  ;;  %vm1668_vm13 = vcmp.eq.s32.totalorder %v8327_v61, %v8346_v4 }
 0x160   :  { %v757_v7 = vpop.f32.mrb[3].mxu0  ;;  %5606 = vmatprep.mubr.msk.f32.mxu0 %vm1664_vm11, %v7569_v48 }
 0x161   :  { %v6737_v8 = vpack.c.bf16 %v6309_v6, %v757_v7  ;;  %v8357_v7 = vadd.s32 16, %v8239_v41 }
 0x163   :  { %v6312_v9 = vpop.f32.mrb[4].mxu0  ;;  %vm1109_vm15 = vcmp.eq.s32.totalorder %v8357_v7, %v8255_v46  ;;  %vm1672_vm2 = vcmp.eq.s32.totalorder %v8357_v7, %v8346_v4  ;;  %vm1108_vm3 = vcmp.eq.s32.totalorder %v8357_v7, %v8324_v59 }
 0x164   :  { %v767_v10 = vpop.f32.mrb[5].mxu0 }
 0x165   :  { %v6741_v11 = vpack.c.bf16 %v6312_v9, %v767_v10  ;;  %v8369_v9 = vpop.permute.xlu1 %2000 }
 0x167   :  { %v6315_v13 = vpop.f32.mrb[6].mxu0 }
 0x168   :  { %v777_v14 = vpop.f32.mrb[7].mxu0 }
 0x169   :  { %v6745_v16 = vpack.c.bf16 %v6315_v13, %v777_v14  ;;  %v8384_v14 = vadd.s32 24, %v8239_v41 }
 0x16b   :  { %v6318_v17 = vpop.f32.mrb[8].mxu0  ;;  %vm1113_vm4 = vcmp.eq.s32.totalorder %v8384_v14, %v8255_v46  ;;  %vm1676_vm6 = vcmp.eq.s32.totalorder %v8384_v14, %v8346_v4  ;;  %vm1112_vm7 = vcmp.eq.s32.totalorder %v8384_v14, %v8324_v59 }
 0x16c   :  { %v787_v18 = vpop.f32.mrb[9].mxu0 }
 0x16d   :  { %v6749_v19 = vpack.c.bf16 %v6318_v17, %v787_v18 }
 0x16f   :  { %v6321_v21 = vpop.f32.mrb[10].mxu0 }
 0x170   :  { %v797_v22 = vpop.f32.mrb[11].mxu0 }
 0x171   :  { %v6753_v23 = vpack.c.bf16 %v6321_v21, %v797_v22  ;;  %v8410_v21 = vpop.permute.xlu1 %2006 }
 0x173   :  { %v6324_v24 = vpop.f32.mrb[12].mxu0 }
 0x174   :  { %v807_v25 = vpop.f32.mrb[13].mxu0 }
 0x175   :  { %v6757_v26 = vpack.c.bf16 %v6324_v24, %v807_v25 }
 0x177   :  { %v6327_v27 = vpop.f32.mrb[14].mxu0 }
 0x178   :  { %v817_v28 = vpop.f32.mrb[15].mxu0 }
 0x179   :  { %v6761_v29 = vpack.c.bf16 %v6327_v27, %v817_v28  ;;  %v8440_v28 = vpop.permute.xlu1 %1961 }
 0x17b   :  { %v6330_v30 = vpop.f32.mrb[16].mxu0 }
 0x17c   :  { %v827_v31 = vpop.f32.mrb[17].mxu0 }
 0x17d   :  { %v6731_v32 = vpack.c.bf16 %v6330_v30, %v827_v31 }
 0x17f   :  { %v6333_v33 = vpop.f32.mrb[18].mxu0  ;;  %6732 = vmatprep.subr.bf16.mxu1 %v6731_v32  ;;  %v8455_v32 = vadd.s32 48, %v8239_v41 }
 0x180   :  { %v837_v34 = vpop.f32.mrb[19].mxu0  ;;  %6734 = vmatpush3.bf16.msra.mxu1 %v6733_v5  ;;  %v8350_v5 = vrot.slane %v8338_v1, %v8320_v55 }
 0x181   :  { %v6735_v35 = vpack.c.bf16 %v6333_v33, %v837_v34 }
 0x182   :  { %vm1663_vm12 = vcmp.eq.s32.totalorder %v8239_v41, %v8350_v5  ;;  %vm1667_vm1 = vcmp.eq.s32.totalorder %v8327_v61, %v8350_v5  ;;  %vm1671_vm5 = vcmp.eq.s32.totalorder %v8357_v7, %v8350_v5 }
 0x183   :  { %v6336_v36 = vpop.f32.mrb[20].mxu0  ;;  %6736 = vmatprep.subr.bf16.mxu1 %v6735_v35  ;;  %5607 = vmatmul.mubr.msk.f32.vlgmr.msra.gmra.mrb[64].mxu0 %vm1663_vm12, %v7569_v48 }
 0x184   :  { %v847_v37 = vpop.f32.mrb[21].mxu0  ;;  %6738 = vmatpush3.bf16.msra.mxu1 %v6737_v8  ;;  %5608 = vmatprep.mubr.msk.f32.mxu0 %vm1668_vm13, %v7569_v48 }
 0x185   :  { %v6739_v38 = vpack.c.bf16 %v6336_v36, %v847_v37  ;;  %v8476_v36 = vadd.s32 56, %v8239_v41  ;;  %v8481_v37 = vpop.permute.xlu1 %2015 }
 0x187   :  { %v6339_v39 = vpop.f32.mrb[22].mxu0  ;;  %6740 = vmatprep.subr.bf16.mxu1 %v6739_v38  ;;  %5609 = vmatmul.mubr.msk.f32.gmra.mrb[66].mxu0 %vm1667_vm1, %v7569_v48  ;;  %vm1125_vm1 = vcmp.eq.s32.totalorder %v8455_v32, %v8255_v46 }
 0x188   :  { %v857_v40 = vpop.f32.mrb[23].mxu0  ;;  %6742 = vmatpush3.bf16.msra.mxu1 %v6741_v11  ;;  %v8377_v11 = vpop.permute.xlu0 %1958  ;;  %5610 = vmatprep.mubr.msk.f32.mxu0 %vm1672_vm2, %v7569_v48 }
 0x189   :  { %v6743_v42 = vpack.c.bf16 %v6339_v39, %v857_v40 }
 0x18b   :  { %v6342_v43 = vpop.f32.mrb[24].mxu0  ;;  %6744 = vmatprep.subr.bf16.mxu1 %v6743_v42  ;;  %5611 = vmatmul.mubr.msk.f32.gmra.mrb[68].mxu0 %vm1671_vm5, %v7569_v48  ;;  %vm1128_vm5 = vcmp.eq.s32.totalorder %v8476_v36, %v8324_v59 }
 0x18c   :  { %v867_v47 = vpop.f32.mrb[25].mxu0  ;;  %6746 = vmatpush3.bf16.msra.mxu1 %v6745_v16  ;;  %v8414_v22 = vpop.permute.xlu0 %2003  ;;  %5612 = vmatprep.mubr.msk.f32.mxu0 %vm1676_vm6, %v7569_v48 }
 0x18d   :  { %v6747_v12 = vpack.c.bf16 %v6342_v43, %v867_v47  ;;  %v8499_v43 = vadd.s32 64, %v8239_v41 }
 0x18f   :  { %v6345_v49 = vpop.f32.mrb[26].mxu0  ;;  %6748 = vmatprep.subr.bf16.mxu1 %v6747_v12  ;;  %v8504_v12 = vpop.permute.xlu1 %1967  ;;  %vm1133_vm6 = vcmp.eq.s32.totalorder %v8499_v43, %v8255_v46 }
 0x190   :  { %v877_v50 = vpop.f32.mrb[27].mxu0  ;;  %6750 = vmatpush3.bf16.msra.mxu1 %v6749_v19  ;;  %v8405_v19 = vadd.s32 32, %v8239_v41  ;;  %v8448_v30 = vpop.permute.xlu0 %2009 }
 0x191   :  { %v6751_v52 = vpack.c.bf16 %v6345_v49, %v877_v50 }
 0x192   :  { %vm1117_vm8 = vcmp.eq.s32.totalorder %v8405_v19, %v8255_v46  ;;  %vm1116_vm11 = vcmp.eq.s32.totalorder %v8405_v19, %v8324_v59  ;;  %vm1679_vm13 = vcmp.eq.s32.totalorder %v8405_v19, %v8350_v5 }
 0x193   :  { %v6348_v53 = vpop.f32.mrb[28].mxu0  ;;  %6752 = vmatprep.subr.bf16.mxu1 %v6751_v52 }
 0x194   :  { %v887_v54 = vpop.f32.mrb[29].mxu0  ;;  %6754 = vmatpush3.bf16.msra.mxu1 %v6753_v23  ;;  %v8483_v38 = vpop.permute.xlu0 %2012 }
 0x195   :  { %v6755_v56 = vpack.c.bf16 %v6348_v53, %v887_v54  ;;  %v8518_v53 = vadd.s32 72, %v8239_v41 }
 0x197   :  { %v6351_v57 = vpop.f32.mrb[30].mxu0  ;;  %6756 = vmatprep.subr.bf16.mxu1 %v6755_v56 }
 0x198   :  { %v897_v58 = vpop.f32.mrb[31].mxu0  ;;  %6758 = vmatpush3.bf16.msra.mxu1 %v6757_v26  ;;  %v8430_v26 = vadd.s32 40, %v8239_v41  ;;  %v8511_v50 = vpop.permute.xlu0 %1964 }
 0x199   :  { %v6759_v60 = vpack.c.bf16 %v6351_v57, %v897_v58  ;;  %v8527_v58 = vadd.s32 80, %v8239_v41 }
 0x19a   :  { %vm1121_vm12 = vcmp.eq.s32.totalorder %v8430_v26, %v8255_v46  ;;  %vm1683_vm2 = vcmp.eq.s32.totalorder %v8430_v26, %v8350_v5 }
 0x19b   :  { %v8333_v0 = vpop.f32.mrb[32].mxu0  ;;  %6760 = vmatprep.subr.bf16.mxu1 %v6759_v60  ;;  %v8529_v60 = vpop.permute.xlu1 %2021 }
 0x19c   :  { %v8340_v3 = vpop.f32.mrb[33].mxu0  ;;  %6762 = vmatpush3.bf16.msra.mxu1 %v6761_v29  ;;  %v8531_v2 = vpop.permute.xlu0 %2018 }
 0x19d   :  { %v6765_v6 = vpack.c.bf16 %v8333_v0, %v8340_v3  ;;  %v8559_v3 = vadd.s32 96, %v8239_v41 }
 0x19f   :  { %v8365_v8 = vpop.f32.mrb[34].mxu0  ;;  %5383 = vmatmul.mubr.msk.f32.vlgmr.msra.gmra.mrb[0].mxu1 %vm1100_vm9, %v7569_v48  ;;  %vm1675_vm9 = vcmp.eq.s32.totalorder %v8384_v14, %v8350_v5 }
 0x1a0   :  { %v8371_v10 = vpop.f32.mrb[35].mxu0  ;;  %5384 = vmatprep.mubr.msk.f32.mxu1 %vm1105_vm10, %v7569_v48  ;;  %vm1680_vm10 = vcmp.eq.s32.totalorder %v8405_v19, %v8346_v4  ;;  %5613 = vmatmul.mubr.msk.f32.gmra.mrb[70].mxu0 %vm1675_vm9, %v7569_v48  ;;  %vm1136_vm9 = vcmp.eq.s32.totalorder %v8518_v53, %v8324_v59 }
 0x1a1   :  { %v6769_v13 = vpack.c.bf16 %v8365_v8, %v8371_v10  ;;  %5614 = vmatprep.mubr.msk.f32.mxu0 %vm1680_vm10, %v7569_v48  ;;  %vm1141_vm10 = vcmp.eq.s32.totalorder %v8527_v58, %v8255_v46 }
 0x1a3   :  { %v8391_v16 = vpop.f32.mrb[36].mxu0  ;;  %5385 = vmatmul.mubr.msk.f32.gmra.mrb[2].mxu1 %vm1104_vm14, %v7569_v48  ;;  %vm1684_vm14 = vcmp.eq.s32.totalorder %v8430_v26, %v8346_v4 }
 0x1a4   :  { %v8394_v17 = vpop.f32.mrb[37].mxu0  ;;  %5386 = vmatprep.mubr.msk.f32.mxu1 %vm1109_vm15, %v7569_v48  ;;  %vm1120_vm15 = vcmp.eq.s32.totalorder %v8430_v26, %v8324_v59  ;;  %5615 = vmatmul.mubr.msk.f32.gmra.mrb[72].mxu0 %vm1679_vm13, %v7569_v48 }
 0x1a5   :  { %v6773_v18 = vpack.c.bf16 %v8391_v16, %v8394_v17  ;;  %5616 = vmatprep.mubr.msk.f32.mxu0 %vm1684_vm14, %v7569_v48  ;;  %vm1149_vm14 = vcmp.eq.s32.totalorder %v8559_v3, %v8255_v46 }
 0x1a7   :  { %v8416_v23 = vpop.f32.mrb[38].mxu0  ;;  %5387 = vmatmul.mubr.msk.f32.gmra.mrb[4].mxu1 %vm1108_vm3, %v7569_v48  ;;  %vm1124_vm3 = vcmp.eq.s32.totalorder %v8455_v32, %v8324_v59 }
 0x1a8   :  { %v8419_v24 = vpop.f32.mrb[39].mxu0  ;;  %5388 = vmatprep.mubr.msk.f32.mxu1 %vm1113_vm4, %v7569_v48  ;;  %5617 = vmatmul.mubr.msk.f32.gmra.mrb[74].mxu0 %vm1683_vm2, %v7569_v48  ;;  %vm1129_vm4 = vcmp.eq.s32.totalorder %v8476_v36, %v8255_v46 }
 0x1a9   :  { %v6777_v25 = vpack.c.bf16 %v8416_v23, %v8419_v24 }
 0x1ab   :  { %v8437_v27 = vpop.f32.mrb[40].mxu0  ;;  %5389 = vmatmul.mubr.msk.f32.gmra.mrb[6].mxu1 %vm1112_vm7, %v7569_v48  ;;  %vm1132_vm7 = vcmp.eq.s32.totalorder %v8499_v43, %v8324_v59 }
 0x1ac   :  { %v8442_v29 = vpop.f32.mrb[41].mxu0  ;;  %5390 = vmatprep.mubr.msk.f32.mxu1 %vm1117_vm8, %v7569_v48  ;;  %vm1137_vm8 = vcmp.eq.s32.totalorder %v8518_v53, %v8255_v46 }
 0x1ad   :  { %v6781_v31 = vpack.c.bf16 %v8437_v27, %v8442_v29  ;;  %v8616_v29 = vsub.s32 2, %v8239_v41 }
 0x1af   :  { %v8462_v33 = vpop.f32.mrb[42].mxu0  ;;  %5391 = vmatmul.mubr.msk.f32.gmra.mrb[8].mxu1 %vm1116_vm11, %v7569_v48  ;;  %vm1140_vm11 = vcmp.eq.s32.totalorder %v8527_v58, %v8324_v59 }
 0x1b0   :  { %v8465_v34 = vpop.f32.mrb[43].mxu0  ;;  %5392 = vmatprep.mubr.msk.f32.mxu1 %vm1121_vm12, %v7569_v48 }
 0x1b1   :  { %v6785_v35 = vpack.c.bf16 %v8462_v33, %v8465_v34 }
 0x1b3   :  { %v8485_v39 = vpop.f32.mrb[44].mxu0  ;;  %5393 = vmatmul.mubr.msk.f32.gmra.mrb[10].mxu1 %vm1120_vm15, %v7569_v48  ;;  %vm1148_vm15 = vcmp.eq.s32.totalorder %v8559_v3, %v8324_v59 }
 0x1b4   :  { %v8488_v40 = vpop.f32.mrb[45].mxu0  ;;  %5394 = vmatprep.mubr.msk.f32.mxu1 %vm1125_vm1, %v7569_v48 }
 0x1b5   :  { %v6789_v42 = vpack.c.bf16 %v8485_v39, %v8488_v40  ;;  %v2578_v39 = vld [vmem:[%s10771_s5 + $0x8] sm:$0xff] }
 0x1b7   :  { %v8501_v47 = vpop.f32.mrb[46].mxu0  ;;  %5395 = vmatmul.mubr.msk.f32.gmra.mrb[12].mxu1 %vm1124_vm3, %v7569_v48 }
 0x1b8   :  { %v8506_v49 = vpop.f32.mrb[47].mxu0  ;;  %5396 = vmatprep.mubr.msk.f32.mxu1 %vm1129_vm4, %v7569_v48 }
 0x1bb   :  { %v6378_v54 = vpop.f32.mrb[48].mxu0  ;;  %5397 = vmatmul.mubr.msk.f32.gmra.mrb[14].mxu1 %vm1128_vm5, %v7569_v48 }
 0x1bc   :  { %v987_v56 = vpop.f32.mrb[49].mxu0  ;;  %5398 = vmatprep.mubr.msk.f32.mxu1 %vm1133_vm6, %v7569_v48 }
 0x1bd   :  { %v6763_v57 = vpack.c.bf16 %v6378_v54, %v987_v56  ;;  %v8543_v56 = vadd.s32 88, %v8239_v41 }
 0x1bf   :  { %v6381_v20 = vpop.f32.mrb[50].mxu0  ;;  %5399 = vmatmul.mubr.msk.f32.gmra.mrb[16].mxu1 %vm1132_vm7, %v7569_v48  ;;  %6764 = vmatprep.subr.bf16.mxu1 %v6763_v57  ;;  %v8546_v57 = vpop.permute.xlu1 %1973  ;;  %vm1145_vm12 = vcmp.eq.s32.totalorder %v8543_v56, %v8255_v46  ;;  %vm1144_vm13 = vcmp.eq.s32.totalorder %v8543_v56, %v8324_v59  ;;  %vm2096_vm7 = vcmp.eq.s32.totalorder %v8414_v22, %v7846_v15 }
 0x1c0   :  { %v997_v51 = vpop.f32.mrb[51].mxu0  ;;  %6766 = vmatpush3.bf16.msra.mxu1 %v6765_v6  ;;  %5400 = vmatprep.mubr.msk.f32.mxu1 %vm1137_vm8, %v7569_v48 }
 0x1c1   :  { %v6767_v54 = vpack.c.bf16 %v6381_v20, %v997_v51  ;;  %v8554_v20 = vpop.permute.xlu0 %1970 }
 0x1c3   :  { %v6384_v52 = vpop.f32.mrb[52].mxu0  ;;  %5401 = vmatmul.mubr.msk.f32.gmra.mrb[18].mxu1 %vm1136_vm9, %v7569_v48  ;;  %6768 = vmatprep.subr.bf16.mxu1 %v6767_v54  ;;  %vm2095_vm9 = vcmp.eq.s32.totalorder %v8369_v9, %v7846_v15 }
 0x1c4   :  { %v1007_v0 = vpop.f32.mrb[53].mxu0  ;;  %6770 = vmatpush3.bf16.msra.mxu1 %v6769_v13  ;;  %5402 = vmatprep.mubr.msk.f32.mxu1 %vm1141_vm10, %v7569_v48  ;;  %v8571_v13 = vadd.s32 104, %v8239_v41  ;;  %vm2080_vm10 = vcmp.eq.s32.totalorder %v8329_v62, %v7846_v15  ;;  %v10872_v62 = vmov 1.0|1.0  }
 0x1c5   :  { %v6771_v51 = vpack.c.bf16 %v6384_v52, %v1007_v0  ;;  %v8573_v52 = vpop.permute.xlu1 %2027  ;;  %v8575_v54 = vpop.permute.xlu0 %2024 }
 0x1c6   :  { %vm1153_vm1 = vcmp.eq.s32.totalorder %v8571_v13, %v8255_v46  ;;  %vm1152_vm2 = vcmp.eq.s32.totalorder %v8571_v13, %v8324_v59 }
 0x1c7   :  { %v6387_v6 = vpop.f32.mrb[54].mxu0  ;;  %5403 = vmatmul.mubr.msk.f32.gmra.mrb[20].mxu1 %vm1140_vm11, %v7569_v48  ;;  %6772 = vmatprep.subr.bf16.mxu1 %v6771_v51  ;;  %vm2079_vm11 = vcmp.eq.s32.totalorder %v8331_v63, %v7846_v15 }
 0x1c8   :  { %v1017_v8 = vpop.f32.mrb[55].mxu0  ;;  %6774 = vmatpush3.bf16.msra.mxu1 %v6773_v18  ;;  %5404 = vmatprep.mubr.msk.f32.mxu1 %vm1145_vm12, %v7569_v48  ;;  %v8587_v18 = vadd.s32 112, %v8239_v41  ;;  %vm6827_vm12 = vmpackc.low %vm2096_vm7, %vm2095_vm9  ;;  %vm2099_vm7 = vcmp.eq.s32.totalorder %v8483_v38, %v7846_v15  ;;  %vm2081_vm9 = vcmp.eq.s32.totalorder %v8377_v11, %v7846_v15  ;;  %v2577_v38 = vld [vmem:[%s10771_s5] sm:$0xff] }
 0x1c9   :  { %v6775_v10 = vpack.c.bf16 %v6387_v6, %v1017_v8  ;;  %v8590_v6 = vpop.permute.xlu1 %1979  ;;  %v8598_v24 = vpop.permute.xlu0 %1976  ;;  %v8603_v8 = vadd.s32 120, %v8239_v41  ;;  %v6859_v40 = vpack.c.bf16 %v2578_v39, %v2577_v38 }
 0x1ca   :  { %vm1157_vm3 = vcmp.eq.s32.totalorder %v8587_v18, %v8255_v46  ;;  %vm1156_vm4 = vcmp.eq.s32.totalorder %v8587_v18, %v8324_v59 }
 0x1cb   :  { %v6390_v0 = vpop.f32.mrb[56].mxu0  ;;  %5405 = vmatmul.mubr.msk.f32.gmra.mrb[22].mxu1 %vm1144_vm13, %v7569_v48  ;;  %6776 = vmatprep.subr.bf16.mxu1 %v6775_v10  ;;  %v8606_v10 = vsub.s32 3, %v8239_v41  ;;  %vm1161_vm5 = vcmp.eq.s32.totalorder %v8603_v8, %v8255_v46  ;;  %vm1160_vm6 = vcmp.eq.s32.totalorder %v8603_v8, %v8324_v59  ;;  %v8637_v46 = vrot.slane %v8251_v45, %v8616_v29 }
 0x1cc   :  { %v1027_v16 = vpop.f32.mrb[57].mxu0  ;;  %6778 = vmatpush3.bf16.msra.mxu1 %v6777_v25  ;;  %5406 = vmatprep.mubr.msk.f32.mxu1 %vm1149_vm14, %v7569_v48  ;;  %vm2098_vm14 = vcmp.eq.s32.totalorder %v8448_v30, %v7846_v15 }
 0x1cd   :  { %v6779_v17 = vpack.c.bf16 %v6390_v0, %v1027_v16  ;;  %v8622_v16 = vrot.slane %v8251_v45, %v8606_v10  ;;  %v8626_v33 = vpop.permute.xlu0 %2030  ;;  %v10871_v45 = vpack.c.bf16 %v8501_v47, %v8506_v49  ;;  %vm1102_vm13 = vcmp.eq.s32.totalorder %v8239_v41, %v8637_v46  ;;  %6860 = vmatprep.subr.bf16.mxu0 %v6859_v40  ;;  %v2580_v47 = vld [vmem:[%s10771_s5 + $0x18] sm:$0xff] }
 0x1ce   :  { %6862 = vmatpush3.bf16.msra.mxu0 %v6859_v40  ;;  %v8856_v49 = vrot.slane %v8338_v1, %v8606_v10 }
 0x1cf   :  { %v6393_v51 = vpop.f32.mrb[58].mxu0  ;;  %5407 = vmatmul.mubr.msk.f32.gmra.mrb[24].mxu1 %vm1148_vm15, %v7569_v48  ;;  %6780 = vmatprep.subr.bf16.mxu1 %v6779_v17  ;;  %v8624_v17 = vpop.permute.xlu1 %2033  ;;  %vm1103_vm8 = vcmp.eq.s32.totalorder %v8239_v41, %v8622_v16  ;;  %vm1107_vm15 = vcmp.eq.s32.totalorder %v8327_v61, %v8622_v16 }
 0x1d0   :  { %v1037_v23 = vpop.f32.mrb[59].mxu0  ;;  %6782 = vmatpush3.bf16.msra.mxu1 %v6781_v31  ;;  %5408 = vmatprep.mubr.msk.f32.mxu1 %vm1153_vm1, %v7569_v48  ;;  %vm6829_vm1 = vmpackc.low %vm2080_vm10, %vm2079_vm11 }
 0x1d1   :  { %v6783_v25 = vpack.c.bf16 %v6393_v51, %v1037_v23  ;;  %v8660_v9 = vpop.permute.xlu0 %1982  ;;  %v2586_v23 = vld [vmem:[%s10771_s5 + $0x48] sm:$0xff] }
 0x1d3   :  { %v6396_v0 = vpop.f32.mrb[60].mxu0  ;;  %5409 = vmatmul.mubr.msk.f32.gmra.mrb[26].mxu1 %vm1152_vm2, %v7569_v48  ;;  %6784 = vmatprep.subr.bf16.mxu1 %v6783_v25  ;;  %v8658_v59 = vpop.permute.xlu1 %1985  ;;  %vm2097_vm2 = vcmp.eq.s32.totalorder %v8410_v21, %v7846_v15  ;;  %v2587_v25 = vld [vmem:[%s10771_s5 + $0x50] sm:$0xff] }
 0x1d4   :  { %v1047_v27 = vpop.f32.mrb[61].mxu0  ;;  %6786 = vmatpush3.bf16.msra.mxu1 %v6785_v35  ;;  %5410 = vmatprep.mubr.msk.f32.mxu1 %vm1157_vm3, %v7569_v48  ;;  %vm2082_vm3 = vcmp.eq.s32.totalorder %v8440_v28, %v7846_v15 }
 0x1d5   :  { %v6787_v31 = vpack.c.bf16 %v6396_v0, %v1047_v27  ;;  %vm6833_vm10 = vmpackc.low %vm2082_vm3, %vm2081_vm9  ;;  %v2037_v21 = vpop.permute.xlu0 %2036  ;;  %vm2103_vm9 = vcmp.eq.s32.totalorder %v8575_v54, %v7846_v15  ;;  %v2588_v0 = vld [vmem:[%s10771_s5 + $0x58] sm:$0xff] }
 0x1d6   :  { %v6879_v27 = vpack.c.bf16 %v2588_v0, %v2587_v25 }
 0x1d7   :  { %v6399_v34 = vpop.f32.mrb[62].mxu0  ;;  %5411 = vmatmul.mubr.msk.f32.gmra.mrb[28].mxu1 %vm1156_vm4, %v7569_v48  ;;  %6788 = vmatprep.subr.bf16.mxu1 %v6787_v31  ;;  %vm6831_vm4 = vmpackc.low %vm2098_vm14, %vm2097_vm2  ;;  %v2040_v63 = vpop.permute.xlu1 %2039  ;;  %vm1110_vm14 = vcmp.eq.s32.totalorder %v8357_v7, %v8637_v46  ;;  %vm1115_vm2 = vcmp.eq.s32.totalorder %v8384_v14, %v8622_v16  ;;  %v2589_v31 = vld [vmem:[%s10771_s5 + $0x60] sm:$0xff] }
 0x1d8   :  { %v1057_v35 = vpop.f32.mrb[63].mxu0  ;;  %6790 = vmatpush3.bf16.msra.mxu1 %v6789_v42  ;;  %5412 = vmatprep.mubr.msk.f32.mxu1 %vm1161_vm5, %v7569_v48  ;;  %vm1106_vm5 = vcmp.eq.s32.totalorder %v8327_v61, %v8637_v46  ;;  %v2579_v42 = vld [vmem:[%s10771_s5 + $0x10] sm:$0xff] }
 0x1d9   :  { %v6791_v51 = vpack.c.bf16 %v6399_v34, %v1057_v35  ;;  %v1989_v11 = vpop.permute.xlu0 %1988  ;;  %v2592_v34 = vld [vmem:[%s10771_s5 + $0x78] sm:$0xff] }
 0x1db   :  { %5413 = vmatmul.mubr.msk.f32.gmra.mrb[30].mxu1 %vm1160_vm6, %v7569_v48  ;;  %6792 = vmatprep.subr.bf16.mxu1 %v6791_v51  ;;  %vm2100_vm6 = vcmp.eq.s32.totalorder %v8481_v37, %v7846_v15 }
 0x1dc   :  { %6794 = vmatpush3.bf16.msra.mxu1 %v10871_v45  ;;  %5414 = vmatprep.mubr.msk.f32.mxu1 %vm1103_vm8, %v7569_v48  ;;  %vm1111_vm8 = vcmp.eq.s32.totalorder %v8357_v7, %v8622_v16  ;;  %vm6835_vm11 = vmpackc.low %vm2100_vm6, %vm2099_vm7  ;;  %vm2085_vm6 = vcmp.eq.s32.totalorder %v8554_v20, %v7846_v15  ;;  %vm1114_vm7 = vcmp.eq.s32.totalorder %v8384_v14, %v8637_v46 }
 0x1dd   :  { %6828 = vmatprep.subr.msk.bf16.mxu1 %vm6827_vm12, %v10872_v62  ;;  %vm2084_vm12 = vcmp.eq.s32.totalorder %v8504_v12, %v7846_v15  ;;  %v2043_v28 = vpop.permute.xlu0 %2042  ;;  %v6863_v12 = vpack.c.bf16 %v2580_v47, %v2579_v42  ;;  %v8871_v20 = vrot.slane %v8338_v1, %v8616_v29  ;;  %v2583_v1 = vld [vmem:[%s10771_s5 + $0x30] sm:$0xff] }
 0x1df   :  { %5415 = vmatmul.mubr.msk.f32.vlgmr.msra.gmra.mrb[32].mxu1 %vm1102_vm13, %v7569_v48  ;;  %vm2083_vm13 = vcmp.eq.s32.totalorder %v8511_v50, %v7846_v15  ;;  %6864 = vmatprep.subr.bf16.mxu0 %v6863_v12  ;;  %v2581_v50 = vld [vmem:[%s10771_s5 + $0x20] sm:$0xff] }
 0x1e0   :  { %6830 = vmatpush3.bf16.msk.msra.mxu1 %vm6829_vm1, %v10872_v62  ;;  %5416 = vmatprep.mubr.msk.f32.mxu1 %vm1107_vm15, %v7569_v48  ;;  %vm2102_vm15 = vcmp.eq.s32.totalorder %v8529_v60, %v7846_v15  ;;  %vm2101_vm1 = vcmp.eq.s32.totalorder %v8531_v2, %v7846_v15  ;;  %vm6837_vm3 = vmpackc.low %vm2084_vm12, %vm2083_vm13  ;;  %v1992_v2 = vpop.permute.xlu1 %1991  ;;  %vm2088_vm13 = vcmp.eq.s32.totalorder %v8590_v6, %v7846_v15  ;;  %v2582_v60 = vld [vmem:[%s10771_s5 + $0x28] sm:$0xff]  ;;  %v2585_v6 = vld [vmem:[%s10771_s5 + $0x40] sm:$0xff] }
 0x1e1   :  { %6832 = vmatprep.subr.msk.bf16.mxu1 %vm6831_vm4, %v10872_v62  ;;  %vm6839_vm4 = vmpackc.low %vm2102_vm15, %vm2101_vm1  ;;  %vm1118_vm15 = vcmp.eq.s32.totalorder %v8405_v19, %v8637_v46  ;;  %vm2106_vm1 = vcmp.eq.s32.totalorder %v8624_v17, %v7846_v15  ;;  %v1995_v37 = vpop.permute.xlu0 %1994  ;;  %6866 = vmatpush3.bf16.msra.mxu0 %v6863_v12 }
 0x1e3   :  { %5417 = vmatmul.mubr.msk.f32.gmra.mrb[34].mxu1 %vm1106_vm5, %v7569_v48  ;;  %vm2086_vm5 = vcmp.eq.s32.totalorder %v8546_v57, %v7846_v15  ;;  %v6867_v57 = vpack.c.bf16 %v2582_v60, %v2581_v50 }
 0x1e4   :  { %6834 = vmatpush3.bf16.msk.msra.mxu1 %vm6833_vm10, %v10872_v62  ;;  %5418 = vmatprep.mubr.msk.f32.mxu1 %vm1111_vm8, %v7569_v48  ;;  %vm2104_vm8 = vcmp.eq.s32.totalorder %v8573_v52, %v7846_v15  ;;  %vm1119_vm10 = vcmp.eq.s32.totalorder %v8405_v19, %v8622_v16  ;;  %v2046_v22 = vpop.permute.xlu1 %2045  ;;  %v2584_v52 = vld [vmem:[%s10771_s5 + $0x38] sm:$0xff] }
 0x1e5   :  { %6836 = vmatprep.subr.msk.bf16.mxu1 %vm6835_vm11, %v10872_v62  ;;  %vm6841_vm11 = vmpackc.low %vm2086_vm5, %vm2085_vm6  ;;  %vm2090_vm6 = vcmp.eq.s32.totalorder %v8658_v59, %v7846_v15  ;;  %6868 = vmatprep.subr.bf16.mxu0 %v6867_v57  ;;  %v6871_v54 = vpack.c.bf16 %v2584_v52, %v2583_v1 }
 0x1e6   :  { %vm6843_vm12 = vmpackc.low %vm2104_vm8, %vm2103_vm9  ;;  %vm1122_vm8 = vcmp.eq.s32.totalorder %v8430_v26, %v8637_v46  ;;  %vm2108_vm9 = vcmp.eq.s32.totalorder %v2040_v63, %v7846_v15  ;;  %6870 = vmatpush3.bf16.msra.mxu0 %v6867_v57 }
 0x1e7   :  { %5419 = vmatmul.mubr.msk.f32.gmra.mrb[36].mxu1 %vm1110_vm14, %v7569_v48  ;;  %vm2087_vm14 = vcmp.eq.s32.totalorder %v8598_v24, %v7846_v15  ;;  %6872 = vmatprep.subr.bf16.mxu0 %v6871_v54  ;;  %v6875_v24 = vpack.c.bf16 %v2586_v23, %v2585_v6 }
 0x1e8   :  { %6838 = vmatpush3.bf16.msk.msra.mxu1 %vm6837_vm3, %v10872_v62  ;;  %5420 = vmatprep.mubr.msk.f32.mxu1 %vm1115_vm2, %v7569_v48  ;;  %vm2105_vm2 = vcmp.eq.s32.totalorder %v8626_v33, %v7846_v15  ;;  %vm1123_vm3 = vcmp.eq.s32.totalorder %v8430_v26, %v8622_v16  ;;  %v1998_v30 = vpop.permute.xlu1 %1997  ;;  %v2591_v33 = vld [vmem:[%s10771_s5 + $0x70] sm:$0xff] }
 0x1e9   :  { %6840 = vmatprep.subr.msk.bf16.mxu1 %vm6839_vm4, %v10872_v62  ;;  %vm6845_vm4 = vmpackc.low %vm2088_vm13, %vm2087_vm14  ;;  %vm1126_vm14 = vcmp.eq.s32.totalorder %v8455_v32, %v8637_v46 }
 0x1ea   :  { %vm6847_vm5 = vmpackc.low %vm2106_vm1, %vm2105_vm2  ;;  %vm2092_vm1 = vcmp.eq.s32.totalorder %v1992_v2, %v7846_v15  ;;  %vm2091_vm2 = vcmp.eq.s32.totalorder %v1989_v11, %v7846_v15  ;;  %6874 = vmatpush3.bf16.msra.mxu0 %v6871_v54 }
 0x1eb   :  { %5421 = vmatmul.mubr.msk.f32.gmra.mrb[38].mxu1 %vm1114_vm7, %v7569_v48  ;;  %vm2089_vm7 = vcmp.eq.s32.totalorder %v8660_v9, %v7846_v15  ;;  %6876 = vmatprep.subr.bf16.mxu0 %v6875_v24 }
 0x1ec   :  { %6842 = vmatpush3.bf16.msk.msra.mxu1 %vm6841_vm11, %v10872_v62  ;;  %5422 = vmatprep.mubr.msk.f32.mxu1 %vm1119_vm10, %v7569_v48  ;;  %vm2107_vm10 = vcmp.eq.s32.totalorder %v2037_v21, %v7846_v15  ;;  %vm1127_vm11 = vcmp.eq.s32.totalorder %v8455_v32, %v8622_v16  ;;  %vm6849_vm13 = vmpackc.low %vm2090_vm6, %vm2089_vm7  ;;  %vm1131_vm6 = vcmp.eq.s32.totalorder %v8476_v36, %v8622_v16 }
 0x1ed   :  { %6844 = vmatprep.subr.msk.bf16.mxu1 %vm6843_vm12, %v10872_v62  ;;  %vm1688_vm12 = vcmp.eq.s32.totalorder %v8455_v32, %v8346_v4  ;;  %vm6853_vm7 = vmpackc.low %vm2092_vm1, %vm2091_vm2  ;;  %vm1691_vm1 = vcmp.eq.s32.totalorder %v8476_v36, %v8350_v5  ;;  %vm1139_vm2 = vcmp.eq.s32.totalorder %v8518_v53, %v8622_v16 }
 0x1ee   :  { %5618 = vmatprep.mubr.msk.f32.mxu0 %vm1688_vm12, %v7569_v48  ;;  %vm1135_vm12 = vcmp.eq.s32.totalorder %v8499_v43, %v8622_v16  ;;  %6878 = vmatpush3.bf16.msra.mxu0 %v6875_v24 }
 0x1ef   :  { %5423 = vmatmul.mubr.msk.f32.gmra.mrb[40].mxu1 %vm1118_vm15, %v7569_v48  ;;  %vm6851_vm15 = vmpackc.low %vm2108_vm9, %vm2107_vm10  ;;  %vm2094_vm9 = vcmp.eq.s32.totalorder %v1998_v30, %v7846_v15  ;;  %vm2093_vm10 = vcmp.eq.s32.totalorder %v1995_v37, %v7846_v15  ;;  %6880 = vmatprep.subr.bf16.mxu0 %v6879_v27 }
 0x1f0   :  { %6846 = vmatpush3.bf16.msk.msra.mxu1 %vm6845_vm4, %v10872_v62  ;;  %5424 = vmatprep.mubr.msk.f32.mxu1 %vm1123_vm3, %v7569_v48  ;;  %vm1687_vm3 = vcmp.eq.s32.totalorder %v8455_v32, %v8350_v5  ;;  %vm2110_vm4 = vcmp.eq.s32.totalorder %v2046_v22, %v7846_v15 }
 0x1f1   :  { %6848 = vmatprep.subr.msk.bf16.mxu1 %vm6847_vm5, %v10872_v62  ;;  %vm2109_vm5 = vcmp.eq.s32.totalorder %v2043_v28, %v7846_v15  ;;  %5619 = vmatmul.mubr.msk.f32.gmra.mrb[76].mxu0 %vm1687_vm3, %v7569_v48  ;;  %vm1138_vm3 = vcmp.eq.s32.totalorder %v8518_v53, %v8637_v46 }
 0x1f2   :  { %6882 = vmatpush3.bf16.msra.mxu0 %v6879_v27 }
 0x1f3   :  { %5425 = vmatmul.mubr.msk.f32.gmra.mrb[42].mxu1 %vm1122_vm8, %v7569_v48  ;;  %vm6855_vm8 = vmpackc.low %vm2110_vm4, %vm2109_vm5  ;;  %vm1143_vm4 = vcmp.eq.s32.totalorder %v8527_v58, %v8622_v16  ;;  %vm1696_vm5 = vcmp.eq.s32.totalorder %v8499_v43, %v8346_v4 }
 0x1f4   :  { %6850 = vmatpush3.bf16.msk.msra.mxu1 %vm6849_vm13, %v10872_v62  ;;  %5426 = vmatprep.mubr.msk.f32.mxu1 %vm1127_vm11, %v7569_v48  ;;  %vm1130_vm11 = vcmp.eq.s32.totalorder %v8476_v36, %v8637_v46  ;;  %vm1692_vm13 = vcmp.eq.s32.totalorder %v8476_v36, %v8346_v4 }
 0x1f5   :  { %6852 = vmatprep.subr.msk.bf16.mxu1 %vm6851_vm15, %v10872_v62  ;;  %5620 = vmatprep.mubr.msk.f32.mxu0 %vm1692_vm13, %v7569_v48  ;;  %vm1134_vm15 = vcmp.eq.s32.totalorder %v8499_v43, %v8637_v46  ;;  %vm1699_vm13 = vcmp.eq.s32.totalorder %v8518_v53, %v8350_v5 }
 0x1f6   :  { %5621 = vmatmul.mubr.msk.f32.gmra.mrb[78].mxu0 %vm1691_vm1, %v7569_v48  ;;  %vm1159_vm1 = vcmp.eq.s32.totalorder %v8587_v18, %v8622_v16 }
 0x1f7   :  { %5427 = vmatmul.mubr.msk.f32.gmra.mrb[44].mxu1 %vm1126_vm14, %v7569_v48  ;;  %vm6857_vm14 = vmpackc.low %vm2094_vm9, %vm2093_vm10  ;;  %5622 = vmatprep.mubr.msk.f32.mxu0 %vm1696_vm5, %v7569_v48  ;;  %vm1146_vm9 = vcmp.eq.s32.totalorder %v8543_v56, %v8637_v46  ;;  %vm1151_vm10 = vcmp.eq.s32.totalorder %v8559_v3, %v8622_v16  ;;  %vm1163_vm5 = vcmp.eq.s32.totalorder %v8603_v8, %v8622_v16 }
 0x1f8   :  { %6854 = vmatpush3.bf16.msk.msra.mxu1 %vm6853_vm7, %v10872_v62  ;;  %5428 = vmatprep.mubr.msk.f32.mxu1 %vm1131_vm6, %v7569_v48  ;;  %vm1142_vm6 = vcmp.eq.s32.totalorder %v8527_v58, %v8637_v46  ;;  %vm1695_vm7 = vcmp.eq.s32.totalorder %v8499_v43, %v8350_v5 }
 0x1f9   :  { %6856 = vmatprep.subr.msk.bf16.mxu1 %vm6855_vm8, %v10872_v62  ;;  %vm1147_vm8 = vcmp.eq.s32.totalorder %v8543_v56, %v8622_v16 }
 0x1fa   :  { %5623 = vmatmul.mubr.msk.f32.gmra.mrb[80].mxu0 %vm1695_vm7, %v7569_v48  ;;  %vm1666_vm7 = vcmp.eq.s32.totalorder %v8239_v41, %v8856_v49 }
 0x1fb   :  { %5429 = vmatmul.mubr.msk.f32.gmra.mrb[46].mxu1 %vm1130_vm11, %v7569_v48  ;;  %vm1700_vm11 = vcmp.eq.s32.totalorder %v8518_v53, %v8346_v4 }
 0x1fc   :  { %6858 = vmatpush3.bf16.msk.msra.mxu1 %vm6857_vm14, %v10872_v62  ;;  %5430 = vmatprep.mubr.msk.f32.mxu1 %vm1135_vm12, %v7569_v48  ;;  %vm1150_vm12 = vcmp.eq.s32.totalorder %v8559_v3, %v8637_v46  ;;  %vm1155_vm14 = vcmp.eq.s32.totalorder %v8571_v13, %v8622_v16  ;;  %v2590_v16 = vld [vmem:[%s10771_s5 + $0x68] sm:$0xff]  ;;  %s7573_s5 = smov 64  }
 0x1fd   :  { %5624 = vmatprep.mubr.msk.f32.mxu0 %vm1700_vm11, %v7569_v48  ;;  %vm1670_vm11 = vcmp.eq.s32.totalorder %v8327_v61, %v8856_v49  ;;  %v6883_v17 = vpack.c.bf16 %v2590_v16, %v2589_v31 }
 0x1fe   :  { %5625 = vmatmul.mubr.msk.f32.gmra.mrb[82].mxu0 %vm1699_vm13, %v7569_v48  ;;  %vm1674_vm13 = vcmp.eq.s32.totalorder %v8357_v7, %v8856_v49 }
 0x1ff   :  { %5431 = vmatmul.mubr.msk.f32.gmra.mrb[48].mxu1 %vm1134_vm15, %v7569_v48  ;;  %vm1154_vm15 = vcmp.eq.s32.totalorder %v8571_v13, %v8637_v46  ;;  %6884 = vmatprep.subr.bf16.mxu0 %v6883_v17 }
 0x200   :  { %5432 = vmatprep.mubr.msk.f32.mxu1 %vm1139_vm2, %v7569_v48  ;;  %vm1704_vm2 = vcmp.eq.s32.totalorder %v8527_v58, %v8346_v4  ;;  %6886 = vmatpush3.bf16.msra.mxu0 %v6883_v17 }
 0x201   :  { %5626 = vmatprep.mubr.msk.f32.mxu0 %vm1704_vm2, %v7569_v48  ;;  %vm1678_vm2 = vcmp.eq.s32.totalorder %v8384_v14, %v8856_v49 }
 0x203   :  { %5433 = vmatmul.mubr.msk.f32.gmra.mrb[50].mxu1 %vm1138_vm3, %v7569_v48  ;;  %vm1158_vm3 = vcmp.eq.s32.totalorder %v8587_v18, %v8637_v46 }
 0x204   :  { %5434 = vmatprep.mubr.msk.f32.mxu1 %vm1143_vm4, %v7569_v48  ;;  %vm1703_vm4 = vcmp.eq.s32.totalorder %v8527_v58, %v8350_v5 }
 0x205   :  { %5627 = vmatmul.mubr.msk.f32.gmra.mrb[84].mxu0 %vm1703_vm4, %v7569_v48  ;;  %vm1682_vm4 = vcmp.eq.s32.totalorder %v8405_v19, %v8856_v49 }
 0x207   :  { %5435 = vmatmul.mubr.msk.f32.gmra.mrb[52].mxu1 %vm1142_vm6, %v7569_v48  ;;  %vm1162_vm6 = vcmp.eq.s32.totalorder %v8603_v8, %v8637_v46 }
 0x208   :  { %5436 = vmatprep.mubr.msk.f32.mxu1 %vm1147_vm8, %v7569_v48  ;;  %vm1708_vm8 = vcmp.eq.s32.totalorder %v8543_v56, %v8346_v4 }
 0x209   :  { %5628 = vmatprep.mubr.msk.f32.mxu0 %vm1708_vm8, %v7569_v48  ;;  %vm1686_vm8 = vcmp.eq.s32.totalorder %v8430_v26, %v8856_v49 }
 0x20b   :  { %5437 = vmatmul.mubr.msk.f32.gmra.mrb[54].mxu1 %vm1146_vm9, %v7569_v48  ;;  %vm1665_vm9 = vcmp.eq.s32.totalorder %v8239_v41, %v8871_v20 }
 0x20c   :  { %5438 = vmatprep.mubr.msk.f32.mxu1 %vm1151_vm10, %v7569_v48  ;;  %vm1707_vm10 = vcmp.eq.s32.totalorder %v8543_v56, %v8350_v5 }
 0x20d   :  { %5629 = vmatmul.mubr.msk.f32.gmra.mrb[86].mxu0 %vm1707_vm10, %v7569_v48  ;;  %vm1720_vm10 = vcmp.eq.s32.totalorder %v8587_v18, %v8346_v4 }
 0x20f   :  { %5439 = vmatmul.mubr.msk.f32.gmra.mrb[56].mxu1 %vm1150_vm12, %v7569_v48  ;;  %vm1669_vm12 = vcmp.eq.s32.totalorder %v8327_v61, %v8871_v20 }
 0x210   :  { %5440 = vmatprep.mubr.msk.f32.mxu1 %vm1155_vm14, %v7569_v48  ;;  %vm1712_vm14 = vcmp.eq.s32.totalorder %v8559_v3, %v8346_v4 }
 0x211   :  { %5630 = vmatprep.mubr.msk.f32.mxu0 %vm1712_vm14, %v7569_v48  ;;  %vm1724_vm14 = vcmp.eq.s32.totalorder %v8603_v8, %v8346_v4 }
 0x213   :  { %5441 = vmatmul.mubr.msk.f32.gmra.mrb[58].mxu1 %vm1154_vm15, %v7569_v48  ;;  %vm1673_vm15 = vcmp.eq.s32.totalorder %v8357_v7, %v8871_v20 }
 0x214   :  { %5442 = vmatprep.mubr.msk.f32.mxu1 %vm1159_vm1, %v7569_v48  ;;  %vm1711_vm1 = vcmp.eq.s32.totalorder %v8559_v3, %v8350_v5 }
 0x215   :  { %5631 = vmatmul.mubr.msk.f32.gmra.mrb[88].mxu0 %vm1711_vm1, %v7569_v48  ;;  %vm1723_vm1 = vcmp.eq.s32.totalorder %v8603_v8, %v8350_v5 }
 0x217   :  { %5443 = vmatmul.mubr.msk.f32.gmra.mrb[60].mxu1 %vm1158_vm3, %v7569_v48  ;;  %vm1677_vm3 = vcmp.eq.s32.totalorder %v8384_v14, %v8871_v20 }
 0x218   :  { %5444 = vmatprep.mubr.msk.f32.mxu1 %vm1163_vm5, %v7569_v48  ;;  %vm1716_vm5 = vcmp.eq.s32.totalorder %v8571_v13, %v8346_v4  ;;  %v6887_v4 = vpack.c.bf16 %v2592_v34, %v2591_v33 }
 0x219   :  { %5632 = vmatprep.mubr.msk.f32.mxu0 %vm1716_vm5, %v7569_v48  ;;  %vm1702_vm5 = vcmp.eq.s32.totalorder %v8518_v53, %v8856_v49 }
 0x21a   :  { %6888 = vmatprep.subr.bf16.mxu0 %v6887_v4 }
 0x21b   :  { %5445 = vmatmul.mubr.msk.f32.gmra.mrb[62].mxu1 %vm1162_vm6, %v7569_v48  ;;  %vm1681_vm6 = vcmp.eq.s32.totalorder %v8405_v19, %v8871_v20  ;;  %6890 = vmatpush3.bf16.msra.mxu0 %v6887_v4 }
 0x21c   :  { %5670 = vmatprep.mubr.msk.f32.mxu1 %vm1666_vm7, %v7569_v48  ;;  %vm1715_vm7 = vcmp.eq.s32.totalorder %v8571_v13, %v8350_v5 }
 0x21d   :  { %5633 = vmatmul.mubr.msk.f32.gmra.mrb[90].mxu0 %vm1715_vm7, %v7569_v48  ;;  %vm1706_vm7 = vcmp.eq.s32.totalorder %v8527_v58, %v8856_v49 }
 0x21e   :  { %5634 = vmatprep.mubr.msk.f32.mxu0 %vm1720_vm10, %v7569_v48  ;;  %vm1709_vm10 = vcmp.eq.s32.totalorder %v8543_v56, %v8871_v20 }
 0x21f   :  { %5671 = vmatmul.mubr.msk.f32.vlgmr.msra.gmra.mrb[64].mxu1 %vm1665_vm9, %v7569_v48  ;;  %vm1685_vm9 = vcmp.eq.s32.totalorder %v8430_v26, %v8871_v20 }
 0x220   :  { %5672 = vmatprep.mubr.msk.f32.mxu1 %vm1670_vm11, %v7569_v48  ;;  %vm1690_vm11 = vcmp.eq.s32.totalorder %v8455_v32, %v8856_v49 }
 0x223   :  { %5673 = vmatmul.mubr.msk.f32.gmra.mrb[66].mxu1 %vm1669_vm12, %v7569_v48  ;;  %vm1719_vm12 = vcmp.eq.s32.totalorder %v8587_v18, %v8350_v5  ;;  %v7571_v5 = vmov 0.0|0.0  }
 0x224   :  { %5674 = vmatprep.mubr.msk.f32.mxu1 %vm1674_vm13, %v7569_v48  ;;  %5635 = vmatmul.mubr.msk.f32.gmra.mrb[92].mxu0 %vm1719_vm12, %v7569_v48  ;;  %vm1689_vm13 = vcmp.eq.s32.totalorder %v8455_v32, %v8871_v20  ;;  %vm1713_vm12 = vcmp.eq.s32.totalorder %v8559_v3, %v8871_v20 }
 0x225   :  { %5636 = vmatprep.mubr.msk.f32.mxu0 %vm1724_vm14, %v7569_v48  ;;  %6891 = vmatprep.subr.bf16.mxu1 %v7571_v5  ;;  %vm1717_vm14 = vcmp.eq.s32.totalorder %v8571_v13, %v8871_v20 }
 0x227   :  { %5675 = vmatmul.mubr.msk.f32.gmra.mrb[68].mxu1 %vm1673_vm15, %v7569_v48  ;;  %vm1694_vm15 = vcmp.eq.s32.totalorder %v8476_v36, %v8856_v49 }
 0x228   :  { %5676 = vmatprep.mubr.msk.f32.mxu1 %vm1678_vm2, %v7569_v48  ;;  %5637 = vmatmul.mubr.msk.f32.gmra.mrb[94].mxu0 %vm1723_vm1, %v7569_v48  ;;  %vm1693_vm2 = vcmp.eq.s32.totalorder %v8476_v36, %v8871_v20  ;;  %vm1721_vm1 = vcmp.eq.s32.totalorder %v8587_v18, %v8871_v20 }
 0x22b   :  { %5677 = vmatmul.mubr.msk.f32.gmra.mrb[70].mxu1 %vm1677_vm3, %v7569_v48  ;;  %vm1698_vm3 = vcmp.eq.s32.totalorder %v8499_v43, %v8856_v49 }
 0x22c   :  { %5678 = vmatprep.mubr.msk.f32.mxu1 %vm1682_vm4, %v7569_v48  ;;  %vm1697_vm4 = vcmp.eq.s32.totalorder %v8499_v43, %v8871_v20 }
 0x22f   :  { %5679 = vmatmul.mubr.msk.f32.gmra.mrb[72].mxu1 %vm1681_vm6, %v7569_v48  ;;  %vm1701_vm6 = vcmp.eq.s32.totalorder %v8518_v53, %v8871_v20 }
 0x230   :  { %5680 = vmatprep.mubr.msk.f32.mxu1 %vm1686_vm8, %v7569_v48  ;;  %vm1705_vm8 = vcmp.eq.s32.totalorder %v8527_v58, %v8871_v20 }
 0x233   :  { %5681 = vmatmul.mubr.msk.f32.gmra.mrb[74].mxu1 %vm1685_vm9, %v7569_v48  ;;  %vm1710_vm9 = vcmp.eq.s32.totalorder %v8543_v56, %v8856_v49 }
 0x234   :  { %5682 = vmatprep.mubr.msk.f32.mxu1 %vm1690_vm11, %v7569_v48  ;;  %vm1714_vm11 = vcmp.eq.s32.totalorder %v8559_v3, %v8856_v49 }
 0x237   :  { %5683 = vmatmul.mubr.msk.f32.gmra.mrb[76].mxu1 %vm1689_vm13, %v7569_v48  ;;  %vm1718_vm13 = vcmp.eq.s32.totalorder %v8571_v13, %v8856_v49 }
 0x238   :  { %5684 = vmatprep.mubr.msk.f32.mxu1 %vm1694_vm15, %v7569_v48  ;;  %vm1722_vm15 = vcmp.eq.s32.totalorder %v8587_v18, %v8856_v49 }
 0x23b   :  { %5685 = vmatmul.mubr.msk.f32.gmra.mrb[78].mxu1 %vm1693_vm2, %v7569_v48  ;;  %vm1726_vm2 = vcmp.eq.s32.totalorder %v8603_v8, %v8856_v49 }
 0x23c   :  { %5686 = vmatprep.mubr.msk.f32.mxu1 %vm1698_vm3, %v7569_v48  ;;  %vm1725_vm3 = vcmp.eq.s32.totalorder %v8603_v8, %v8871_v20 }
 0x23f   :  { %5687 = vmatmul.mubr.msk.f32.gmra.mrb[80].mxu1 %vm1697_vm4, %v7569_v48  ;;  %vm7572_vm4 = vmmov 0  }
 0x240   :  { %5688 = vmatprep.mubr.msk.f32.mxu1 %vm1702_vm5, %v7569_v48  ;;  %vm2530_vm5 = vcmp.eq.s32.totalorder %v8327_v61, %v7846_v15 }
 0x243   :  { %5689 = vmatmul.mubr.msk.f32.gmra.mrb[82].mxu1 %vm1701_vm6, %v7569_v48  ;;  %vm2529_vm6 = vcmp.eq.s32.totalorder %v8239_v41, %v7846_v15 }
 0x244   :  { %5690 = vmatprep.mubr.msk.f32.mxu1 %vm1706_vm7, %v7569_v48 }
 0x247   :  { %5691 = vmatmul.mubr.msk.f32.gmra.mrb[84].mxu1 %vm1705_vm8, %v7569_v48 }
 0x248   :  { %5692 = vmatprep.mubr.msk.f32.mxu1 %vm1710_vm9, %v7569_v48 }
 0x24b   :  { %5693 = vmatmul.mubr.msk.f32.gmra.mrb[86].mxu1 %vm1709_vm10, %v7569_v48 }
 0x24c   :  { %5694 = vmatprep.mubr.msk.f32.mxu1 %vm1714_vm11, %v7569_v48 }
 0x24f   :  { %5695 = vmatmul.mubr.msk.f32.gmra.mrb[88].mxu1 %vm1713_vm12, %v7569_v48 }
 0x250   :  { %5696 = vmatprep.mubr.msk.f32.mxu1 %vm1718_vm13, %v7569_v48  ;;  %vm2532_vm13 = vcmp.eq.s32.totalorder %v8384_v14, %v7846_v15 }
 0x253   :  { %5697 = vmatmul.mubr.msk.f32.gmra.mrb[90].mxu1 %vm1717_vm14, %v7569_v48 }
 0x254   :  { %5698 = vmatprep.mubr.msk.f32.mxu1 %vm1722_vm15, %v7569_v48 }
 0x257   :  { %5699 = vmatmul.mubr.msk.f32.gmra.mrb[92].mxu1 %vm1721_vm1, %v7569_v48 }
 0x258   :  { %5700 = vmatprep.mubr.msk.f32.mxu1 %vm1726_vm2, %v7569_v48  ;;  %vm2531_vm2 = vcmp.eq.s32.totalorder %v8357_v7, %v7846_v15 }
 0x25b   :  { %5701 = vmatmul.mubr.msk.f32.gmra.mrb[94].mxu1 %vm1725_vm3, %v7569_v48 }
 0x272   :  { %v5823_v35 = vpop.f32.mrb[0].mxu1 }
 0x273   :  { %v5824_v46 = vpop.f32.mrb[1].mxu1 }
 0x274   :  { %v5825_v51 = vadd.f32 %v5824_v46, %v5823_v35 }
 0x276   :  { %v5826_v45 = vpop.f32.mrb[2].mxu1 }
 0x277   :  { %v5827_v59 = vpop.f32.mrb[3].mxu1 }
 0x278   :  { %v5828_v9 = vadd.f32 %v5827_v59, %v5826_v45 }
 0x27a   :  { %v5829_v62 = vpop.f32.mrb[4].mxu1 }
 0x27b   :  { %v5830_v63 = vpop.f32.mrb[5].mxu1 }
 0x27c   :  { %v5831_v21 = vadd.f32 %v5830_v63, %v5829_v62 }
 0x27e   :  { %v5832_v2 = vpop.f32.mrb[6].mxu1 }
 0x27f   :  { %v5833_v11 = vpop.f32.mrb[7].mxu1 }
 0x280   :  { %v9031_v22 = vadd.f32 %v5833_v11, %v5832_v2 }
 0x282   :  { %v5835_v28 = vpop.f32.mrb[8].mxu1 }
 0x283   :  { %v5836_v30 = vpop.f32.mrb[9].mxu1 }
 0x284   :  { %v9033_v37 = vadd.f32 %v5836_v30, %v5835_v28 }
 0x286   :  { %v5838_v38 = vpop.f32.mrb[10].mxu1 }
 0x287   :  { %v5839_v39 = vpop.f32.mrb[11].mxu1 }
 0x288   :  { %v9035_v48 = vadd.f32 %v5839_v39, %v5838_v38  ;;  %v10873_v39 = vmov 0.0  }
 0x289   :  { %6488 = vmatprep.mubr.msk.f32.mxu1 %vm7572_vm4, %v10873_v39 }
 0x28a   :  { %v5841_v40 = vpop.f32.mrb[12].mxu1 }
 0x28b   :  { %v5842_v42 = vpop.f32.mrb[13].mxu1 }
 0x28c   :  { %v9037_v47 = vadd.f32 %v5842_v42, %v5841_v40 }
 0x28e   :  { %v5844_v12 = vpop.f32.mrb[14].mxu1 }
 0x28f   :  { %v5845_v49 = vpop.f32.mrb[15].mxu1 }
 0x290   :  { %v9039_v50 = vadd.f32 %v5845_v49, %v5844_v12 }
 0x292   :  { %v5847_v60 = vpop.f32.mrb[16].mxu1 }
 0x293   :  { %v5848_v57 = vpop.f32.mrb[17].mxu1 }
 0x294   :  { %v9041_v20 = vadd.f32 %v5848_v57, %v5847_v60 }
 0x296   :  { %v5850_v1 = vpop.f32.mrb[18].mxu1 }
 0x297   :  { %v5851_v52 = vpop.f32.mrb[19].mxu1 }
 0x298   :  { %v9043_v54 = vadd.f32 %v5851_v52, %v5850_v1 }
 0x29a   :  { %v5853_v6 = vpop.f32.mrb[20].mxu1 }
 0x29b   :  { %v5854_v23 = vpop.f32.mrb[21].mxu1 }
 0x29c   :  { %v9045_v24 = vadd.f32 %v5854_v23, %v5853_v6 }
 0x29e   :  { %v5856_v25 = vpop.f32.mrb[22].mxu1 }
 0x29f   :  { %v5857_v0 = vpop.f32.mrb[23].mxu1 }
 0x2a0   :  { %v9047_v27 = vadd.f32 %v5857_v0, %v5856_v25 }
 0x2a2   :  { %v5859_v31 = vpop.f32.mrb[24].mxu1 }
 0x2a3   :  { %v5860_v16 = vpop.f32.mrb[25].mxu1 }
 0x2a4   :  { %v9049_v17 = vadd.f32 %v5860_v16, %v5859_v31 }
 0x2a6   :  { %v5862_v33 = vpop.f32.mrb[26].mxu1 }
 0x2a7   :  { %v5863_v34 = vpop.f32.mrb[27].mxu1 }
 0x2a8   :  { %v9051_v4 = vadd.f32 %v5863_v34, %v5862_v33 }
 0x2aa   :  { %v5865_v35 = vpop.f32.mrb[28].mxu1 }
 0x2ab   :  { %v5866_v46 = vpop.f32.mrb[29].mxu1 }
 0x2ac   :  { %v9053_v45 = vadd.f32 %v5866_v46, %v5865_v35 }
 0x2ae   :  { %v5868_v59 = vpop.f32.mrb[30].mxu1 }
 0x2af   :  { %v5869_v62 = vpop.f32.mrb[31].mxu1 }
 0x2b0   :  { %v9055_v63 = vadd.f32 %v5869_v62, %v5868_v59 }
 0x2b2   :  { %v5903_v2 = vpop.f32.mrb[32].mxu1 }
 0x2b3   :  { %v5904_v11 = vpop.f32.mrb[33].mxu1 }
 0x2b4   :  { %v5905_v28 = vadd.f32 %v5904_v11, %v5903_v2 }
 0x2b6   :  { %v1504_v30 = vadd.f32 %v5905_v28, %v5825_v51  ;;  %v5906_v38 = vpop.f32.mrb[34].mxu1 }
 0x2b7   :  { %v5907_v40 = vpop.f32.mrb[35].mxu1 }
 0x2b8   :  { %v5908_v42 = vadd.f32 %v5907_v40, %v5906_v38  ;;  %6432 = vmatprep.mubr.f32.mxu0 %v1504_v30 }
 0x2ba   :  { %v1509_v12 = vadd.f32 %v5908_v42, %v5828_v9  ;;  %v5909_v49 = vpop.f32.mrb[36].mxu1 }
 0x2bb   :  { %v5910_v60 = vpop.f32.mrb[37].mxu1 }
 0x2bc   :  { %v5911_v57 = vadd.f32 %v5910_v60, %v5909_v49  ;;  %6433 = vmatmul.mubr.f32.vlgmr.msra.gmra.mrb[96].mxu0 %v1509_v12  ;;  %v7081_v1 = vpack.i.bf16 %v1509_v12, %v1504_v30  ;;  %v6892_v52 = vpack.c.bf16 %v1509_v12, %v1504_v30  ;;  %v5983_v30 = vpop.f32.mrb[64].mxu0 }
 0x2bd   :  { %v5984_v40 = vpop.f32.mrb[65].mxu0 }
 0x2be   :  { %v1514_v6 = vadd.f32 %v5911_v57, %v5831_v21  ;;  %v5912_v23 = vpop.f32.mrb[38].mxu1  ;;  %7082 = vrot.lane.b32.xlu1 %v7081_v1, %s7573_s5  ;;  %7077 = vrot.lane.b32.xlu0 %v7081_v1, %s7574_s25  ;;  %v9071_v42 = vadd.f32 %v5984_v40, %v5983_v30  ;;  %v5986_v49 = vpop.f32.mrb[66].mxu0 }
 0x2bf   :  { %6893 = vmatpush3.bf16.xpose.msra.mxu1 %v6892_v52  ;;  %6916 = vmatprep.subr.bf16.mxu0 %v6892_v52  ;;  %v5913_v51 = vpop.f32.mrb[39].mxu1  ;;  %v5987_v57 = vpop.f32.mrb[67].mxu0 }
 0x2c0   :  { %v5914_v25 = vadd.f32 %v5913_v51, %v5912_v23  ;;  %6918 = vmatpush3.bf16.msra.mxu0 %v6892_v52  ;;  %6435 = vmatprep.mubr.f32.mxu0 %v1514_v6  ;;  %v9076_v52 = vadd.f32 %v5987_v57, %v5986_v49 }
 0x2c1   :  { %6894 = vmatprep.subr.bf16.mxu1 %v7571_v5 }
 0x2c2   :  { %v1519_v9 = vadd.f32 %v5914_v25, %v9031_v22  ;;  %v5915_v0 = vpop.f32.mrb[40].mxu1  ;;  %7087 = vrot.lane.b32.xlu1 %v7081_v1, %s7575_s26  ;;  %v5989_v25 = vpop.f32.mrb[68].mxu0 }
 0x2c3   :  { %v5916_v21 = vpop.f32.mrb[41].mxu1 }
 0x2c4   :  { %v5917_v31 = vadd.f32 %v5916_v21, %v5915_v0  ;;  %6436 = vmatmul.mubr.f32.gmra.mrb[98].mxu0 %v1519_v9  ;;  %v7091_v16 = vpack.i.bf16 %v1519_v9, %v1514_v6  ;;  %v6895_v33 = vpack.c.bf16 %v1519_v9, %v1514_v6  ;;  %v5990_v21 = vpop.f32.mrb[69].mxu0 }
 0x2c6   :  { %v1524_v34 = vadd.f32 %v5917_v31, %v9033_v37  ;;  %v5918_v35 = vpop.f32.mrb[42].mxu1  ;;  %7092 = vrot.lane.b32.xlu1 %v7091_v16, %s7574_s25  ;;  %6920 = vmatprep.subr.bf16.mxu0 %v6895_v33  ;;  %v9080_v31 = vadd.f32 %v5990_v21, %v5989_v25 }
 0x2c7   :  { %6896 = vmatpush3.bf16.xpose.msra.mxu1 %v6895_v33  ;;  %v5919_v46 = vpop.f32.mrb[43].mxu1  ;;  %6922 = vmatpush3.bf16.msra.mxu0 %v6895_v33  ;;  %v5992_v33 = vpop.f32.mrb[70].mxu0 }
 0x2c8   :  { %v5920_v59 = vadd.f32 %v5919_v46, %v5918_v35  ;;  %6438 = vmatprep.mubr.f32.mxu0 %v1524_v34  ;;  %6897 = vmatprep.subr.bf16.mxu1 %v7571_v5 }
 0x2ca   :  { %v1529_v22 = vadd.f32 %v5920_v59, %v9035_v48  ;;  %v5921_v62 = vpop.f32.mrb[44].mxu1  ;;  %7097 = vrot.lane.b32.xlu1 %v7091_v16, %s7573_s5 }
 0x2cb   :  { %v5922_v2 = vpop.f32.mrb[45].mxu1 }
 0x2cc   :  { %v5923_v11 = vadd.f32 %v5922_v2, %v5921_v62  ;;  %6439 = vmatmul.mubr.f32.gmra.mrb[100].mxu0 %v1529_v22  ;;  %v7106_v37 = vpack.i.bf16 %v1529_v22, %v1524_v34  ;;  %v6898_v28 = vpack.c.bf16 %v1529_v22, %v1524_v34 }
 0x2ce   :  { %v1534_v38 = vadd.f32 %v5923_v11, %v9037_v47  ;;  %v5924_v39 = vpop.f32.mrb[46].mxu1  ;;  %7102 = vrot.lane.b32.xlu1 %v7091_v16, %s7575_s26  ;;  %7107 = vrot.lane.b32.xlu0 %v7106_v37, %s7574_s25 }
 0x2cf   :  { %6899 = vmatpush3.bf16.xpose.msra.mxu1 %v6898_v28  ;;  %6924 = vmatprep.subr.bf16.mxu0 %v6898_v28  ;;  %v5925_v48 = vpop.f32.mrb[47].mxu1 }
 0x2d0   :  { %v5926_v12 = vadd.f32 %v5925_v48, %v5924_v39  ;;  %6926 = vmatpush3.bf16.msra.mxu0 %v6898_v28  ;;  %6441 = vmatprep.mubr.f32.mxu0 %v1534_v38 }
 0x2d1   :  { %6900 = vmatprep.subr.bf16.mxu1 %v7571_v5 }
 0x2d2   :  { %v1539_v60 = vadd.f32 %v5926_v12, %v9039_v50  ;;  %v5927_v47 = vpop.f32.mrb[48].mxu1  ;;  %7112 = vrot.lane.b32.xlu1 %v7106_v37, %s7573_s5 }
 0x2d3   :  { %v5928_v1 = vpop.f32.mrb[49].mxu1 }
 0x2d4   :  { %v5929_v6 = vadd.f32 %v5928_v1, %v5927_v47  ;;  %6442 = vmatmul.mubr.f32.gmra.mrb[102].mxu0 %v1539_v60  ;;  %v6901_v23 = vpack.c.bf16 %v1539_v60, %v1534_v38  ;;  %v7121_v51 = vpack.i.bf16 %v1539_v60, %v1534_v38 }
 0x2d6   :  { %v1544_v9 = vadd.f32 %v5929_v6, %v9041_v20  ;;  %v5930_v0 = vpop.f32.mrb[50].mxu1  ;;  %7117 = vrot.lane.b32.xlu1 %v7106_v37, %s7575_s26  ;;  %6928 = vmatprep.subr.bf16.mxu0 %v6901_v23  ;;  %v5993_v20 = vpop.f32.mrb[71].mxu0 }
 0x2d7   :  { %6902 = vmatpush3.bf16.xpose.msra.mxu1 %v6901_v23  ;;  %v5931_v50 = vpop.f32.mrb[51].mxu1  ;;  %6930 = vmatpush3.bf16.msra.mxu0 %v6901_v23  ;;  %v9085_v59 = vadd.f32 %v5993_v20, %v5992_v33  ;;  %v5995_v11 = vpop.f32.mrb[72].mxu0 }
 0x2d8   :  { %v5932_v16 = vadd.f32 %v5931_v50, %v5930_v0  ;;  %6444 = vmatprep.mubr.f32.mxu0 %v1544_v9  ;;  %6903 = vmatprep.subr.bf16.mxu1 %v7571_v5 }
 0x2da   :  { %v1549_v34 = vadd.f32 %v5932_v16, %v9043_v54  ;;  %v5933_v35 = vpop.f32.mrb[52].mxu1  ;;  %7122 = vrot.lane.b32.xlu1 %v7121_v51, %s7574_s25  ;;  %v5996_v54 = vpop.f32.mrb[73].mxu0 }
 0x2db   :  { %v5934_v46 = vpop.f32.mrb[53].mxu1  ;;  %v9090_v38 = vadd.f32 %v5996_v54, %v5995_v11  ;;  %v5998_v40 = vpop.f32.mrb[74].mxu0 }
 0x2dc   :  { %v5935_v22 = vadd.f32 %v5934_v46, %v5933_v35  ;;  %6445 = vmatmul.mubr.f32.gmra.mrb[104].mxu0 %v1549_v34  ;;  %v7136_v62 = vpack.i.bf16 %v1549_v34, %v1544_v9  ;;  %v6904_v2 = vpack.c.bf16 %v1549_v34, %v1544_v9  ;;  %v5999_v12 = vpop.f32.mrb[75].mxu0 }
 0x2dd   :  { %v9096_v60 = vadd.f32 %v5999_v12, %v5998_v40  ;;  %v6001_v6 = vpop.f32.mrb[76].mxu0 }
 0x2de   :  { %v1554_v37 = vadd.f32 %v5935_v22, %v9045_v24  ;;  %v5936_v28 = vpop.f32.mrb[54].mxu1  ;;  %7127 = vrot.lane.b32.xlu1 %v7121_v51, %s7573_s5  ;;  %7137 = vrot.lane.b32.xlu0 %v7136_v62, %s7574_s25 }
 0x2df   :  { %6905 = vmatpush3.bf16.xpose.msra.mxu1 %v6904_v2  ;;  %6932 = vmatprep.subr.bf16.mxu0 %v6904_v2  ;;  %v5937_v30 = vpop.f32.mrb[55].mxu1 }
 0x2e0   :  { %v5938_v39 = vadd.f32 %v5937_v30, %v5936_v28  ;;  %6934 = vmatpush3.bf16.msra.mxu0 %v6904_v2  ;;  %6447 = vmatprep.mubr.f32.mxu0 %v1554_v37 }
 0x2e1   :  { %6906 = vmatprep.subr.bf16.mxu1 %v7571_v5 }
 0x2e2   :  { %v1559_v48 = vadd.f32 %v5938_v39, %v9047_v27  ;;  %v5939_v24 = vpop.f32.mrb[56].mxu1  ;;  %7132 = vrot.lane.b32.xlu1 %v7121_v51, %s7575_s26  ;;  %7142 = vrot.lane.b32.xlu0 %v7136_v62, %s7573_s5  ;;  %v6002_v27 = vpop.f32.mrb[77].mxu0 }
 0x2e3   :  { %v5940_v49 = vpop.f32.mrb[57].mxu1  ;;  %v9102_v9 = vadd.f32 %v6002_v27, %v6001_v6  ;;  %v6004_v21 = vpop.f32.mrb[78].mxu0 }
 0x2e4   :  { %v5941_v47 = vadd.f32 %v5940_v49, %v5939_v24  ;;  %6448 = vmatmul.mubr.f32.gmra.mrb[106].mxu0 %v1559_v48  ;;  %v6907_v57 = vpack.c.bf16 %v1559_v48, %v1554_v37  ;;  %v9098_v1 = vpack.i.bf16 %v1559_v48, %v1554_v37 }
 0x2e6   :  { %10874 = vst [vmem:[#allocation5_spill] sm:$0xff] %v9098_v1  ;;  %v1564_v23 = vadd.f32 %v5941_v47, %v9049_v17  ;;  %v5942_v25 = vpop.f32.mrb[58].mxu1  ;;  %7147 = vrot.lane.b32.xlu0 %v7136_v62, %s7575_s26  ;;  %6936 = vmatprep.subr.bf16.mxu0 %v6907_v57  ;;  %v6005_v17 = vpop.f32.mrb[79].mxu0 }
 0x2e7   :  { %6908 = vmatpush3.bf16.xpose.msra.mxu1 %v6907_v57  ;;  %v5943_v51 = vpop.f32.mrb[59].mxu1  ;;  %6938 = vmatpush3.bf16.msra.mxu0 %v6907_v57  ;;  %v9108_v34 = vadd.f32 %v6005_v17, %v6004_v21  ;;  %v6007_v22 = vpop.f32.mrb[80].mxu0 }
 0x2e8   :  { %v5944_v0 = vadd.f32 %v5943_v51, %v5942_v25  ;;  %6450 = vmatprep.mubr.f32.mxu0 %v1564_v23  ;;  %6909 = vmatprep.subr.bf16.mxu1 %v7571_v5 }
 0x2ea   :  { %v1569_v50 = vadd.f32 %v5944_v0, %v9051_v4  ;;  %v5945_v16 = vpop.f32.mrb[60].mxu1  ;;  %7152 = vrot.lane.b32.xlu0 %v9098_v1, %s7574_s25  ;;  %v6008_v4 = vpop.f32.mrb[81].mxu0 }
 0x2eb   :  { %v5946_v33 = vpop.f32.mrb[61].mxu1  ;;  %v9115_v37 = vadd.f32 %v6008_v4, %v6007_v22  ;;  %v6010_v54 = vpop.f32.mrb[82].mxu0 }
 0x2ec   :  { %v5947_v35 = vadd.f32 %v5946_v33, %v5945_v16  ;;  %6451 = vmatmul.mubr.f32.gmra.mrb[108].mxu0 %v1569_v50  ;;  %v6910_v20 = vpack.c.bf16 %v1569_v50, %v1564_v23  ;;  %v9110_v46 = vpack.i.bf16 %v1569_v50, %v1564_v23  ;;  %v6011_v39 = vpop.f32.mrb[83].mxu0  ;;  %v10780_v23 = vmov 1  }
 0x2ed   :  { %v9121_v48 = vadd.f32 %v6011_v39, %v6010_v54  ;;  %v6013_v24 = vpop.f32.mrb[84].mxu0  ;;  %7181 = vset.pattern.permute.xlu0 %v10780_v23 }
 0x2ee   :  { %10875 = vst [vmem:[#allocation6_spill] sm:$0xff] %v9110_v46  ;;  %v1574_v62 = vadd.f32 %v5947_v35, %v9053_v45  ;;  %v5948_v2 = vpop.f32.mrb[62].mxu1  ;;  %7157 = vrot.lane.b32.xlu0 %v9098_v1, %s7573_s5  ;;  %6940 = vmatprep.subr.bf16.mxu0 %v6910_v20  ;;  %v6014_v57 = vpop.f32.mrb[85].mxu0 }
 0x2ef   :  { %6911 = vmatpush3.bf16.xpose.msra.mxu1 %v6910_v20  ;;  %v5949_v11 = vpop.f32.mrb[63].mxu1  ;;  %6942 = vmatpush3.bf16.msra.mxu0 %v6910_v20  ;;  %v9125_v6 = vadd.f32 %v6014_v57, %v6013_v24 }
 0x2f0   :  { %v5950_v28 = vadd.f32 %v5949_v11, %v5948_v2  ;;  %6453 = vmatprep.mubr.f32.mxu0 %v1574_v62  ;;  %6912 = vmatprep.subr.bf16.mxu1 %v7571_v5  ;;  %v6016_v5 = vpop.f32.mrb[86].mxu0 }
 0x2f1   :  { %v6017_v27 = vpop.f32.mrb[87].mxu0 }
 0x2f2   :  { %v1579_v30 = vadd.f32 %v5950_v28, %v9055_v63  ;;  %7162 = vrot.lane.b32.xlu0 %v9110_v46, %s7574_s25  ;;  %v6063_v45 = vpop.f32.mrb[64].mxu1  ;;  %v6018_v0 = vadd.f32 %v6017_v27, %v6016_v5  ;;  %v6019_v50 = vpop.f32.mrb[88].mxu0 }
 0x2f3   :  { %v6064_v40 = vpop.f32.mrb[65].mxu1  ;;  %v6020_v16 = vpop.f32.mrb[89].mxu0 }
 0x2f4   :  { %6454 = vmatmul.mubr.f32.gmra.mrb[110].mxu0 %v1579_v30  ;;  %v6913_v12 = vpack.c.bf16 %v1579_v30, %v1574_v62  ;;  %v9123_v49 = vpack.i.bf16 %v1579_v30, %v1574_v62  ;;  %v6065_v47 = vadd.f32 %v6064_v40, %v6063_v45  ;;  %v6021_v35 = vadd.f32 %v6020_v16, %v6019_v50 }
 0x2f6   :  { %10876 = vst [vmem:[#allocation7_spill] sm:$0xff] %v9123_v49  ;;  %7167 = vrot.lane.b32.xlu0 %v9110_v46, %s7573_s5  ;;  %6944 = vmatprep.subr.bf16.mxu0 %v6913_v12  ;;  %v9131_v63 = vadd.f32 %v6065_v47, %v9071_v42  ;;  %v6066_v25 = vpop.f32.mrb[66].mxu1  ;;  %v2738_v42 = vld [vmem:[%s10772_s6] sm:$0xf] }
 0x2f7   :  { %6914 = vmatpush3.bf16.xpose.msra.mxu1 %v6913_v12  ;;  %6946 = vmatpush3.bf16.msra.mxu0 %v6913_v12  ;;  %v6067_v51 = vpop.f32.mrb[67].mxu1 }
 0x2f8   :  { %v6068_v21 = vadd.f32 %v6067_v51, %v6066_v25 }
 0x2fa   :  { %7172 = vrot.lane.b32.xlu0 %v9123_v49, %s7574_s25  ;;  %v9136_v17 = vadd.f32 %v6068_v21, %v9076_v52  ;;  %v6069_v33 = vpop.f32.mrb[68].mxu1  ;;  %v6022_v52 = vpop.f32.mrb[90].mxu0 }
 0x2fb   :  { %v6070_v20 = vpop.f32.mrb[69].mxu1  ;;  %v6023_v28 = vpop.f32.mrb[91].mxu0 }
 0x2fc   :  { %v6071_v22 = vadd.f32 %v6070_v20, %v6069_v33  ;;  %v6024_v45 = vadd.f32 %v6023_v28, %v6022_v52  ;;  %v6025_v47 = vpop.f32.mrb[92].mxu0 }
 0x2fe   :  { %7177 = vrot.lane.b32.xlu0 %v9123_v49, %s7573_s5  ;;  %6489 = vmatmul.mubr.f32.vlgmr.msra.gmra.mrb[96].mxu1 %v2738_v42  ;;  %v9144_v62 = vadd.f32 %v6071_v22, %v9080_v31  ;;  %v6072_v2 = vpop.f32.mrb[70].mxu1  ;;  %v6026_v31 = vpop.f32.mrb[93].mxu0 }
 0x2ff   :  { %v6073_v4 = vpop.f32.mrb[71].mxu1  ;;  %v6027_v25 = vadd.f32 %v6026_v31, %v6025_v47  ;;  %v6028_v21 = vpop.f32.mrb[94].mxu0 }
 0x300   :  { %v6074_v11 = vadd.f32 %v6073_v4, %v6072_v2  ;;  %v6029_v50 = vpop.f32.mrb[95].mxu0 }
 0x301   :  { %v6030_v33 = vadd.f32 %v6029_v50, %v6028_v21 }
 0x302   :  { %v9147_v54 = vadd.f32 %v6074_v11, %v9085_v59  ;;  %v6075_v30 = vpop.f32.mrb[72].mxu1 }
 0x303   :  { %v6076_v39 = vpop.f32.mrb[73].mxu1 }
 0x304   :  { %v6077_v40 = vadd.f32 %v6076_v39, %v6075_v30 }
 0x306   :  { %v9150_v24 = vadd.f32 %v6077_v40, %v9090_v38  ;;  %v6078_v12 = vpop.f32.mrb[74].mxu1 }
 0x307   :  { %v6079_v57 = vpop.f32.mrb[75].mxu1 }
 0x308   :  { %v6080_v5 = vadd.f32 %v6079_v57, %v6078_v12 }
 0x30a   :  { %v9153_v27 = vadd.f32 %v6080_v5, %v9096_v60  ;;  %v6081_v51 = vpop.f32.mrb[76].mxu1 }
 0x30b   :  { %v6082_v59 = vpop.f32.mrb[77].mxu1 }
 0x30c   :  { %v6083_v16 = vadd.f32 %v6082_v59, %v6081_v51 }
 0x30e   :  { %v9156_v42 = vadd.f32 %v6083_v16, %v9102_v9  ;;  %v6084_v38 = vpop.f32.mrb[78].mxu1 }
 0x30f   :  { %v6085_v20 = vpop.f32.mrb[79].mxu1 }
 0x310   :  { %v6086_v22 = vadd.f32 %v6085_v20, %v6084_v38 }
 0x312   :  { %v9159_v2 = vadd.f32 %v6086_v22, %v9108_v34  ;;  %v6087_v4 = vpop.f32.mrb[80].mxu1 }
 0x313   :  { %v6088_v11 = vpop.f32.mrb[81].mxu1 }
 0x314   :  { %v6089_v52 = vadd.f32 %v6088_v11, %v6087_v4 }
 0x316   :  { %v9162_v60 = vadd.f32 %v6089_v52, %v9115_v37  ;;  %v6090_v28 = vpop.f32.mrb[82].mxu1 }
 0x317   :  { %v6091_v30 = vpop.f32.mrb[83].mxu1 }
 0x318   :  { %v6092_v39 = vadd.f32 %v6091_v30, %v6090_v28 }
 0x31a   :  { %v9165_v40 = vadd.f32 %v6092_v39, %v9121_v48  ;;  %v6093_v9 = vpop.f32.mrb[84].mxu1 }
 0x31b   :  { %v6094_v12 = vpop.f32.mrb[85].mxu1 }
 0x31c   :  { %v6095_v47 = vadd.f32 %v6094_v12, %v6093_v9 }
 0x31e   :  { %v9168_v57 = vadd.f32 %v6095_v47, %v9125_v6  ;;  %v6096_v34 = vpop.f32.mrb[86].mxu1 }
 0x31f   :  { %v6097_v31 = vpop.f32.mrb[87].mxu1 }
 0x320   :  { %v6098_v5 = vadd.f32 %v6097_v31, %v6096_v34 }
 0x322   :  { %v9170_v51 = vadd.f32 %v6098_v5, %v6018_v0  ;;  %v6099_v21 = vpop.f32.mrb[88].mxu1 }
 0x323   :  { %v6100_v37 = vpop.f32.mrb[89].mxu1 }
 0x324   :  { %v6101_v59 = vadd.f32 %v6100_v37, %v6099_v21 }
 0x326   :  { %v9172_v50 = vadd.f32 %v6101_v59, %v6021_v35  ;;  %v6102_v16 = vpop.f32.mrb[90].mxu1 }
 0x327   :  { %v6103_v38 = vpop.f32.mrb[91].mxu1 }
 0x328   :  { %v6104_v48 = vadd.f32 %v6103_v38, %v6102_v16 }
 0x32a   :  { %v9174_v20 = vadd.f32 %v6104_v48, %v6024_v45  ;;  %v6105_v22 = vpop.f32.mrb[92].mxu1 }
 0x32b   :  { %v6106_v4 = vpop.f32.mrb[93].mxu1 }
 0x32c   :  { %v6107_v11 = vadd.f32 %v6106_v4, %v6105_v22 }
 0x32e   :  { %v9176_v6 = vadd.f32 %v6107_v11, %v6027_v25  ;;  %v6108_v52 = vpop.f32.mrb[94].mxu1 }
 0x32f   :  { %v6109_v28 = vpop.f32.mrb[95].mxu1 }
 0x330   :  { %v7083_v30 = vpop.permute.xlu1 %7082  ;;  %v7078_v0 = vpop.permute.xlu0 %7077  ;;  %v6110_v39 = vadd.f32 %v6109_v28, %v6108_v52 }
 0x331   :  { %v7085_v9 = vunpack.i.h.bf16 %v7083_v30  ;;  %v7084_v12 = vunpack.i.l.bf16 %v7083_v30  ;;  %v7080_v47 = vunpack.i.h.bf16 %v7078_v0  ;;  %v7079_v35 = vunpack.i.l.bf16 %v7078_v0 }
 0x332   :  { %v9178_v34 = vadd.f32 %v6110_v39, %v6030_v33 }
 0x333   :  { %v6947_v31 = vpack.c.bf16 %v7080_v47, %v7079_v35  ;;  %v9180_v5 = vpack.c.bf16 %v7085_v9, %v7084_v12 }
 0x334   :  { %v7088_v45 = vpop.permute.xlu1 %7087 }
 0x335   :  { %10877 = vst [vmem:[#allocation8_spill] sm:$0xff] %v9180_v5  ;;  %6948 = vmatprep.subr.bf16.mxu1 %v6947_v31  ;;  %6980 = vmatprep.subr.bf16.mxu0 %v9180_v5 }
 0x336   :  { %6950 = vmatpush3.bf16.msra.mxu1 %v6947_v31 }
 0x338   :  { %v7093_v25 = vpop.permute.xlu1 %7092 }
 0x339   :  { %v7095_v21 = vunpack.i.h.bf16 %v7093_v25  ;;  %v7094_v37 = vunpack.i.l.bf16 %v7093_v25 }
 0x33b   :  { %v6951_v59 = vpack.c.bf16 %v7095_v21, %v7094_v37 }
 0x33c   :  { %v9183_v16 = vpop.permute.xlu1 %7097 }
 0x33d   :  { %10878 = vst [vmem:[#allocation9_spill] sm:$0xff] %v9183_v16  ;;  %6952 = vmatprep.subr.bf16.mxu1 %v6951_v59 }
 0x33e   :  { %6954 = vmatpush3.bf16.msra.mxu1 %v6951_v59 }
 0x340   :  { %v9185_v38 = vpop.permute.xlu1 %7102  ;;  %v7108_v33 = vpop.permute.xlu0 %7107 }
 0x341   :  { %10879 = vst [vmem:[#allocation10_spill] sm:$0xff] %v9185_v38  ;;  %v7110_v48 = vunpack.i.h.bf16 %v7108_v33  ;;  %v7109_v22 = vunpack.i.l.bf16 %v7108_v33 }
 0x343   :  { %v6955_v4 = vpack.c.bf16 %v7110_v48, %v7109_v22 }
 0x344   :  { %v9187_v11 = vpop.permute.xlu1 %7112 }
 0x345   :  { %10880 = vst [vmem:[#allocation11_spill] sm:$0xff] %v9187_v11  ;;  %6956 = vmatprep.subr.bf16.mxu1 %v6955_v4 }
 0x346   :  { %6958 = vmatpush3.bf16.msra.mxu1 %v6955_v4 }
 0x348   :  { %v9189_v52 = vpop.permute.xlu1 %7117 }
 0x349   :  { %10881 = vst [vmem:[#allocation12_spill] sm:$0xff] %v9189_v52 }
 0x34c   :  { %v7123_v28 = vpop.permute.xlu1 %7122 }
 0x34d   :  { %v7125_v30 = vunpack.i.h.bf16 %v7123_v28  ;;  %v7124_v0 = vunpack.i.l.bf16 %v7123_v28 }
 0x34f   :  { %v6959_v39 = vpack.c.bf16 %v7125_v30, %v7124_v0 }
 0x350   :  { %v7138_v9 = vpop.permute.xlu0 %7137 }
 0x351   :  { %v7140_v12 = vunpack.i.h.bf16 %v7138_v9  ;;  %v7139_v47 = vunpack.i.l.bf16 %v7138_v9  ;;  %6960 = vmatprep.subr.bf16.mxu1 %v6959_v39  ;;  %v7090_v9 = vunpack.i.h.bf16 %v7088_v45 }
 0x352   :  { %6962 = vmatpush3.bf16.msra.mxu1 %v6959_v39 }
 0x353   :  { %v6963_v35 = vpack.c.bf16 %v7140_v12, %v7139_v47  ;;  %v7089_v12 = vunpack.i.l.bf16 %v7088_v45 }
 0x354   :  { %v9191_v31 = vpop.permute.xlu0 %7142 }
 0x355   :  { %10882 = vst [vmem:[#allocation13_spill] sm:$0xff] %v9191_v31  ;;  %6964 = vmatprep.subr.bf16.mxu1 %v6963_v35 }
 0x356   :  { %6966 = vmatpush3.bf16.msra.mxu1 %v6963_v35 }
 0x358   :  { %v9193_v25 = vpop.permute.xlu0 %7147 }
 0x359   :  { %10883 = vst [vmem:[#allocation14_spill] sm:$0xff] %v9193_v25 }
 0x35c   :  { %v7153_v21 = vpop.permute.xlu0 %7152 }
 0x35d   :  { %v7155_v37 = vunpack.i.h.bf16 %v7153_v21  ;;  %v7154_v59 = vunpack.i.l.bf16 %v7153_v21  ;;  %v9199_v21 = vpack.c.bf16 %v7090_v9, %v7089_v12 }
 0x35f   :  { %v6967_v33 = vpack.c.bf16 %v7155_v37, %v7154_v59  ;;  %10886 = vst [vmem:[#allocation17_spill] sm:$0xff] %v9199_v21 }
 0x360   :  { %v9195_v48 = vpop.permute.xlu0 %7157 }
 0x361   :  { %10884 = vst [vmem:[#allocation15_spill] sm:$0xff] %v9195_v48  ;;  %6968 = vmatprep.subr.bf16.mxu1 %v6967_v33 }
 0x362   :  { %6970 = vmatpush3.bf16.msra.mxu1 %v6967_v33  ;;  %v10887_v33 = vmov 0  }
 0x364   :  { %v7163_v22 = vpop.permute.xlu0 %7162 }
 0x365   :  { %v7165_v4 = vunpack.i.h.bf16 %v7163_v22  ;;  %v7164_v28 = vunpack.i.l.bf16 %v7163_v22  ;;  %v10783_v22 = vmov 2  }
 0x367   :  { %v6971_v30 = vpack.c.bf16 %v7165_v4, %v7164_v28  ;;  %v10785_v28 = vmov 3  }
 0x368   :  { %v9197_v0 = vpop.permute.xlu0 %7167 }
 0x369   :  { %10885 = vst [vmem:[#allocation16_spill] sm:$0xff] %v9197_v0  ;;  %6972 = vmatprep.subr.bf16.mxu1 %v6971_v30 }
 0x36a   :  { %6974 = vmatpush3.bf16.msra.mxu1 %v6971_v30 }
 0x36c   :  { %v7173_v39 = vpop.permute.xlu0 %7172 }
 0x36d   :  { %v7175_v47 = vunpack.i.h.bf16 %v7173_v39  ;;  %v7174_v35 = vunpack.i.l.bf16 %v7173_v39 }
 0x36f   :  { %v6975_v23 = vpack.c.bf16 %v7175_v47, %v7174_v35 }
 0x371   :  { %6976 = vmatprep.subr.bf16.mxu1 %v6975_v23 }
 0x372   :  { %6978 = vmatpush3.bf16.msra.mxu1 %v6975_v23  ;;  %v10888_v23 = vmov 1  }
 0x373   :  { %7043 = vmatprep.subr.bf16.mxu1 %v9199_v21 }
 0x38f   :  { %v6434_v37 = vpop.f32.mrb[96].mxu0 }
 0x390   :  { %3299 = vperm.xlu0 %7181, %v6434_v37   ;;  %2816 = vperm.xlu1 %7075, %v6434_v37   ;;  %v2659_v59 = vpop.f32.mrb[97].mxu0 }
 0x394   :  { %7184 = vset.pattern.permute.xlu0 %v10887_v33  ;;  %7182 = vset.pattern.permute.xlu1 %v10783_v22 }
 0x395   :  { %3816 = vperm.xlu1 %7182, %v6434_v37   ;;  %2811 = vperm.xlu0 %7184, %v2659_v59  }
 0x397   :  { %v6437_v45 = vpop.f32.mrb[98].mxu0 }
 0x398   :  { %v2669_v4 = vpop.f32.mrb[99].mxu0 }
 0x399   :  { %7183 = vset.pattern.permute.xlu1 %v10785_v28  ;;  %7187 = vset.pattern.permute.xlu0 %v10785_v28 }
 0x39a   :  { %4317 = vperm.xlu1 %7183, %v6434_v37   ;;  %4313 = vperm.xlu0 %7187, %v2659_v59  }
 0x39e   :  { %7185 = vset.pattern.permute.xlu1 %v10888_v23  ;;  %7192 = vset.pattern.permute.xlu0 %v10887_v33 }
 0x39f   :  { %3295 = vperm.xlu1 %7185, %v2659_v59   ;;  %2821 = vperm.xlu0 %7192, %v2669_v4   ;;  %v6440_v30 = vpop.f32.mrb[100].mxu0 }
 0x3a0   :  { %v9208_v39 = vpop.f32.mrb[101].mxu0 }
 0x3a3   :  { %7186 = vset.pattern.permute.xlu1 %v10783_v22  ;;  %2831 = vperm.xlu0 %7192, %v9208_v39  }
 0x3a4   :  { %3812 = vperm.xlu1 %7186, %v2659_v59  }
 0x3a7   :  { %v9212_v9 = vpop.f32.mrb[102].mxu0 }
 0x3a8   :  { %7188 = vset.pattern.permute.xlu1 %v10887_v33  ;;  %v9215_v12 = vpop.f32.mrb[103].mxu0 }
 0x3a9   :  { %2826 = vperm.xlu1 %7188, %v6437_v45   ;;  %2841 = vperm.xlu0 %7192, %v9215_v12  }
 0x3ad   :  { %7189 = vset.pattern.permute.xlu1 %v10888_v23 }
 0x3ae   :  { %3307 = vperm.xlu1 %7189, %v6437_v45  }
 0x3af   :  { %v9219_v47 = vpop.f32.mrb[104].mxu0 }
 0x3b0   :  { %v9221_v35 = vpop.f32.mrb[105].mxu0 }
 0x3b1   :  { %2851 = vperm.xlu0 %7192, %v9221_v35  }
 0x3b2   :  { %7190 = vset.pattern.permute.xlu1 %v10783_v22 }
 0x3b3   :  { %3824 = vperm.xlu1 %7190, %v6437_v45  }
 0x3b5   :  { %7215 = vset.pattern.permute.xlu0 %v10783_v22 }
 0x3b6   :  { %3844 = vperm.xlu0 %7215, %v9221_v35  }
 0x3b7   :  { %7191 = vset.pattern.permute.xlu1 %v10785_v28  ;;  %v9228_v37 = vpop.f32.mrb[106].mxu0  ;;  %v10889_v28 = vmov 2  }
 0x3b8   :  { %4325 = vperm.xlu1 %7191, %v6437_v45   ;;  %v9230_v59 = vpop.f32.mrb[107].mxu0  ;;  %v10890_v45 = vmov 3  }
 0x3ba   :  { %7221 = vset.pattern.permute.xlu0 %v10887_v33 }
 0x3bb   :  { %2861 = vperm.xlu0 %7221, %v9230_v59  }
 0x3bc   :  { %7193 = vset.pattern.permute.xlu1 %v10888_v23 }
 0x3bd   :  { %3303 = vperm.xlu1 %7193, %v2669_v4  }
 0x3bf   :  { %7222 = vset.pattern.permute.xlu0 %v10888_v23  ;;  %v9236_v0 = vpop.f32.mrb[108].mxu0 }
 0x3c0   :  { %3335 = vperm.xlu0 %7222, %v9230_v59   ;;  %v9239_v22 = vpop.f32.mrb[109].mxu0 }
 0x3c1   :  { %7194 = vset.pattern.permute.xlu1 %v10889_v28 }
 0x3c2   :  { %3820 = vperm.xlu1 %7194, %v2669_v4  }
 0x3c4   :  { %7228 = vset.pattern.permute.xlu0 %v10890_v45 }
 0x3c5   :  { %4365 = vperm.xlu0 %7228, %v9236_v0  }
 0x3c6   :  { %7195 = vset.pattern.permute.xlu1 %v10890_v45 }
 0x3c7   :  { %4321 = vperm.xlu1 %7195, %v2669_v4   ;;  %v9245_v48 = vpop.f32.mrb[110].mxu0 }
 0x3c8   :  { %v2729_v25 = vpop.f32.mrb[111].mxu0 }
 0x3c9   :  { %7229 = vset.pattern.permute.xlu0 %v10887_v33 }
 0x3ca   :  { %2871 = vperm.xlu0 %7229, %v9239_v22  }
 0x3cb   :  { %7196 = vset.pattern.permute.xlu1 %v10887_v33 }
 0x3cc   :  { %2836 = vperm.xlu1 %7196, %v6440_v30  }
 0x3ce   :  { %7230 = vset.pattern.permute.xlu0 %v10888_v23 }
 0x3cf   :  { %3343 = vperm.xlu0 %7230, %v9239_v22  }
 0x3d0   :  { %7197 = vset.pattern.permute.xlu1 %v10888_v23 }
 0x3d1   :  { %3315 = vperm.xlu1 %7197, %v6440_v30   ;;  %v9253_v31 = vpop.f32.mrb[96].mxu1 }
 0x3d2   :  { %v6490_v4 = vpop.f32.mrb[97].mxu1  ;;  %v9324_v61 = vrot.slane %v9253_v31, %v8246_v44 }
 0x3d3   :  { %7234 = vset.pattern.permute.xlu0 %v10889_v28 }
 0x3d4   :  { %3872 = vperm.xlu0 %7234, %v9245_v48  }
 0x3d5   :  { %7198 = vset.pattern.permute.xlu1 %v10889_v28 }
 0x3d6   :  { %3832 = vperm.xlu1 %7198, %v6440_v30  }
 0x3d8   :  { %7235 = vset.pattern.permute.xlu0 %v10890_v45 }
 0x3d9   :  { %4373 = vperm.xlu0 %7235, %v9245_v48  }
 0x3da   :  { %7199 = vset.pattern.permute.xlu1 %v10890_v45 }
 0x3db   :  { %4333 = vperm.xlu1 %7199, %v6440_v30  }
 0x3dd   :  { %7236 = vset.pattern.permute.xlu0 %v10887_v33 }
 0x3de   :  { %2881 = vperm.xlu0 %7236, %v2729_v25  }
 0x3df   :  { %7200 = vset.pattern.permute.xlu1 %v10888_v23 }
 0x3e0   :  { %3311 = vperm.xlu1 %7200, %v9208_v39  }
 0x3e2   :  { %7237 = vset.pattern.permute.xlu0 %v10888_v23 }
 0x3e3   :  { %3351 = vperm.xlu0 %7237, %v2729_v25  }
 0x3e4   :  { %7201 = vset.pattern.permute.xlu1 %v10889_v28 }
 0x3e5   :  { %3828 = vperm.xlu1 %7201, %v9208_v39  }
 0x3e7   :  { %7238 = vset.pattern.permute.xlu0 %v10889_v28 }
 0x3e8   :  { %3868 = vperm.xlu0 %7238, %v2729_v25  }
 0x3e9   :  { %7202 = vset.pattern.permute.xlu1 %v10890_v45 }
 0x3ea   :  { %4329 = vperm.xlu1 %7202, %v9208_v39   ;;  %v9287_v39 = vpop.permute.xlu0 %7177 }
 0x3eb   :  { %10893 = vst [vmem:[#allocation20_spill] sm:$0xff] %v9287_v39  ;;  %v9305_v39 = vrot.slane %v9253_v31, %v8606_v10 }
 0x3ec   :  { %7239 = vset.pattern.permute.xlu0 %v10890_v45 }
 0x3ed   :  { %4369 = vperm.xlu0 %7239, %v2729_v25   ;;  %v9281_v25 = vpop.permute.xlu1 %7127 }
 0x3ee   :  { %7203 = vset.pattern.permute.xlu1 %v10887_v33  ;;  %10891 = vst [vmem:[#allocation18_spill] sm:$0xff] %v9281_v25 }
 0x3ef   :  { %2846 = vperm.xlu1 %7203, %v9212_v9  }
 0x3f1   :  { %v9285_v30 = vpop.permute.xlu1 %7132 }
 0x3f2   :  { %10892 = vst [vmem:[#allocation19_spill] sm:$0xff] %v9285_v30  ;;  %v9301_v30 = vrot.slane %v9253_v31, %v8320_v55  ;;  %v2545_v55 = vmax.f32 %v9131_v63, 1.0 }
 0x3f3   :  { %7204 = vset.pattern.permute.xlu1 %v10888_v23 }
 0x3f4   :  { %3323 = vperm.xlu1 %7204, %v9212_v9  }
 0x3f8   :  { %7205 = vset.pattern.permute.xlu1 %v10889_v28 }
 0x3f9   :  { %3840 = vperm.xlu1 %7205, %v9212_v9  }
 0x3fd   :  { %7206 = vset.pattern.permute.xlu1 %v10890_v45 }
 0x3fe   :  { %4341 = vperm.xlu1 %7206, %v9212_v9  }
 0x402   :  { %7207 = vset.pattern.permute.xlu1 %v10888_v23 }
 0x403   :  { %3319 = vperm.xlu1 %7207, %v9215_v12  }
 0x407   :  { %7208 = vset.pattern.permute.xlu1 %v10889_v28 }
 0x408   :  { %3836 = vperm.xlu1 %7208, %v9215_v12  }
 0x40c   :  { %7209 = vset.pattern.permute.xlu1 %v10890_v45 }
 0x40d   :  { %4337 = vperm.xlu1 %7209, %v9215_v12   ;;  %v2546_v12 = vmax.f32 %v9136_v17, 1.0 }
 0x40f   :  { %v9291_v4 = vpop.permute.xlu1 %2816  ;;  %v9293_v9 = vpop.permute.xlu0 %3299  ;;  %v9316_v46 = vsel %vm2530_vm5, %v2546_v12, %v9136_v17  ;;  %v9328_v12 = vsel %vm2529_vm6, %v2545_v55, %v9131_v63 }
 0x410   :  { %vm2958_vm9 = vcmp.gt.f32.partialorder %v9316_v46, 0.0  ;;  %vm2957_vm11 = vcmp.gt.f32.partialorder %v9328_v12, 0.0 }
 0x411   :  { %7210 = vset.pattern.permute.xlu1 %v10887_v33 }
 0x412   :  { %2856 = vperm.xlu1 %7210, %v9219_v47  }
 0x414   :  { %v9297_v21 = vpop.permute.xlu1 %3816  ;;  %v2812_v25 = vpop.permute.xlu0 %2811 }
 0x415   :  { %v2893_v49 = vadd.f32 %v9301_v30, %v2812_v25 }
 0x416   :  { %7211 = vset.pattern.permute.xlu1 %v10888_v23 }
 0x417   :  { %3331 = vperm.xlu1 %7211, %v9219_v47   ;;  %v2925_v10 = vmul.f32 0.2, %v2893_v49  ;;  %vm2909_vm8 = vcmp.ge.f32.partialorder %v2893_v49, 0.0 }
 0x419   :  { %v4318_v52 = vpop.permute.xlu1 %4317  ;;  %v2941_v44 = vsel %vm2909_vm8, %v2893_v49, %v2925_v10  ;;  %v2548_v49 = vmax.f32 %v9147_v54, 1.0  ;;  %vm2534_vm8 = vcmp.eq.s32.totalorder %v8430_v26, %v7846_v15 }
 0x41a   :  { %v4381_v5 = vadd.f32 %v9305_v39, %v4318_v52  ;;  %v4314_v52 = vpop.permute.xlu0 %4313 }
 0x41b   :  { %7212 = vset.pattern.permute.xlu1 %v10889_v28  ;;  %v4380_v16 = vadd.f32 %v9305_v39, %v4314_v52 }
 0x41c   :  { %v4413_v11 = vmul.f32 0.2, %v4381_v5  ;;  %3848 = vperm.xlu1 %7212, %v9219_v47   ;;  %vm4397_vm7 = vcmp.ge.f32.partialorder %v4381_v5, 0.0 }
 0x41d   :  { %vm4396_vm12 = vcmp.ge.f32.partialorder %v4380_v16, 0.0 }
 0x41e   :  { %v3296_v25 = vpop.permute.xlu1 %3295  ;;  %v4429_v17 = vsel %vm4397_vm7, %v4381_v5, %v4413_v11  ;;  %v9344_v5 = vsel %vm2957_vm11, %v2941_v44, -1e+30  ;;  %v4412_v11 = vmul.f32 0.2, %v4380_v16 }
 0x41f   :  { %v3362_v41 = vadd.f32 %v9324_v61, %v3296_v25  ;;  %v9333_v38 = vsel %vm2958_vm9, %v4429_v17, -1e+30  ;;  %v9359_v25 = vsel %vm2532_vm13, %v2548_v49, %v9147_v54  ;;  %v2822_v49 = vpop.permute.xlu0 %2821  ;;  %vm2533_vm13 = vcmp.eq.s32.totalorder %v8405_v19, %v7846_v15 }
 0x420   :  { %10894 = vst [vmem:[#allocation21_spill] sm:$0xff] %v9333_v38  ;;  %7213 = vset.pattern.permute.xlu1 %v10890_v45  ;;  %4462 = vmax.xlane.f32.xlu0 %v9333_v38  ;;  %v4428_v52 = vsel %vm4396_vm12, %v4380_v16, %v4412_v11  ;;  %10895 = vst [vmem:[#allocation22_spill] sm:$0xff] %v9359_v25  ;;  %vm2960_vm15 = vcmp.gt.f32.partialorder %v9359_v25, 0.0 }
 0x421   :  { %v3394_v1 = vmul.f32 0.2, %v3362_v41  ;;  %4349 = vperm.xlu1 %7213, %v9219_v47   ;;  %vm3378_vm10 = vcmp.ge.f32.partialorder %v3362_v41, 0.0  ;;  %v9365_v14 = vsel %vm2957_vm11, %v4428_v52, -1e+30  ;;  %v2895_v52 = vadd.f32 %v9301_v30, %v2822_v49 }
 0x422   :  { %10896 = vst [vmem:[#allocation23_spill] sm:$0xff] %v9365_v14 }
 0x423   :  { %v9340_v63 = vpop.permute.xlu1 %3812  ;;  %v3410_v55 = vsel %vm3378_vm10, %v3362_v41, %v3394_v1  ;;  %vm2911_vm4 = vcmp.ge.f32.partialorder %v2895_v52, 0.0 }
 0x424   :  { %2989 = vmax.xlane.f32.xlu0 %v9344_v5  ;;  %v9354_v47 = vsel %vm2957_vm11, %v3410_v55, -1e+30 }
 0x425   :  { %7214 = vset.pattern.permute.xlu1 %v10888_v23 }
 0x426   :  { %3327 = vperm.xlu1 %7214, %v9221_v35  }
 0x428   :  { %v2827_v10 = vpop.permute.xlu1 %2826  ;;  %3442 = vmax.xlane.f32.xlu0 %v9354_v47 }
 0x429   :  { %v2896_v1 = vadd.f32 %v9301_v30, %v2827_v10 }
 0x42a   :  { %7216 = vset.pattern.permute.xlu1 %v10890_v45 }
 0x42b   :  { %v2928_v17 = vmul.f32 0.2, %v2896_v1  ;;  %4345 = vperm.xlu1 %7216, %v9221_v35   ;;  %vm2912_vm14 = vcmp.ge.f32.partialorder %v2896_v1, 0.0 }
 0x42c   :  { %4460 = vmax.xlane.f32.xlu0 %v9365_v14 }
 0x42d   :  { %v3308_v41 = vpop.permute.xlu1 %3307  ;;  %v2944_v44 = vsel %vm2912_vm14, %v2896_v1, %v2928_v17 }
 0x42e   :  { %v3365_v16 = vadd.f32 %v9324_v61, %v3308_v41  ;;  %v9372_v54 = vsel %vm2960_vm15, %v2944_v44, -1e+30  ;;  %v2547_v41 = vmax.f32 %v9144_v62, 1.0  ;;  %v2927_v44 = vmul.f32 0.2, %v2895_v52 }
 0x42f   :  { %7217 = vset.pattern.permute.xlu1 %v10887_v33 }
 0x430   :  { %v3397_v35 = vmul.f32 0.2, %v3365_v16  ;;  %2866 = vperm.xlu1 %7217, %v9228_v37   ;;  %2995 = vmax.xlane.f32.xlu0 %v9372_v54  ;;  %vm3381_vm1 = vcmp.ge.f32.partialorder %v3365_v16, 0.0  ;;  %v9394_v49 = vsel %vm2531_vm2, %v2547_v41, %v9144_v62  ;;  %v2943_v7 = vsel %vm2911_vm4, %v2895_v52, %v2927_v44 }
 0x431   :  { %10897 = vst [vmem:[#allocation24_spill] sm:$0xff] %v9394_v49  ;;  %vm2959_vm6 = vcmp.gt.f32.partialorder %v9394_v49, 0.0  ;;  %vm2536_vm2 = vcmp.eq.s32.totalorder %v8476_v36, %v7846_v15 }
 0x432   :  { %v9377_v11 = vpop.permute.xlu1 %3824  ;;  %v3413_v55 = vsel %vm3381_vm1, %v3365_v16, %v3397_v35  ;;  %v9409_v62 = vsel %vm2959_vm6, %v2943_v7, -1e+30 }
 0x433   :  { %v9381_v10 = vsel %vm2960_vm15, %v3413_v55, -1e+30  ;;  %10899 = vst [vmem:[#allocation26_spill] sm:$0xff] %v9409_v62 }
 0x434   :  { %7218 = vset.pattern.permute.xlu1 %v10888_v23  ;;  %3448 = vmax.xlane.f32.xlu0 %v9381_v10 }
 0x435   :  { %3339 = vperm.xlu1 %7218, %v9228_v37  }
 0x437   :  { %v4326_v1 = vpop.permute.xlu1 %4325 }
 0x438   :  { %v4383_v17 = vadd.f32 %v9305_v39, %v4326_v1 }
 0x439   :  { %7219 = vset.pattern.permute.xlu1 %v10889_v28 }
 0x43a   :  { %v4415_v16 = vmul.f32 0.2, %v4383_v17  ;;  %3856 = vperm.xlu1 %7219, %v9228_v37   ;;  %vm4399_vm3 = vcmp.ge.f32.partialorder %v4383_v17, 0.0 }
 0x43c   :  { %v3304_v35 = vpop.permute.xlu1 %3303  ;;  %v4431_v55 = vsel %vm4399_vm3, %v4383_v17, %v4415_v16  ;;  %v2550_v16 = vmax.f32 %v9153_v27, 1.0 }
 0x43d   :  { %v3364_v1 = vadd.f32 %v9324_v61, %v3304_v35  ;;  %v9399_v38 = vsel %vm2960_vm15, %v4431_v55, -1e+30 }
 0x43e   :  { %10898 = vst [vmem:[#allocation25_spill] sm:$0xff] %v9399_v38  ;;  %7220 = vset.pattern.permute.xlu1 %v10890_v45  ;;  %4466 = vmax.xlane.f32.xlu0 %v9399_v38 }
 0x43f   :  { %v3396_v14 = vmul.f32 0.2, %v3364_v1  ;;  %4357 = vperm.xlu1 %7220, %v9228_v37   ;;  %vm3380_vm5 = vcmp.ge.f32.partialorder %v3364_v1, 0.0 }
 0x441   :  { %v9405_v17 = vpop.permute.xlu1 %3820  ;;  %v3412_v41 = vsel %vm3380_vm5, %v3364_v1, %v3396_v14  ;;  %vm2535_vm5 = vcmp.eq.s32.totalorder %v8455_v32, %v7846_v15  ;;  %v3363_v32 = vadd.f32 %v9324_v61, %v9293_v9 }
 0x442   :  { %2993 = vmax.xlane.f32.xlu0 %v9409_v62  ;;  %v9416_v52 = vsel %vm2959_vm6, %v3412_v41, -1e+30  ;;  %v9431_v41 = vsel %vm2534_vm8, %v2550_v16, %v9153_v27 }
 0x443   :  { %7223 = vset.pattern.permute.xlu1 %v10889_v28  ;;  %10900 = vst [vmem:[#allocation27_spill] sm:$0xff] %v9416_v52  ;;  %vm2962_vm12 = vcmp.gt.f32.partialorder %v9431_v41, 0.0 }
 0x444   :  { %3852 = vperm.xlu1 %7223, %v9230_v59  }
 0x446   :  { %v4322_v37 = vpop.permute.xlu1 %4321  ;;  %3446 = vmax.xlane.f32.xlu0 %v9416_v52 }
 0x447   :  { %v4382_v44 = vadd.f32 %v9305_v39, %v4322_v37 }
 0x448   :  { %7224 = vset.pattern.permute.xlu1 %v10890_v45 }
 0x449   :  { %v4414_v35 = vmul.f32 0.2, %v4382_v44  ;;  %4353 = vperm.xlu1 %7224, %v9230_v59   ;;  %vm4398_vm7 = vcmp.ge.f32.partialorder %v4382_v44, 0.0 }
 0x44b   :  { %v2837_v14 = vpop.permute.xlu1 %2836  ;;  %v4430_v55 = vsel %vm4398_vm7, %v4382_v44, %v4414_v35  ;;  %v2549_v35 = vmax.f32 %v9150_v24, 1.0 }
 0x44c   :  { %v2898_v1 = vadd.f32 %v9301_v30, %v2837_v14  ;;  %v9428_v7 = vsel %vm2959_vm6, %v4430_v55, -1e+30 }
 0x44d   :  { %10901 = vst [vmem:[#allocation28_spill] sm:$0xff] %v9428_v7  ;;  %7225 = vset.pattern.permute.xlu1 %v10887_v33  ;;  %4464 = vmax.xlane.f32.xlu0 %v9428_v7 }
 0x44e   :  { %v2930_v59 = vmul.f32 0.2, %v2898_v1  ;;  %2876 = vperm.xlu1 %7225, %v9236_v0   ;;  %vm2914_vm10 = vcmp.ge.f32.partialorder %v2898_v1, 0.0 }
 0x450   :  { %v9436_v26 = vpop.permute.xlu1 %3315  ;;  %v2946_v37 = vsel %vm2914_vm10, %v2898_v1, %v2930_v59  ;;  %v9459_v1 = vsel %vm2533_vm13, %v2549_v35, %v9150_v24  ;;  %vm3379_vm13 = vcmp.ge.f32.partialorder %v3363_v32, 0.0 }
 0x451   :  { %v9441_v44 = vsel %vm2962_vm12, %v2946_v37, -1e+30  ;;  %vm2961_vm1 = vcmp.gt.f32.partialorder %v9459_v1, 0.0 }
 0x452   :  { %10902 = vst [vmem:[#allocation29_spill] sm:$0xff] %v9441_v44  ;;  %7226 = vset.pattern.permute.xlu1 %v10888_v23  ;;  %2999 = vmax.xlane.f32.xlu0 %v9441_v44 }
 0x453   :  { %3347 = vperm.xlu1 %7226, %v9236_v0  }
 0x455   :  { %v9446_v27 = vpop.permute.xlu1 %3832 }
 0x457   :  { %7227 = vset.pattern.permute.xlu1 %v10889_v28 }
 0x458   :  { %3864 = vperm.xlu1 %7227, %v9236_v0  }
 0x45a   :  { %v9450_v16 = vpop.permute.xlu1 %4333 }
 0x45c   :  { %3860 = vperm.xlu1 %7227, %v9239_v22  }
 0x45f   :  { %v3312_v14 = vpop.permute.xlu1 %3311 }
 0x460   :  { %v3366_v55 = vadd.f32 %v9324_v61, %v3312_v14  ;;  %7231 = vset.pattern.permute.xlu1 %v10890_v45 }
 0x461   :  { %4361 = vperm.xlu1 %7231, %v9239_v22   ;;  %v2552_v22 = vmax.f32 %v9159_v2, 1.0 }
 0x462   :  { %v3398_v0 = vmul.f32 0.2, %v3366_v55  ;;  %vm3382_vm14 = vcmp.ge.f32.partialorder %v3366_v55, 0.0 }
 0x463   :  { %v9481_v37 = vsel %vm2536_vm2, %v2552_v22, %v9159_v2  ;;  %v2551_v2 = vmax.f32 %v9156_v42, 1.0  ;;  %v2894_v22 = vadd.f32 %v9301_v30, %v9291_v4 }
 0x464   :  { %v9462_v28 = vpop.permute.xlu1 %3828  ;;  %v3414_v59 = vsel %vm3382_vm14, %v3366_v55, %v3398_v0  ;;  %10904 = vst [vmem:[#allocation31_spill] sm:$0xff] %v9481_v37  ;;  %vm2964_vm4 = vcmp.gt.f32.partialorder %v9481_v37, 0.0  ;;  %vm2538_vm14 = vcmp.eq.s32.totalorder %v8518_v53, %v7846_v15 }
 0x465   :  { %7232 = vset.pattern.permute.xlu1 %v10887_v33  ;;  %v9468_v19 = vsel %vm2961_vm1, %v3414_v59, -1e+30  ;;  %v9499_v59 = vsel %vm2535_vm5, %v2551_v2, %v9156_v42  ;;  %vm2910_vm10 = vcmp.ge.f32.partialorder %v2894_v22, 0.0  ;;  %v3395_v2 = vmul.f32 0.2, %v3363_v32 }
 0x466   :  { %10903 = vst [vmem:[#allocation30_spill] sm:$0xff] %v9468_v19  ;;  %2886 = vperm.xlu1 %7232, %v9245_v48   ;;  %3450 = vmax.xlane.f32.xlu0 %v9468_v19  ;;  %vm2963_vm8 = vcmp.gt.f32.partialorder %v9499_v59, 0.0 }
 0x467   :  { %v3411_v7 = vsel %vm3379_vm13, %v3363_v32, %v3395_v2 }
 0x469   :  { %v9472_v24 = vpop.permute.xlu1 %4329 }
 0x46a   :  { %7233 = vset.pattern.permute.xlu1 %v10888_v23 }
 0x46b   :  { %3355 = vperm.xlu1 %7233, %v9245_v48  }
 0x46e   :  { %v2847_v33 = vpop.permute.xlu1 %2846 }
 0x46f   :  { %v2900_v45 = vadd.f32 %v9301_v30, %v2847_v33 }
 0x471   :  { %v2932_v35 = vmul.f32 0.2, %v2900_v45  ;;  %vm2916_vm3 = vcmp.ge.f32.partialorder %v2900_v45, 0.0 }
 0x473   :  { %v9483_v14 = vpop.permute.xlu1 %3323  ;;  %v2948_v55 = vsel %vm2916_vm3, %v2900_v45, %v2932_v35  ;;  %v9507_v35 = vrot.slane %v9253_v31, %v8616_v29 }
 0x474   :  { %v9488_v48 = vsel %vm2964_vm4, %v2948_v55, -1e+30  ;;  %v2926_v55 = vmul.f32 0.2, %v2894_v22 }
 0x475   :  { %10905 = vst [vmem:[#allocation32_spill] sm:$0xff] %v9488_v48  ;;  %3003 = vmax.xlane.f32.xlu0 %v9488_v48  ;;  %v3879_v9 = vadd.f32 %v9507_v35, %v9340_v63  ;;  %v3882_v32 = vadd.f32 %v9507_v35, %v9377_v11  ;;  %v3881_v11 = vadd.f32 %v9507_v35, %v9405_v17 }
 0x476   :  { %v2942_v29 = vsel %vm2910_vm10, %v2894_v22, %v2926_v55 }
 0x477   :  { %v3911_v55 = vmul.f32 0.2, %v3879_v9  ;;  %vm3895_vm3 = vcmp.ge.f32.partialorder %v3879_v9, 0.0  ;;  %v3913_v17 = vmul.f32 0.2, %v3881_v11  ;;  %vm3897_vm13 = vcmp.ge.f32.partialorder %v3881_v11, 0.0 }
 0x478   :  { %v9491_v36 = vpop.permute.xlu1 %3840 }
 0x47d   :  { %v9493_v23 = vpop.permute.xlu1 %4341 }
 0x482   :  { %v3320_v0 = vpop.permute.xlu1 %3319 }
 0x483   :  { %v3368_v33 = vadd.f32 %v9324_v61, %v3320_v0  ;;  %v3880_v0 = vadd.f32 %v9507_v35, %v9297_v21  ;;  %v9532_v21 = vpop.permute.xlu0 %2831 }
 0x485   :  { %v3400_v45 = vmul.f32 0.2, %v3368_v33  ;;  %vm3384_vm7 = vcmp.ge.f32.partialorder %v3368_v33, 0.0  ;;  %vm3896_vm2 = vcmp.ge.f32.partialorder %v3880_v0, 0.0 }
 0x487   :  { %v9511_v38 = vpop.permute.xlu1 %3836  ;;  %v3416_v42 = vsel %vm3384_vm7, %v3368_v33, %v3400_v45  ;;  %v9526_v33 = vsel %vm2958_vm9, %v2942_v29, -1e+30  ;;  %v2554_v45 = vmax.f32 %v9165_v40, 1.0  ;;  %v9537_v29 = vsel %vm2958_vm9, %v3411_v7, -1e+30  ;;  %v9545_v48 = vpop.permute.xlu0 %2841 }
 0x488   :  { %v9515_v4 = vsel %vm2963_vm8, %v3416_v42, -1e+30  ;;  %v3912_v42 = vmul.f32 0.2, %v3880_v0 }
 0x489   :  { %10906 = vst [vmem:[#allocation33_spill] sm:$0xff] %v9515_v4  ;;  %3454 = vmax.xlane.f32.xlu0 %v9515_v4  ;;  %v9540_v4 = vsel %vm2538_vm14, %v2554_v45, %v9165_v40  ;;  %v3927_v40 = vsel %vm3895_vm3, %v3879_v9, %v3911_v55  ;;  %v3914_v45 = vmul.f32 0.2, %v3882_v32 }
 0x48a   :  { %10907 = vst [vmem:[#allocation34_spill] sm:$0xff] %v9540_v4  ;;  %v3928_v53 = vsel %vm3896_vm2, %v3880_v0, %v3912_v42  ;;  %vm2966_vm7 = vcmp.gt.f32.partialorder %v9540_v4, 0.0  ;;  %v9565_v9 = vsel %vm2957_vm11, %v3927_v40, -1e+30 }
 0x48c   :  { %v9520_v31 = vpop.permute.xlu1 %4337 }
 0x48f   :  { %2991 = vmax.xlane.f32.xlu1 %v9526_v33 }
 0x491   :  { %v2857_v22 = vpop.permute.xlu1 %2856 }
 0x492   :  { %v2902_v63 = vadd.f32 %v9301_v30, %v2857_v22  ;;  %v9549_v22 = vsel %vm2958_vm9, %v3928_v53, -1e+30  ;;  %vm3898_vm9 = vcmp.ge.f32.partialorder %v3882_v32, 0.0  ;;  %v9561_v53 = vpop.permute.xlu0 %2851 }
 0x493   :  { %3444 = vmax.xlane.f32.xlu1 %v9537_v29 }
 0x494   :  { %v2934_v2 = vmul.f32 0.2, %v2902_v63  ;;  %vm2918_vm5 = vcmp.ge.f32.partialorder %v2902_v63, 0.0 }
 0x496   :  { %v3332_v19 = vpop.permute.xlu1 %3331  ;;  %v2950_v7 = vsel %vm2918_vm5, %v2902_v63, %v2934_v2 }
 0x497   :  { %v3371_v0 = vadd.f32 %v9324_v61, %v3332_v19  ;;  %3961 = vmax.xlane.f32.xlu1 %v9549_v22  ;;  %v9558_v42 = vsel %vm2966_vm7, %v2950_v7, -1e+30  ;;  %v3367_v19 = vadd.f32 %v9324_v61, %v9436_v26  ;;  %v3930_v7 = vsel %vm3898_vm9, %v3882_v32, %v3914_v45  ;;  %v3845_v26 = vpop.permute.xlu0 %3844 }
 0x498   :  { %10908 = vst [vmem:[#allocation35_spill] sm:$0xff] %v9558_v42  ;;  %3007 = vmax.xlane.f32.xlu0 %v9558_v42  ;;  %v9578_v44 = vsel %vm2960_vm15, %v3930_v7, -1e+30  ;;  %v3884_v32 = vadd.f32 %v9507_v35, %v9446_v27  ;;  %v3929_v45 = vsel %vm3897_vm13, %v3881_v11, %v3913_v17  ;;  %v2553_v7 = vmax.f32 %v9162_v60, 1.0 }
 0x499   :  { %v3403_v63 = vmul.f32 0.2, %v3371_v0  ;;  %vm3387_vm10 = vcmp.ge.f32.partialorder %v3371_v0, 0.0  ;;  %v3399_v62 = vmul.f32 0.2, %v3367_v19  ;;  %vm3383_vm14 = vcmp.ge.f32.partialorder %v3367_v19, 0.0 }
 0x49a   :  { %v3916_v27 = vmul.f32 0.2, %v3884_v32  ;;  %v4385_v11 = vadd.f32 %v9305_v39, %v9450_v16  ;;  %vm2537_vm15 = vcmp.eq.s32.totalorder %v8499_v43, %v7846_v15  ;;  %v3887_v17 = vadd.f32 %v9507_v35, %v3845_v26 }
 0x49b   :  { %v3849_v55 = vpop.permute.xlu1 %3848  ;;  %3959 = vmax.xlane.f32.xlu1 %v9565_v9  ;;  %v3419_v2 = vsel %vm3387_vm10, %v3371_v0, %v3403_v63  ;;  %vm3900_vm2 = vcmp.ge.f32.partialorder %v3884_v32, 0.0  ;;  %vm2540_vm13 = vcmp.eq.s32.totalorder %v8543_v56, %v7846_v15 }
 0x49c   :  { %v3888_v42 = vadd.f32 %v9507_v35, %v3849_v55  ;;  %v9573_v52 = vsel %vm2966_vm7, %v3419_v2, -1e+30  ;;  %v9592_v2 = vsel %vm2959_vm6, %v3929_v45, -1e+30  ;;  %v2897_v45 = vadd.f32 %v9301_v30, %v9532_v21 }
 0x49d   :  { %10909 = vst [vmem:[#allocation36_spill] sm:$0xff] %v9573_v52  ;;  %3460 = vmax.xlane.f32.xlu0 %v9573_v52  ;;  %v3932_v43 = vsel %vm3900_vm2, %v3884_v32, %v3916_v27  ;;  %v3919_v26 = vmul.f32 0.2, %v3887_v17  ;;  %vm4401_vm3 = vcmp.ge.f32.partialorder %v4385_v11, 0.0  ;;  %vm3903_vm5 = vcmp.ge.f32.partialorder %v3887_v17, 0.0 }
 0x49e   :  { %v3920_v40 = vmul.f32 0.2, %v3888_v42  ;;  %vm3904_vm11 = vcmp.ge.f32.partialorder %v3888_v42, 0.0  ;;  %v2929_v49 = vmul.f32 0.2, %v2897_v45  ;;  %vm2913_vm10 = vcmp.ge.f32.partialorder %v2897_v45, 0.0 }
 0x49f   :  { %3965 = vmax.xlane.f32.xlu1 %v9578_v44  ;;  %v3935_v25 = vsel %vm3903_vm5, %v3887_v17, %v3919_v26 }
 0x4a0   :  { %v9583_v0 = vpop.permute.xlu1 %4349  ;;  %v3936_v63 = vsel %vm3904_vm11, %v3888_v42, %v3920_v40  ;;  %v3415_v42 = vsel %vm3383_vm14, %v3367_v19, %v3399_v62  ;;  %v9601_v40 = vpop.permute.xlu0 %2861  ;;  %v9611_v62 = vsel %vm2537_vm15, %v2553_v7, %v9162_v60  ;;  %v4417_v19 = vmul.f32 0.2, %v4385_v11 }
 0x4a1   :  { %v9587_v55 = vsel %vm2966_vm7, %v3936_v63, -1e+30  ;;  %v9608_v16 = vsel %vm2962_vm12, %v3415_v42, -1e+30  ;;  %vm2965_vm9 = vcmp.gt.f32.partialorder %v9611_v62, 0.0  ;;  %v3883_v42 = vadd.f32 %v9507_v35, %v9462_v28 }
 0x4a2   :  { %10910 = vst [vmem:[#allocation37_spill] sm:$0xff] %v9587_v55  ;;  %3977 = vmax.xlane.f32.xlu0 %v9587_v55  ;;  %v4433_v27 = vsel %vm4401_vm3, %v4385_v11, %v4417_v19  ;;  %v9641_v11 = vsel %vm2965_vm9, %v3935_v25, -1e+30  ;;  %v3369_v25 = vadd.f32 %v9324_v61, %v9483_v14  ;;  %vm2539_vm3 = vcmp.eq.s32.totalorder %v8527_v58, %v7846_v15 }
 0x4a3   :  { %3963 = vmax.xlane.f32.xlu1 %v9592_v2  ;;  %v9636_v28 = vsel %vm2962_vm12, %v4433_v27, -1e+30  ;;  %10913 = vst [vmem:[#allocation40_spill] sm:$0xff] %v9641_v11  ;;  %vm3899_vm11 = vcmp.ge.f32.partialorder %v3883_v42, 0.0 }
 0x4a4   :  { %v3336_v7 = vpop.permute.xlu0 %3335 }
 0x4a5   :  { %v3328_v63 = vpop.permute.xlu1 %3327 }
 0x4a6   :  { %v3370_v55 = vadd.f32 %v9324_v61, %v3328_v63  ;;  %v9618_v63 = vsel %vm2962_vm12, %v3932_v43, -1e+30  ;;  %v2556_v43 = vmax.f32 %v9170_v51, 1.0 }
 0x4a7   :  { %3452 = vmax.xlane.f32.xlu1 %v9608_v16  ;;  %10911 = vst [vmem:[#allocation38_spill] sm:$0xff] %v9618_v63 }
 0x4a8   :  { %v3402_v52 = vmul.f32 0.2, %v3370_v55  ;;  %vm3386_vm6 = vcmp.ge.f32.partialorder %v3370_v55, 0.0  ;;  %v9646_v56 = vsel %vm2540_vm13, %v2556_v43, %v9170_v51 }
 0x4a9   :  { %vm2968_vm15 = vcmp.gt.f32.partialorder %v9646_v56, 0.0 }
 0x4aa   :  { %v9614_v21 = vpop.permute.xlu1 %4345  ;;  %v3418_v60 = vsel %vm3386_vm6, %v3370_v55, %v3402_v52  ;;  %v4384_v52 = vadd.f32 %v9305_v39, %v9472_v24  ;;  %v2945_v55 = vsel %vm2913_vm10, %v2897_v45, %v2929_v49  ;;  %v9648_v24 = vpop.permute.xlu0 %4365  ;;  %vm3385_vm6 = vcmp.ge.f32.partialorder %v3369_v25, 0.0 }
 0x4ab   :  { %3969 = vmax.xlane.f32.xlu1 %v9618_v63  ;;  %v9626_v32 = vsel %vm2965_vm9, %v3418_v60, -1e+30  ;;  %v3915_v60 = vmul.f32 0.2, %v3883_v42  ;;  %v9652_v49 = vsel %vm2961_vm1, %v2945_v55, -1e+30 }
 0x4ac   :  { %10912 = vst [vmem:[#allocation39_spill] sm:$0xff] %v9626_v32  ;;  %3458 = vmax.xlane.f32.xlu0 %v9626_v32  ;;  %v4416_v45 = vmul.f32 0.2, %v4384_v52  ;;  %vm4400_vm14 = vcmp.ge.f32.partialorder %v4384_v52, 0.0 }
 0x4ad   :  { %v3931_v26 = vsel %vm3899_vm11, %v3883_v42, %v3915_v60  ;;  %v3401_v42 = vmul.f32 0.2, %v3369_v25  ;;  %v3886_v60 = vadd.f32 %v9507_v35, %v9491_v36 }
 0x4ae   :  { %v9666_v55 = vsel %vm2961_vm1, %v3931_v26, -1e+30  ;;  %v4432_v14 = vsel %vm4400_vm14, %v4384_v52, %v4416_v45  ;;  %v9668_v32 = vpop.permute.xlu0 %2871 }
 0x4af   :  { %v2867_v63 = vpop.permute.xlu1 %2866  ;;  %4470 = vmax.xlane.f32.xlu1 %v9636_v28  ;;  %v9678_v52 = vsel %vm2961_vm1, %v4432_v14, -1e+30  ;;  %v3918_v45 = vmul.f32 0.2, %v3886_v60  ;;  %vm3902_vm5 = vcmp.ge.f32.partialorder %v3886_v60, 0.0 }
 0x4b0   :  { %v2904_v17 = vadd.f32 %v9301_v30, %v2867_v63  ;;  %3975 = vmax.xlane.f32.xlu0 %v9641_v11  ;;  %10915 = vst [vmem:[#allocation42_spill] sm:$0xff] %v9678_v52 }
 0x4b2   :  { %v2936_v19 = vmul.f32 0.2, %v2904_v17  ;;  %vm2920_vm12 = vcmp.ge.f32.partialorder %v2904_v17, 0.0  ;;  %v9690_v14 = vpop.permute.xlu0 %3343 }
 0x4b3   :  { %2997 = vmax.xlane.f32.xlu1 %v9652_v49 }
 0x4b4   :  { %v3340_v63 = vpop.permute.xlu1 %3339  ;;  %v2952_v27 = vsel %vm2920_vm12, %v2904_v17, %v2936_v19  ;;  %v3372_v19 = vadd.f32 %v9324_v61, %v3336_v7  ;;  %v4387_v7 = vadd.f32 %v9305_v39, %v9493_v23 }
 0x4b5   :  { %v3373_v51 = vadd.f32 %v9324_v61, %v3340_v63  ;;  %v9661_v43 = vsel %vm2968_vm15, %v2952_v27, -1e+30 }
 0x4b6   :  { %10914 = vst [vmem:[#allocation41_spill] sm:$0xff] %v9661_v43  ;;  %3011 = vmax.xlane.f32.xlu0 %v9661_v43  ;;  %v2555_v43 = vmax.f32 %v9168_v57, 1.0  ;;  %vm3388_vm10 = vcmp.ge.f32.partialorder %v3372_v19, 0.0  ;;  %vm4403_vm13 = vcmp.ge.f32.partialorder %v4387_v7, 0.0 }
 0x4b7   :  { %v3405_v17 = vmul.f32 0.2, %v3373_v51  ;;  %3967 = vmax.xlane.f32.xlu1 %v9666_v55  ;;  %vm3389_vm2 = vcmp.ge.f32.partialorder %v3373_v51, 0.0 }
 0x4b9   :  { %v3857_v63 = vpop.permute.xlu1 %3856  ;;  %v3421_v27 = vsel %vm3389_vm2, %v3373_v51, %v3405_v17  ;;  %v3417_v51 = vsel %vm3385_vm6, %v3369_v25, %v3401_v42  ;;  %v3404_v17 = vmul.f32 0.2, %v3372_v19  ;;  %v2899_v25 = vadd.f32 %v9301_v30, %v9545_v48  ;;  %v9714_v48 = vpop.permute.xlu0 %3872 }
 0x4ba   :  { %v3890_v26 = vadd.f32 %v9507_v35, %v3857_v63  ;;  %v9682_v36 = vsel %vm2968_vm15, %v3421_v27, -1e+30  ;;  %v9693_v27 = vsel %vm2539_vm3, %v2555_v43, %v9168_v57  ;;  %v9699_v23 = vsel %vm2964_vm4, %v3417_v51, -1e+30 }
 0x4bb   :  { %10916 = vst [vmem:[#allocation43_spill] sm:$0xff] %v9682_v36  ;;  %4468 = vmax.xlane.f32.xlu1 %v9678_v52  ;;  %3464 = vmax.xlane.f32.xlu0 %v9682_v36  ;;  %v4419_v42 = vmul.f32 0.2, %v4387_v7  ;;  %v3934_v52 = vsel %vm3902_vm5, %v3886_v60, %v3918_v45  ;;  %v3420_v57 = vsel %vm3388_vm10, %v3372_v19, %v3404_v17  ;;  %vm2967_vm11 = vcmp.gt.f32.partialorder %v9693_v27, 0.0 }
 0x4bc   :  { %v3922_v63 = vmul.f32 0.2, %v3890_v26  ;;  %vm3906_vm1 = vcmp.ge.f32.partialorder %v3890_v26, 0.0  ;;  %v9711_v43 = vsel %vm2964_vm4, %v3934_v52, -1e+30  ;;  %v3885_v51 = vadd.f32 %v9507_v35, %v9511_v38 }
 0x4bd   :  { %v4435_v60 = vsel %vm4403_vm13, %v4387_v7, %v4419_v42  ;;  %vm2915_vm12 = vcmp.ge.f32.partialorder %v2899_v25, 0.0  ;;  %v4386_v17 = vadd.f32 %v9305_v39, %v9520_v31  ;;  %v9734_v42 = vpop.permute.xlu0 %4373 }
 0x4be   :  { %v9695_v58 = vpop.permute.xlu1 %4357  ;;  %v3938_v11 = vsel %vm3906_vm1, %v3890_v26, %v3922_v63  ;;  %v2931_v26 = vmul.f32 0.2, %v2899_v25  ;;  %v9727_v45 = vsel %vm2964_vm4, %v4435_v60, -1e+30  ;;  %v3917_v38 = vmul.f32 0.2, %v3885_v51 }
 0x4bf   :  { %3456 = vmax.xlane.f32.xlu1 %v9699_v23  ;;  %v9706_v36 = vsel %vm2968_vm15, %v3938_v11, -1e+30  ;;  %v9721_v11 = vsel %vm2967_vm11, %v3420_v57, -1e+30  ;;  %vm3901_vm2 = vcmp.ge.f32.partialorder %v3885_v51, 0.0  ;;  %v2558_v60 = vmax.f32 %v9174_v20, 1.0 }
 0x4c0   :  { %10917 = vst [vmem:[#allocation44_spill] sm:$0xff] %v9706_v36  ;;  %3981 = vmax.xlane.f32.xlu0 %v9706_v36  ;;  %10918 = vst [vmem:[#allocation45_spill] sm:$0xff] %v9721_v11  ;;  %v2947_v57 = vsel %vm2915_vm12, %v2899_v25, %v2931_v26  ;;  %vm2542_vm4 = vcmp.eq.s32.totalorder %v8571_v13, %v7846_v15  ;;  %v4418_v25 = vmul.f32 0.2, %v4386_v17  ;;  %vm4402_vm6 = vcmp.ge.f32.partialorder %v4386_v17, 0.0 }
 0x4c1   :  { %v9744_v31 = vsel %vm2963_vm8, %v2947_v57, -1e+30  ;;  %v4389_v26 = vadd.f32 %v9305_v39, %v9583_v0 }
 0x4c3   :  { %v3853_v63 = vpop.permute.xlu1 %3852  ;;  %3973 = vmax.xlane.f32.xlu1 %v9711_v43  ;;  %v4421_v0 = vmul.f32 0.2, %v4389_v26  ;;  %vm4405_vm1 = vcmp.ge.f32.partialorder %v4389_v26, 0.0 }
 0x4c4   :  { %v3889_v19 = vadd.f32 %v9507_v35, %v3853_v63  ;;  %3462 = vmax.xlane.f32.xlu0 %v9721_v11  ;;  %v9761_v11 = vpop.permute.xlu0 %2881 }
 0x4c6   :  { %v3921_v52 = vmul.f32 0.2, %v3889_v19  ;;  %vm3905_vm14 = vcmp.ge.f32.partialorder %v3889_v19, 0.0 }
 0x4c7   :  { %4474 = vmax.xlane.f32.xlu1 %v9727_v45 }
 0x4c8   :  { %v9732_v36 = vpop.permute.xlu1 %4353  ;;  %v3937_v7 = vsel %vm3905_vm14, %v3889_v19, %v3921_v52  ;;  %v3933_v19 = vsel %vm3901_vm2, %v3885_v51, %v3917_v38  ;;  %v4434_v51 = vsel %vm4402_vm6, %v4386_v17, %v4418_v25  ;;  %v4437_v25 = vsel %vm4405_vm1, %v4389_v26, %v4421_v0 }
 0x4c9   :  { %v9738_v63 = vsel %vm2967_vm11, %v3937_v7, -1e+30  ;;  %v9752_v7 = vsel %vm2542_vm4, %v2558_v60, %v9174_v20  ;;  %v9759_v13 = vsel %vm2963_vm8, %v3933_v19, -1e+30  ;;  %v4388_v19 = vadd.f32 %v9305_v39, %v9614_v21 }
 0x4ca   :  { %10919 = vst [vmem:[#allocation46_spill] sm:$0xff] %v9738_v63  ;;  %3979 = vmax.xlane.f32.xlu0 %v9738_v63  ;;  %10920 = vst [vmem:[#allocation47_spill] sm:$0xff] %v9752_v7  ;;  %v2901_v63 = vadd.f32 %v9301_v30, %v9561_v53  ;;  %vm2970_vm5 = vcmp.gt.f32.partialorder %v9752_v7, 0.0  ;;  %v9767_v53 = vsel %vm2963_vm8, %v4434_v51, -1e+30 }
 0x4cb   :  { %3001 = vmax.xlane.f32.xlu1 %v9744_v31  ;;  %10921 = vst [vmem:[#allocation48_spill] sm:$0xff] %v9759_v13  ;;  %10922 = vst [vmem:[#allocation49_spill] sm:$0xff] %v9767_v53  ;;  %v9784_v21 = vsel %vm2966_vm7, %v4437_v25, -1e+30  ;;  %vm4404_vm13 = vcmp.ge.f32.partialorder %v4388_v19, 0.0  ;;  %vm2541_vm7 = vcmp.eq.s32.totalorder %v8559_v3, %v7846_v15 }
 0x4cc   :  { %v2933_v20 = vmul.f32 0.2, %v2901_v63  ;;  %vm2917_vm10 = vcmp.ge.f32.partialorder %v2901_v63, 0.0  ;;  %10924 = vst [vmem:[#allocation51_spill] sm:$0xff] %v9784_v21 }
 0x4cd   :  { %v2877_v52 = vpop.permute.xlu1 %2876 }
 0x4ce   :  { %v2906_v57 = vadd.f32 %v9301_v30, %v2877_v52 }
 0x4cf   :  { %3971 = vmax.xlane.f32.xlu1 %v9759_v13  ;;  %v9778_v13 = vpop.permute.xlu0 %3351 }
 0x4d0   :  { %v2938_v38 = vmul.f32 0.2, %v2906_v57  ;;  %vm2922_vm3 = vcmp.ge.f32.partialorder %v2906_v57, 0.0 }
 0x4d2   :  { %v3348_v60 = vpop.permute.xlu1 %3347  ;;  %v2954_v52 = vsel %vm2922_vm3, %v2906_v57, %v2938_v38  ;;  %v3374_v57 = vadd.f32 %v9324_v61, %v9690_v14  ;;  %v2949_v38 = vsel %vm2917_vm10, %v2901_v63, %v2933_v20  ;;  %v2557_v14 = vmax.f32 %v9172_v50, 1.0 }
 0x4d3   :  { %v3375_v37 = vadd.f32 %v9324_v61, %v3348_v60  ;;  %4472 = vmax.xlane.f32.xlu1 %v9767_v53  ;;  %v9775_v17 = vsel %vm2970_vm5, %v2954_v52, -1e+30  ;;  %v4420_v60 = vmul.f32 0.2, %v4388_v19  ;;  %v4391_v52 = vadd.f32 %v9305_v39, %v9695_v58 }
 0x4d4   :  { %10923 = vst [vmem:[#allocation50_spill] sm:$0xff] %v9775_v17  ;;  %3015 = vmax.xlane.f32.xlu0 %v9775_v17  ;;  %v9798_v63 = vsel %vm2965_vm9, %v2949_v38, -1e+30  ;;  %v3406_v58 = vmul.f32 0.2, %v3374_v57  ;;  %v2903_v20 = vadd.f32 %v9301_v30, %v9601_v40  ;;  %vm3390_vm14 = vcmp.ge.f32.partialorder %v3374_v57, 0.0 }
 0x4d5   :  { %v3407_v51 = vmul.f32 0.2, %v3375_v37  ;;  %vm3391_vm8 = vcmp.ge.f32.partialorder %v3375_v37, 0.0  ;;  %v4423_v25 = vmul.f32 0.2, %v4391_v52  ;;  %vm4407_vm2 = vcmp.ge.f32.partialorder %v4391_v52, 0.0 }
 0x4d6   :  { %v9809_v3 = vsel %vm2541_vm7, %v2557_v14, %v9172_v50  ;;  %vm2919_vm3 = vcmp.ge.f32.partialorder %v2903_v20, 0.0 }
 0x4d7   :  { %v3865_v53 = vpop.permute.xlu1 %3864  ;;  %4478 = vmax.xlane.f32.xlu1 %v9784_v21  ;;  %v3423_v26 = vsel %vm3391_vm8, %v3375_v37, %v3407_v51  ;;  %v4439_v50 = vsel %vm4407_vm2, %v4391_v52, %v4423_v25  ;;  %vm2969_vm6 = vcmp.gt.f32.partialorder %v9809_v3, 0.0 }
 0x4d8   :  { %v3892_v0 = vadd.f32 %v9507_v35, %v3865_v53  ;;  %v9792_v17 = vsel %vm2970_vm5, %v3423_v26, -1e+30  ;;  %v9804_v53 = vpop.permute.xlu0 %3868  ;;  %v4436_v26 = vsel %vm4404_vm13, %v4388_v19, %v4420_v60  ;;  %v3422_v19 = vsel %vm3390_vm14, %v3374_v57, %v3406_v58 }
 0x4d9   :  { %10925 = vst [vmem:[#allocation52_spill] sm:$0xff] %v9792_v17  ;;  %3468 = vmax.xlane.f32.xlu0 %v9792_v17  ;;  %v9818_v21 = vsel %vm2965_vm9, %v4436_v26, -1e+30  ;;  %v2935_v60 = vmul.f32 0.2, %v2903_v20  ;;  %v4393_v57 = vadd.f32 %v9305_v39, %v9648_v24  ;;  %v2560_v58 = vmax.f32 %v9178_v34, 1.0 }
 0x4da   :  { %v3924_v37 = vmul.f32 0.2, %v3892_v0  ;;  %vm3908_vm12 = vcmp.ge.f32.partialorder %v3892_v0, 0.0  ;;  %vm2544_vm9 = vcmp.eq.s32.totalorder %v8603_v8, %v7846_v15  ;;  %v2905_v8 = vadd.f32 %v9301_v30, %v9668_v32 }
 0x4db   :  { %v3861_v51 = vpop.permute.xlu1 %3860  ;;  %3005 = vmax.xlane.f32.xlu1 %v9798_v63  ;;  %v3893_v7 = vadd.f32 %v9507_v35, %v9804_v53 }
 0x4dc   :  { %v3891_v38 = vadd.f32 %v9507_v35, %v3861_v51  ;;  %v3940_v17 = vsel %vm3908_vm12, %v3892_v0, %v3924_v37  ;;  %v4390_v0 = vadd.f32 %v9305_v39, %v9732_v36  ;;  %v9828_v37 = vsel %vm2969_vm6, %v3422_v19, -1e+30 }
 0x4dd   :  { %v9813_v4 = vsel %vm2970_vm5, %v3940_v17, -1e+30  ;;  %v9824_v17 = vpop.permute.xlu0 %4369  ;;  %v9835_v36 = vsel %vm2968_vm15, %v4439_v50, -1e+30  ;;  %v2951_v51 = vsel %vm2919_vm3, %v2903_v20, %v2935_v60  ;;  %v4425_v50 = vmul.f32 0.2, %v4393_v57 }
 0x4de   :  { %10926 = vst [vmem:[#allocation53_spill] sm:$0xff] %v9813_v4  ;;  %v3923_v40 = vmul.f32 0.2, %v3891_v38  ;;  %3985 = vmax.xlane.f32.xlu0 %v9813_v4  ;;  %vm3907_vm4 = vcmp.ge.f32.partialorder %v3891_v38, 0.0  ;;  %v4422_v25 = vmul.f32 0.2, %v4390_v0  ;;  %v9854_v20 = vsel %vm2544_vm9, %v2560_v58, %v9178_v34 }
 0x4df   :  { %4476 = vmax.xlane.f32.xlu1 %v9818_v21  ;;  %vm4406_vm1 = vcmp.ge.f32.partialorder %v4390_v0, 0.0  ;;  %vm4409_vm15 = vcmp.ge.f32.partialorder %v4393_v57, 0.0  ;;  %vm2972_vm8 = vcmp.gt.f32.partialorder %v9854_v20, 0.0  ;;  %v2937_v58 = vmul.f32 0.2, %v2905_v8 }
 0x4e0   :  { %v4362_v14 = vpop.permute.xlu1 %4361  ;;  %v3939_v52 = vsel %vm3907_vm4, %v3891_v38, %v3923_v40  ;;  %v9851_v40 = vsel %vm2967_vm11, %v2951_v51, -1e+30  ;;  %v4438_v60 = vsel %vm4406_vm1, %v4390_v0, %v4422_v25  ;;  %v4441_v34 = vsel %vm4409_vm15, %v4393_v57, %v4425_v50 }
 0x4e1   :  { %v9841_v26 = vpop.xlane.xlu0 %4462  ;;  %v9845_v19 = vsel %vm2969_vm6, %v3939_v52, -1e+30  ;;  %v9863_v51 = vsel %vm2967_vm11, %v4438_v60, -1e+30  ;;  %v4392_v4 = vadd.f32 %v9305_v39, %v4362_v14  ;;  %vm2921_vm11 = vcmp.ge.f32.partialorder %v2905_v8, 0.0 }
 0x4e2   :  { %3466 = vmax.xlane.f32.xlu0 %v9828_v37  ;;  %10927 = vst [vmem:[#allocation54_spill] sm:$0xff] %v9841_v26  ;;  %10928 = vst [vmem:[#allocation55_spill] sm:$0xff] %v9845_v19  ;;  %v2559_v50 = vmax.f32 %v9176_v6, 1.0  ;;  %v9879_v14 = vsel %vm2970_vm5, %v4441_v34, -1e+30  ;;  %vm2543_vm12 = vcmp.eq.s32.totalorder %v8587_v18, %v7846_v15  ;;  %vm3909_vm4 = vcmp.ge.f32.partialorder %v3893_v7, 0.0 }
 0x4e3   :  { %4482 = vmax.xlane.f32.xlu1 %v9835_v36  ;;  %10929 = vst [vmem:[#allocation56_spill] sm:$0xff] %v9879_v14  ;;  %vm4408_vm5 = vcmp.ge.f32.partialorder %v4392_v4, 0.0  ;;  %vm5005_vm1 = vcmask 261120   ;;  %vm5038_vm15 = vcmask 785408  }
 0x4e4   :  { %v9899_v15 = vsel %vm2543_vm12, %v2559_v50, %v9176_v6 }
 0x4e5   :  { %v2887_v24 = vpop.permute.xlu1 %2886  ;;  %v2990_v32 = vpop.xlane.xlu0 %2989  ;;  %vm2971_vm3 = vcmp.gt.f32.partialorder %v9899_v15, 0.0 }
 0x4e6   :  { %v2908_v38 = vadd.f32 %v9301_v30, %v2887_v24  ;;  %3983 = vmax.xlane.f32.xlu0 %v9845_v19  ;;  %v3894_v24 = vadd.f32 %v9507_v35, %v9714_v48 }
 0x4e7   :  { %3009 = vmax.xlane.f32.xlu1 %v9851_v40 }
 0x4e8   :  { %v2940_v52 = vmul.f32 0.2, %v2908_v38  ;;  %vm2924_vm10 = vcmp.ge.f32.partialorder %v2908_v38, 0.0  ;;  %v3926_v25 = vmul.f32 0.2, %v3894_v24  ;;  %vm3910_vm7 = vcmp.ge.f32.partialorder %v3894_v24, 0.0 }
 0x4ea   :  { %v3356_v26 = vpop.permute.xlu1 %3355  ;;  %v2956_v19 = vsel %vm2924_vm10, %v2908_v38, %v2940_v52  ;;  %v3376_v38 = vadd.f32 %v9324_v61, %v9778_v13  ;;  %v2953_v52 = vsel %vm2921_vm11, %v2905_v8, %v2937_v58 }
 0x4eb   :  { %v3377_v0 = vadd.f32 %v9324_v61, %v3356_v26  ;;  %4480 = vmax.xlane.f32.xlu1 %v9863_v51  ;;  %v9871_v48 = vsel %vm2972_vm8, %v2956_v19, -1e+30  ;;  %v4395_v26 = vadd.f32 %v9305_v39, %v9734_v42  ;;  %v4424_v19 = vmul.f32 0.2, %v4392_v4  ;;  %v3443_v42 = vpop.xlane.xlu0 %3442 }
 0x4ec   :  { %3019 = vmax.xlane.f32.xlu0 %v9871_v48  ;;  %v3021_v61 = vsub.f32 %v9344_v5, %v2990_v32  ;;  %v3408_v34 = vmul.f32 0.2, %v3376_v38  ;;  %v9896_v8 = vsel %vm2969_vm6, %v2953_v52, -1e+30  ;;  %vm3392_vm14 = vcmp.ge.f32.partialorder %v3376_v38, 0.0 }
 0x4ed   :  { %v3409_v57 = vmul.f32 0.2, %v3377_v0  ;;  %vm3393_vm13 = vcmp.ge.f32.partialorder %v3377_v0, 0.0  ;;  %v4427_v18 = vmul.f32 0.2, %v4395_v26  ;;  %v2907_v5 = vadd.f32 %v9301_v30, %v9761_v11 }
 0x4ee   :  { %v4440_v58 = vsel %vm4408_vm5, %v4392_v4, %v4424_v19  ;;  %v3037_v35 = vmul.f32 1.442695, %v3021_v61  ;;  %v3474_v53 = vsub.f32 %v9354_v47, %v3443_v42  ;;  %vm4411_vm2 = vcmp.ge.f32.partialorder %v4395_v26, 0.0 }
 0x4ef   :  { %4486 = vmax.xlane.f32.xlu1 %v9879_v14  ;;  %v3425_v60 = vsel %vm3393_vm13, %v3377_v0, %v3409_v57  ;;  %v3942_v14 = vsel %vm3910_vm7, %v3894_v24, %v3926_v25  ;;  %v3925_v32 = vmul.f32 0.2, %v3893_v7  ;;  %v3424_v6 = vsel %vm3392_vm14, %v3376_v38, %v3408_v34  ;;  %v9916_v11 = vpop.xlane.xlu0 %4460 }
 0x4f0   :  { %v9889_v13 = vsel %vm2972_vm8, %v3425_v60, -1e+30  ;;  %v9907_v24 = vsel %vm2972_vm8, %v3942_v14, -1e+30  ;;  %v9912_v0 = vsel %vm2969_vm6, %v4440_v58, -1e+30  ;;  %v4394_v4 = vadd.f32 %v9305_v39, %v9824_v17 }
 0x4f1   :  { %3472 = vmax.xlane.f32.xlu0 %v9889_v13  ;;  %v2939_v30 = vmul.f32 0.2, %v2907_v5  ;;  %v4443_v47 = vsel %vm4411_vm2, %v4395_v26, %v4427_v18  ;;  %7255 = vpow2.f32 %v3037_v35  ;;  %v3490_v25 = vmul.f32 1.442695, %v3474_v53 }
 0x4f2   :  { %v9922_v38 = vsel %vm2971_vm3, %v3424_v6, -1e+30  ;;  %vm2923_vm6 = vcmp.ge.f32.partialorder %v2907_v5, 0.0  ;;  %v3941_v57 = vsel %vm3909_vm4, %v3893_v7, %v3925_v32  ;;  %v9927_v39 = vsel %vm2972_vm8, %v4443_v47, -1e+30 }
 0x4f3   :  { %3013 = vmax.xlane.f32.xlu1 %v9896_v8  ;;  %10930 = vst [vmem:[#allocation57_spill] sm:$0xff] %v9927_v39  ;;  %v4426_v17 = vmul.f32 0.2, %v4394_v4  ;;  %v2955_v50 = vsel %vm2923_vm6, %v2907_v5, %v2939_v30  ;;  %7257 = vpow2.f32 %v3490_v25  ;;  %v9932_v14 = vsel %vm2971_vm3, %v3941_v57, -1e+30  ;;  %v2996_v26 = vpop.xlane.xlu0 %2995 }
 0x4f4   :  { %vm4410_vm9 = vcmp.ge.f32.partialorder %v4394_v4, 0.0  ;;  %v9937_v7 = vsel %vm2971_vm3, %v2955_v50, -1e+30 }
 0x4f5   :  { %3989 = vmax.xlane.f32.xlu0 %v9907_v24  ;;  %v4442_v19 = vsel %vm4410_vm9, %v4394_v4, %v4426_v17  ;;  %v3024_v17 = vsub.f32 %v9372_v54, %v2996_v26 }
 0x4f6   :  { %v9942_v52 = vsel %vm2971_vm3, %v4442_v19, -1e+30 }
 0x4f7   :  { %4484 = vmax.xlane.f32.xlu1 %v9912_v0  ;;  %10931 = vst [vmem:[#allocation58_spill] sm:$0xff] %v9942_v52  ;;  %v3449_v61 = vpop.xlane.xlu0 %3448 }
 0x4f9   :  { %3470 = vmax.xlane.f32.xlu0 %v9922_v38 }
 0x4fb   :  { %4490 = vmax.xlane.f32.xlu1 %v9927_v39  ;;  %v7256_v60 = vpop.eup %7255  ;;  %v9948_v18 = vpop.xlane.xlu0 %4466  ;;  %v3043_v39 = vmul.f32 1.442695, %v3024_v17 }
 0x4fc   :  { %v9946_v34 = vmul.f32 %v7256_v60, %v9328_v12  ;;  %10932 = vst [vmem:[#allocation59_spill] sm:$0xff] %v9948_v18  ;;  %v3477_v18 = vsub.f32 %v9381_v10, %v3449_v61 }
 0x4fd   :  { %3987 = vmax.xlane.f32.xlu0 %v9932_v14  ;;  %v7258_v42 = vpop.eup %7257 }
 0x4fe   :  { %v9952_v5 = vmul.f32 %v7258_v42, %v9328_v12  ;;  %v3496_v54 = vmul.f32 1.442695, %v3477_v18 }
 0x4ff   :  { %3017 = vmax.xlane.f32.xlu1 %v9937_v7  ;;  %v2994_v58 = vpop.xlane.xlu0 %2993 }
 0x503   :  { %4488 = vmax.xlane.f32.xlu1 %v9942_v52  ;;  %v3447_v35 = vpop.xlane.xlu0 %3446 }
 0x507   :  { %3085 = vadd.xlane.f32.xlu1 %v9946_v34  ;;  %v9955_v53 = vpop.xlane.xlu0 %4464 }
 0x50b   :  { %3538 = vadd.xlane.f32.xlu1 %v9952_v5  ;;  %v3000_v6 = vpop.xlane.xlu0 %2999 }
 0x50f   :  { %v3451_v25 = vpop.xlane.xlu0 %3450 }
 0x513   :  { %v9960_v60 = vpop.xlane.xlu0 %3003 }
 0x51c   :  { %v2992_v32 = vpop.xlane.xlu1 %2991 }
 0x51d   :  { %v3022_v30 = vsub.f32 %v9526_v33, %v2992_v32  ;;  %v9964_v32 = vpop.xlane.xlu0 %3454 }
 0x51f   :  { %v3039_v4 = vmul.f32 1.442695, %v3022_v30 }
 0x520   :  { %v3445_v47 = vpop.xlane.xlu1 %3444 }
 0x521   :  { %7259 = vpow2.f32 %v3039_v4  ;;  %v3475_v57 = vsub.f32 %v9537_v29, %v3445_v47 }
 0x523   :  { %v3492_v50 = vmul.f32 1.442695, %v3475_v57 }
 0x524   :  { %v3962_v19 = vpop.xlane.xlu1 %3961 }
 0x525   :  { %7261 = vpow2.f32 %v3492_v50  ;;  %v3992_v42 = vsub.f32 %v9549_v22, %v3962_v19  ;;  %v9970_v57 = vpop.xlane.xlu0 %3007  ;;  %v10933_v22 = vld [vmem:[#allocation26_spill] sm:$0xff] }
 0x526   :  { %v3023_v61 = vsub.f32 %v10933_v22, %v2994_v58 }
 0x527   :  { %v4009_v52 = vmul.f32 1.442695, %v3992_v42 }
 0x528   :  { %v3960_v33 = vpop.xlane.xlu1 %3959  ;;  %v3041_v42 = vmul.f32 1.442695, %v3023_v61 }
 0x529   :  { %7263 = vpow2.f32 %v4009_v52  ;;  %v3991_v30 = vsub.f32 %v9565_v9, %v3960_v33  ;;  %v10934_v9 = vld [vmem:[#allocation29_spill] sm:$0xff]  ;;  %v10935_v33 = vld [vmem:[#allocation27_spill] sm:$0xff] }
 0x52a   :  { %7265 = vpow2.f32 %v3043_v39  ;;  %v3026_v17 = vsub.f32 %v10934_v9, %v3000_v6 }
 0x52b   :  { %v7260_v29 = vpop.eup %7259  ;;  %v4007_v26 = vmul.f32 1.442695, %v3991_v30  ;;  %v3476_v30 = vsub.f32 %v10935_v33, %v3447_v35  ;;  %v10940_v33 = vld [vmem:[#allocation38_spill] sm:$0xff] }
 0x52c   :  { %v3966_v4 = vpop.xlane.xlu1 %3965  ;;  %v9968_v47 = vmul.f32 %v7260_v29, %v9316_v46  ;;  %v3047_v58 = vmul.f32 1.442695, %v3026_v17  ;;  %v10936_v29 = vld [vmem:[#allocation30_spill] sm:$0xff] }
 0x52d   :  { %7267 = vpow2.f32 %v4007_v26  ;;  %v3994_v10 = vsub.f32 %v9578_v44, %v3966_v4  ;;  %v3478_v26 = vsub.f32 %v10936_v29, %v3451_v25  ;;  %v9983_v4 = vpop.xlane.xlu0 %3460  ;;  %v10939_v17 = vld [vmem:[#allocation22_spill] sm:$0xff] }
 0x52e   :  { %3087 = vadd.xlane.f32.xlu0 %v9968_v47  ;;  %7269 = vpow2.f32 %v3496_v54 }
 0x52f   :  { %v7262_v52 = vpop.eup %7261  ;;  %v4013_v39 = vmul.f32 1.442695, %v3994_v10  ;;  %v3498_v61 = vmul.f32 1.442695, %v3478_v26 }
 0x530   :  { %v3964_v18 = vpop.xlane.xlu1 %3963  ;;  %v9977_v50 = vmul.f32 %v7262_v52, %v9316_v46 }
 0x531   :  { %v3993_v19 = vsub.f32 %v9592_v2, %v3964_v18  ;;  %7271 = vpow2.f32 %v4013_v39  ;;  %v3494_v2 = vmul.f32 1.442695, %v3476_v30 }
 0x532   :  { %3540 = vadd.xlane.f32.xlu0 %v9977_v50 }
 0x533   :  { %v7264_v44 = vpop.eup %7263  ;;  %v4011_v6 = vmul.f32 1.442695, %v3993_v19  ;;  %v9996_v19 = vpop.xlane.xlu0 %3977 }
 0x534   :  { %v3453_v54 = vpop.xlane.xlu1 %3452  ;;  %v9986_v10 = vmul.f32 %v7264_v44, %v9316_v46  ;;  %v7266_v22 = vpop.eup %7265 }
 0x535   :  { %7273 = vpow2.f32 %v4011_v6  ;;  %v3479_v52 = vsub.f32 %v9608_v16, %v3453_v54  ;;  %v9994_v39 = vmul.f32 %v7266_v22, %v10939_v17 }
 0x536   :  { %10937 = vst [vmem:[#allocation26_spill] sm:$0xff] %v9986_v10  ;;  %7275 = vpow2.f32 %v3041_v42  ;;  %4057 = vadd.xlane.f32.xlu0 %v9986_v10 }
 0x537   :  { %v7268_v35 = vpop.eup %7267  ;;  %7277 = vpow2.f32 %v3047_v58  ;;  %v3500_v42 = vmul.f32 1.442695, %v3479_v52 }
 0x538   :  { %v3970_v25 = vpop.xlane.xlu1 %3969  ;;  %v9991_v9 = vmul.f32 %v7268_v35, %v9328_v12  ;;  %v7270_v18 = vpop.eup %7269  ;;  %7279 = vpow2.f32 %v3494_v2  ;;  %v10941_v35 = vld [vmem:[#allocation24_spill] sm:$0xff] }
 0x539   :  { %7281 = vpow2.f32 %v3498_v61  ;;  %v3996_v30 = vsub.f32 %v10940_v33, %v3970_v25  ;;  %v10002_v44 = vmul.f32 %v7270_v18, %v10939_v17  ;;  %v10004_v29 = vpop.xlane.xlu0 %3458 }
 0x53a   :  { %10938 = vst [vmem:[#allocation29_spill] sm:$0xff] %v9991_v9  ;;  %4055 = vadd.xlane.f32.xlu1 %v9991_v9  ;;  %3091 = vadd.xlane.f32.xlu0 %v9994_v39  ;;  %7283 = vpow2.f32 %v3500_v42 }
 0x53b   :  { %v7272_v58 = vpop.eup %7271  ;;  %v4017_v6 = vmul.f32 1.442695, %v3996_v30 }
 0x53c   :  { %v4471_v16 = vpop.xlane.xlu1 %4470  ;;  %v10012_v52 = vmul.f32 %v7272_v58, %v10939_v17 }
 0x53d   :  { %v4497_v54 = vsub.f32 %v9636_v28, %v4471_v16  ;;  %7285 = vpow2.f32 %v4017_v6  ;;  %v10016_v33 = vpop.xlane.xlu0 %3975  ;;  %v10945_v6 = vld [vmem:[#allocation32_spill] sm:$0xff] }
 0x53e   :  { %3544 = vadd.xlane.f32.xlu1 %v10002_v44  ;;  %10943 = vst [vmem:[#allocation30_spill] sm:$0xff] %v10012_v52 }
 0x53f   :  { %v7274_v26 = vpop.eup %7273  ;;  %v4518_v18 = vmul.f32 1.442695, %v4497_v54  ;;  %v3028_v54 = vsub.f32 %v10945_v6, %v9960_v60 }
 0x540   :  { %v7276_v22 = vpop.eup %7275  ;;  %v2998_v2 = vpop.xlane.xlu1 %2997  ;;  %v10009_v61 = vmul.f32 %v7274_v26, %v10941_v35 }
 0x541   :  { %v7278_v25 = vpop.eup %7277  ;;  %v3025_v42 = vsub.f32 %v9652_v49, %v2998_v2  ;;  %v10020_v16 = vmul.f32 %v7276_v22, %v10941_v35  ;;  %7287 = vpow2.f32 %v4518_v18  ;;  %v3051_v60 = vmul.f32 1.442695, %v3028_v54  ;;  %v10947_v18 = vld [vmem:[#allocation33_spill] sm:$0xff] }
 0x542   :  { %10942 = vst [vmem:[#allocation27_spill] sm:$0xff] %v10009_v61  ;;  %4059 = vadd.xlane.f32.xlu0 %v10009_v61  ;;  %4061 = vadd.xlane.f32.xlu1 %v10012_v52  ;;  %v7280_v28 = vpop.eup %7279  ;;  %v10023_v26 = vmul.f32 %v7278_v25, %v9431_v41 }
 0x543   :  { %v7282_v58 = vpop.eup %7281  ;;  %v3045_v49 = vmul.f32 1.442695, %v3025_v42  ;;  %v10030_v2 = vpop.xlane.xlu0 %3011  ;;  %v10033_v61 = vmul.f32 %v7280_v28, %v10941_v35  ;;  %v3480_v42 = vsub.f32 %v10947_v18, %v9964_v32 }
 0x544   :  { %v3968_v30 = vpop.xlane.xlu1 %3967  ;;  %10944 = vst [vmem:[#allocation22_spill] sm:$0xff] %v10023_v26  ;;  %v10036_v25 = vmul.f32 %v7282_v58, %v9459_v1 }
 0x545   :  { %v3995_v10 = vsub.f32 %v9666_v55, %v3968_v30  ;;  %v7284_v55 = vpop.eup %7283  ;;  %v10946_v30 = vld [vmem:[#allocation42_spill] sm:$0xff] }
 0x546   :  { %3089 = vadd.xlane.f32.xlu1 %v10020_v16  ;;  %3095 = vadd.xlane.f32.xlu0 %v10023_v26  ;;  %v10044_v28 = vmul.f32 %v7284_v55, %v9431_v41 }
 0x547   :  { %v4015_v52 = vmul.f32 1.442695, %v3995_v10  ;;  %v7286_v58 = vpop.eup %7285 }
 0x548   :  { %v4469_v22 = vpop.xlane.xlu1 %4468  ;;  %v10046_v26 = vpop.xlane.xlu0 %3464  ;;  %v10051_v32 = vmul.f32 %v7286_v58, %v9431_v41 }
 0x549   :  { %7289 = vpow2.f32 %v4015_v52  ;;  %v4496_v9 = vsub.f32 %v10946_v30, %v4469_v22  ;;  %v3502_v22 = vmul.f32 1.442695, %v3480_v42 }
 0x54a   :  { %3542 = vadd.xlane.f32.xlu1 %v10033_v61  ;;  %3546 = vadd.xlane.f32.xlu0 %v10036_v25  ;;  %7291 = vpow2.f32 %v3045_v49  ;;  %10948 = vst [vmem:[#allocation38_spill] sm:$0xff] %v10051_v32 }
 0x54b   :  { %v4516_v10 = vmul.f32 1.442695, %v4496_v9  ;;  %v7288_v9 = vpop.eup %7287 }
 0x54c   :  { %v3457_v6 = vpop.xlane.xlu1 %3456 }
 0x54d   :  { %7293 = vpow2.f32 %v4516_v10  ;;  %v3481_v52 = vsub.f32 %v9699_v23, %v3457_v6  ;;  %v10055_v18 = vpop.xlane.xlu0 %3981 }
 0x54e   :  { %3548 = vadd.xlane.f32.xlu1 %v10044_v28  ;;  %7295 = vpow2.f32 %v3051_v60  ;;  %v10058_v60 = vmul.f32 %v7288_v9, %v9431_v41 }
 0x54f   :  { %v3504_v54 = vmul.f32 1.442695, %v3481_v52 }
 0x550   :  { %v3974_v30 = vpop.xlane.xlu1 %3973  ;;  %10949 = vst [vmem:[#allocation24_spill] sm:$0xff] %v10058_v60 }
 0x551   :  { %7297 = vpow2.f32 %v3504_v54  ;;  %v3998_v49 = vsub.f32 %v9711_v43, %v3974_v30  ;;  %v10072_v9 = vpop.xlane.xlu0 %3462 }
 0x552   :  { %4065 = vadd.xlane.f32.xlu1 %v10051_v32  ;;  %7299 = vpow2.f32 %v3502_v22 }
 0x553   :  { %v7290_v55 = vpop.eup %7289  ;;  %v4021_v23 = vmul.f32 1.442695, %v3998_v49 }
 0x554   :  { %v4475_v10 = vpop.xlane.xlu1 %4474  ;;  %v10061_v42 = vmul.f32 %v7290_v55, %v9459_v1  ;;  %v7292_v6 = vpop.eup %7291 }
 0x555   :  { %7301 = vpow2.f32 %v4021_v23  ;;  %v4499_v58 = vsub.f32 %v9727_v45, %v4475_v10  ;;  %v10067_v54 = vmul.f32 %v7292_v6, %v9459_v1  ;;  %v10953_v10 = vld [vmem:[#allocation31_spill] sm:$0xff] }
 0x556   :  { %10950 = vst [vmem:[#allocation32_spill] sm:$0xff] %v10061_v42  ;;  %4566 = vadd.xlane.f32.xlu1 %v10058_v60  ;;  %4063 = vadd.xlane.f32.xlu0 %v10061_v42 }
 0x557   :  { %v7294_v43 = vpop.eup %7293  ;;  %v4522_v52 = vmul.f32 1.442695, %v4499_v58  ;;  %10951 = vst [vmem:[#allocation42_spill] sm:$0xff] %v10067_v54 }
 0x558   :  { %v3002_v22 = vpop.xlane.xlu1 %3001  ;;  %v10070_v41 = vmul.f32 %v7294_v43, %v9459_v1  ;;  %v7296_v30 = vpop.eup %7295 }
 0x559   :  { %7303 = vpow2.f32 %v4522_v52  ;;  %v3027_v49 = vsub.f32 %v9744_v31, %v3002_v22  ;;  %v10081_v6 = vmul.f32 %v7296_v30, %v10953_v10  ;;  %v10083_v43 = vpop.xlane.xlu0 %3979  ;;  %v10956_v52 = vld [vmem:[#allocation48_spill] sm:$0xff]  ;;  %v10957_v22 = vld [vmem:[#allocation35_spill] sm:$0xff] }
 0x55a   :  { %10952 = vst [vmem:[#allocation33_spill] sm:$0xff] %v10070_v41  ;;  %3093 = vadd.xlane.f32.xlu1 %v10067_v54  ;;  %4564 = vadd.xlane.f32.xlu0 %v10070_v41 }
 0x55b   :  { %v7298_v45 = vpop.eup %7297  ;;  %v3049_v55 = vmul.f32 1.442695, %v3027_v49  ;;  %10955 = vst [vmem:[#allocation60_spill] sm:$0xff] %v10081_v6  ;;  %v3030_v49 = vsub.f32 %v10957_v22, %v9970_v57  ;;  %v10961_v57 = vld [vmem:[#allocation36_spill] sm:$0xff] }
 0x55c   :  { %v3972_v23 = vpop.xlane.xlu1 %3971  ;;  %v10078_v58 = vmul.f32 %v7298_v45, %v10953_v10  ;;  %v7300_v1 = vpop.eup %7299 }
 0x55d   :  { %7305 = vpow2.f32 %v3049_v55  ;;  %v3997_v60 = vsub.f32 %v10956_v52, %v3972_v23  ;;  %v10094_v30 = vmul.f32 %v7300_v1, %v9499_v59  ;;  %v10960_v55 = vld [vmem:[#allocation49_spill] sm:$0xff] }
 0x55e   :  { %10954 = vst [vmem:[#allocation31_spill] sm:$0xff] %v10078_v58  ;;  %3552 = vadd.xlane.f32.xlu1 %v10078_v58  ;;  %3099 = vadd.xlane.f32.xlu0 %v10081_v6  ;;  %v3055_v6 = vmul.f32 1.442695, %v3030_v49 }
 0x55f   :  { %v7302_v31 = vpop.eup %7301  ;;  %v4019_v32 = vmul.f32 1.442695, %v3997_v60  ;;  %10959 = vst [vmem:[#allocation35_spill] sm:$0xff] %v10094_v30  ;;  %v3483_v60 = vsub.f32 %v10961_v57, %v9983_v4  ;;  %v10964_v4 = vld [vmem:[#allocation40_spill] sm:$0xff] }
 0x560   :  { %v4473_v45 = vpop.xlane.xlu1 %4472  ;;  %v10091_v42 = vmul.f32 %v7302_v31, %v10953_v10 }
 0x561   :  { %7307 = vpow2.f32 %v4019_v32  ;;  %v4498_v41 = vsub.f32 %v10960_v55, %v4473_v45  ;;  %v10097_v23 = vpop.xlane.xlu0 %3015  ;;  %v10962_v32 = vld [vmem:[#allocation51_spill] sm:$0xff]  ;;  %v10963_v45 = vld [vmem:[#allocation37_spill] sm:$0xff]  ;;  %v3508_v49 = vmul.f32 1.442695, %v3483_v60 }
 0x562   :  { %10958 = vst [vmem:[#allocation48_spill] sm:$0xff] %v10091_v42  ;;  %4069 = vadd.xlane.f32.xlu1 %v10091_v42  ;;  %3550 = vadd.xlane.f32.xlu0 %v10094_v30  ;;  %v4000_v55 = vsub.f32 %v10963_v45, %v9996_v19 }
 0x563   :  { %v7304_v52 = vpop.eup %7303  ;;  %v4520_v22 = vmul.f32 1.442695, %v4498_v41  ;;  %v3999_v41 = vsub.f32 %v10964_v4, %v10016_v33 }
 0x564   :  { %v4479_v31 = vpop.xlane.xlu1 %4478  ;;  %v10104_v58 = vmul.f32 %v7304_v52, %v10953_v10 }
 0x565   :  { %7309 = vpow2.f32 %v4520_v22  ;;  %v4501_v1 = vsub.f32 %v10962_v32, %v4479_v31  ;;  %v4025_v22 = vmul.f32 1.442695, %v4000_v55  ;;  %v10965_v31 = vld [vmem:[#allocation39_spill] sm:$0xff]  ;;  %v4023_v60 = vmul.f32 1.442695, %v3999_v41  ;;  %v10966_v41 = vld [vmem:[#allocation41_spill] sm:$0xff] }
 0x566   :  { %4570 = vadd.xlane.f32.xlu1 %v10104_v58  ;;  %v10110_v42 = vpop.xlane.xlu0 %3468  ;;  %7311 = vpow2.f32 %v3055_v6  ;;  %v3482_v6 = vsub.f32 %v10965_v31, %v10004_v29 }
 0x567   :  { %v7306_v30 = vpop.eup %7305  ;;  %v4526_v57 = vmul.f32 1.442695, %v4501_v1 }
 0x568   :  { %v3006_v54 = vpop.xlane.xlu1 %3005  ;;  %v10115_v10 = vmul.f32 %v7306_v30, %v9499_v59 }
 0x569   :  { %7313 = vpow2.f32 %v4526_v57  ;;  %v3029_v52 = vsub.f32 %v9798_v63, %v3006_v54  ;;  %v3506_v54 = vmul.f32 1.442695, %v3482_v6  ;;  %v3032_v57 = vsub.f32 %v10966_v41, %v10030_v2 }
 0x56a   :  { %3097 = vadd.xlane.f32.xlu1 %v10115_v10  ;;  %7315 = vpow2.f32 %v3508_v49 }
 0x56b   :  { %v7308_v19 = vpop.eup %7307  ;;  %v3053_v32 = vmul.f32 1.442695, %v3029_v52  ;;  %v10121_v45 = vpop.xlane.xlu0 %3985 }
 0x56c   :  { %v4477_v33 = vpop.xlane.xlu1 %4476  ;;  %v10124_v1 = vmul.f32 %v7308_v19, %v9499_v59  ;;  %v10967_v19 = vld [vmem:[#allocation45_spill] sm:$0xff] }
 0x56d   :  { %7317 = vpow2.f32 %v3053_v32  ;;  %v4500_v30 = vsub.f32 %v9818_v21, %v4477_v33  ;;  %v3484_v31 = vsub.f32 %v10967_v19, %v10072_v9 }
 0x56e   :  { %7319 = vpow2.f32 %v4025_v22  ;;  %4067 = vadd.xlane.f32.xlu0 %v10124_v1 }
 0x56f   :  { %v7310_v63 = vpop.eup %7309  ;;  %7321 = vpow2.f32 %v4023_v60  ;;  %v10134_v52 = vpop.xlane.xlu0 %3466  ;;  %v4524_v21 = vmul.f32 1.442695, %v4500_v30  ;;  %v3510_v30 = vmul.f32 1.442695, %v3484_v31  ;;  %v10972_v31 = vld [vmem:[#allocation44_spill] sm:$0xff] }
 0x570   :  { %v4483_v55 = vpop.xlane.xlu1 %4482  ;;  %v10129_v29 = vmul.f32 %v7310_v63, %v9499_v59  ;;  %v7312_v49 = vpop.eup %7311  ;;  %7323 = vpow2.f32 %v3506_v54  ;;  %v10968_v59 = vld [vmem:[#allocation34_spill] sm:$0xff]  ;;  %v3059_v63 = vmul.f32 1.442695, %v3032_v57 }
 0x571   :  { %v4503_v4 = vsub.f32 %v9835_v36, %v4483_v55  ;;  %v10143_v36 = vmul.f32 %v7312_v49, %v10968_v59  ;;  %v10970_v55 = vld [vmem:[#allocation43_spill] sm:$0xff] }
 0x572   :  { %4568 = vadd.xlane.f32.xlu0 %v10129_v29  ;;  %v3485_v54 = vsub.f32 %v10970_v55, %v10046_v26  ;;  %v4002_v55 = vsub.f32 %v10972_v31, %v10055_v18 }
 0x573   :  { %v7314_v22 = vpop.eup %7313  ;;  %v4530_v6 = vmul.f32 1.442695, %v4503_v4  ;;  %v10971_v4 = vld [vmem:[#allocation46_spill] sm:$0xff]  ;;  %v10152_v19 = vpop.xlane.xlu0 %3983 }
 0x574   :  { %v3010_v60 = vpop.xlane.xlu1 %3009  ;;  %v10140_v32 = vmul.f32 %v7314_v22, %v10968_v59  ;;  %v7316_v33 = vpop.eup %7315  ;;  %v4001_v41 = vsub.f32 %v10971_v4, %v10083_v43  ;;  %v4029_v18 = vmul.f32 1.442695, %v4002_v55  ;;  %v10974_v4 = vld [vmem:[#allocation50_spill] sm:$0xff] }
 0x575   :  { %7325 = vpow2.f32 %v4530_v6  ;;  %v3031_v2 = vsub.f32 %v9851_v40, %v3010_v60  ;;  %v10158_v26 = vmul.f32 %v7316_v33, %v10968_v59  ;;  %v3512_v60 = vmul.f32 1.442695, %v3485_v54 }
 0x576   :  { %10969 = vst [vmem:[#allocation49_spill] sm:$0xff] %v10140_v32  ;;  %4574 = vadd.xlane.f32.xlu1 %v10140_v32  ;;  %3103 = vadd.xlane.f32.xlu0 %v10143_v36  ;;  %7327 = vpow2.f32 %v4524_v21  ;;  %v4027_v43 = vmul.f32 1.442695, %v4001_v41 }
 0x577   :  { %v7318_v9 = vpop.eup %7317  ;;  %v3057_v49 = vmul.f32 1.442695, %v3031_v2 }
 0x578   :  { %v7320_v22 = vpop.eup %7319  ;;  %v4481_v6 = vpop.xlane.xlu1 %4480  ;;  %v10155_v40 = vmul.f32 %v7318_v9, %v9611_v62 }
 0x579   :  { %v7322_v57 = vpop.eup %7321  ;;  %7329 = vpow2.f32 %v3057_v49  ;;  %v4502_v21 = vsub.f32 %v9863_v51, %v4481_v6  ;;  %v3020_v2 = vpop.xlane.xlu0 %3019  ;;  %v10168_v33 = vmul.f32 %v7320_v22, %v10968_v59  ;;  %v3034_v49 = vsub.f32 %v10974_v4, %v10097_v23  ;;  %v10976_v23 = vld [vmem:[#allocation52_spill] sm:$0xff] }
 0x57a   :  { %7331 = vpow2.f32 %v3059_v63  ;;  %3101 = vadd.xlane.f32.xlu1 %v10155_v40  ;;  %3556 = vadd.xlane.f32.xlu0 %v10158_v26  ;;  %v10171_v63 = vmul.f32 %v7322_v57, %v9611_v62  ;;  %v7324_v54 = vpop.eup %7323  ;;  %v3487_v31 = vsub.f32 %v10976_v23, %v10110_v42 }
 0x57b   :  { %7333 = vpow2.f32 %v3510_v30  ;;  %10973 = vst [vmem:[#allocation36_spill] sm:$0xff] %v10168_v33  ;;  %v4528_v30 = vmul.f32 1.442695, %v4502_v21  ;;  %v10178_v59 = vmul.f32 %v7324_v54, %v9611_v62  ;;  %v3486_v21 = vsub.f32 %v9828_v37, %v10134_v52  ;;  %v10978_v52 = vld [vmem:[#allocation55_spill] sm:$0xff] }
 0x57c   :  { %v10165_v9 = vpop.xlane.xlu1 %4486  ;;  %7335 = vpow2.f32 %v3512_v60  ;;  %v3063_v60 = vmul.f32 1.442695, %v3034_v49  ;;  %v3516_v49 = vmul.f32 1.442695, %v3487_v31 }
 0x57d   :  { %7337 = vpow2.f32 %v4027_v43  ;;  %v3514_v37 = vmul.f32 1.442695, %v3486_v21 }
 0x57e   :  { %4073 = vadd.xlane.f32.xlu0 %v10168_v33  ;;  %4071 = vadd.xlane.f32.xlu1 %v10171_v63  ;;  %7339 = vpow2.f32 %v4029_v18  ;;  %v3473_v55 = vpop.xlane.xlu0 %3472  ;;  %v11006_v33 = vld [vmem:[#allocation14_spill] sm:$0xff] }
 0x57f   :  { %v7326_v51 = vpop.eup %7325  ;;  %7341 = vpow2.f32 %v4528_v30  ;;  %v4003_v30 = vsub.f32 %v10978_v52, %v10152_v19 }
 0x580   :  { %v3014_v41 = vpop.xlane.xlu1 %3013  ;;  %v10181_v22 = vmul.f32 %v7326_v51, %v9646_v56  ;;  %v7328_v6 = vpop.eup %7327  ;;  %7343 = vpow2.f32 %v3063_v60 }
 0x581   :  { %v3033_v57 = vsub.f32 %v9896_v8, %v3014_v41  ;;  %v10193_v8 = vmul.f32 %v7328_v6, %v9611_v62  ;;  %v10977_v41 = vld [vmem:[#allocation53_spill] sm:$0xff]  ;;  %v4031_v19 = vmul.f32 1.442695, %v4003_v30 }
 0x582   :  { %10975 = vst [vmem:[#allocation51_spill] sm:$0xff] %v10181_v22  ;;  %3554 = vadd.xlane.f32.xlu0 %v10178_v59  ;;  %4578 = vadd.xlane.f32.xlu1 %v10181_v22  ;;  %v4004_v23 = vsub.f32 %v10977_v41, %v10121_v45  ;;  %v3990_v6 = vpop.xlane.xlu0 %3989  ;;  %v3036_v41 = vsub.f32 %v9871_v48, %v3020_v2 }
 0x583   :  { %v7330_v43 = vpop.eup %7329  ;;  %v3061_v54 = vmul.f32 1.442695, %v3033_v57  ;;  %v4006_v21 = vsub.f32 %v9907_v24, %v3990_v6  ;;  %v3489_v48 = vsub.f32 %v9889_v13, %v3473_v55  ;;  %v10982_v13 = vld [vmem:[#allocation23_spill] sm:$0xff] }
 0x584   :  { %v7332_v4 = vpop.eup %7331  ;;  %v10190_v51 = vpop.xlane.xlu1 %4484  ;;  %v10196_v18 = vmul.f32 %v7330_v43, %v9693_v27  ;;  %v4033_v31 = vmul.f32 1.442695, %v4004_v23  ;;  %v3067_v23 = vmul.f32 1.442695, %v3036_v41  ;;  %v4492_v55 = vsub.f32 %v10982_v13, %v9916_v11  ;;  %v10984_v11 = vld [vmem:[#allocation54_spill] sm:$0xff] }
 0x585   :  { %v7334_v42 = vpop.eup %7333  ;;  %7345 = vpow2.f32 %v3061_v54  ;;  %v10207_v43 = vmul.f32 %v7332_v4, %v9646_v56  ;;  %v4037_v2 = vmul.f32 1.442695, %v4006_v21  ;;  %v3520_v41 = vmul.f32 1.442695, %v3489_v48 }
 0x586   :  { %4572 = vadd.xlane.f32.xlu0 %v10193_v8  ;;  %3105 = vadd.xlane.f32.xlu1 %v10196_v18  ;;  %v7336_v62 = vpop.eup %7335  ;;  %v10210_v60 = vmul.f32 %v7334_v42, %v9693_v27  ;;  %7347 = vpow2.f32 %v3516_v49 }
 0x587   :  { %v7338_v45 = vpop.eup %7337  ;;  %7349 = vpow2.f32 %v3514_v37  ;;  %v10217_v4 = vmul.f32 %v7336_v62, %v9646_v56 }
 0x588   :  { %v10204_v57 = vpop.xlane.xlu1 %4490  ;;  %v7340_v54 = vpop.eup %7339  ;;  %v10220_v42 = vmul.f32 %v7338_v45, %v9693_v27  ;;  %7351 = vpow2.f32 %v4033_v31 }
 0x589   :  { %v7342_v49 = vpop.eup %7341  ;;  %7353 = vpow2.f32 %v4031_v19  ;;  %v10229_v62 = vmul.f32 %v7340_v54, %v9646_v56  ;;  %v3471_v31 = vpop.xlane.xlu0 %3470  ;;  %v10983_v54 = vld [vmem:[#allocation47_spill] sm:$0xff] }
 0x58a   :  { %3107 = vadd.xlane.f32.xlu0 %v10207_v43  ;;  %3558 = vadd.xlane.f32.xlu1 %v10210_v60  ;;  %10979 = vst [vmem:[#allocation37_spill] sm:$0xff] %v10220_v42  ;;  %v7344_v24 = vpop.eup %7343  ;;  %v10232_v6 = vmul.f32 %v7342_v49, %v9693_v27  ;;  %7355 = vpow2.f32 %v3067_v23  ;;  %v3488_v19 = vsub.f32 %v9922_v38, %v3471_v31  ;;  %v10985_v23 = vld [vmem:[#allocation21_spill] sm:$0xff] }
 0x58b   :  { %10980 = vst [vmem:[#allocation40_spill] sm:$0xff] %v10229_v62  ;;  %7357 = vpow2.f32 %v4037_v2  ;;  %v4493_v48 = vsub.f32 %v10985_v23, %v10984_v11  ;;  %v4508_v2 = vmul.f32 1.442695, %v4492_v55  ;;  %v10986_v55 = vld [vmem:[#allocation56_spill] sm:$0xff] }
 0x58c   :  { %v3018_v52 = vpop.xlane.xlu1 %3017  ;;  %10981 = vst [vmem:[#allocation39_spill] sm:$0xff] %v10232_v6 }
 0x58d   :  { %v3035_v37 = vsub.f32 %v9937_v7, %v3018_v52  ;;  %v10243_v52 = vmul.f32 %v7344_v24, %v10983_v54 }
 0x58e   :  { %3560 = vadd.xlane.f32.xlu0 %v10217_v4  ;;  %4075 = vadd.xlane.f32.xlu1 %v10220_v42 }
 0x58f   :  { %v7346_v45 = vpop.eup %7345  ;;  %v3065_v56 = vmul.f32 1.442695, %v3035_v37  ;;  %v3518_v37 = vmul.f32 1.442695, %v3488_v19 }
 0x590   :  { %v10226_v30 = vpop.xlane.xlu1 %4488  ;;  %v7348_v7 = vpop.eup %7347  ;;  %v10240_v27 = vmul.f32 %v7346_v45, %v9809_v3 }
 0x591   :  { %v7350_v49 = vpop.eup %7349  ;;  %v10250_v45 = vmul.f32 %v7348_v7, %v10983_v54 }
 0x592   :  { %4077 = vadd.xlane.f32.xlu0 %v10229_v62  ;;  %4576 = vadd.xlane.f32.xlu1 %v10232_v6  ;;  %v7352_v38 = vpop.eup %7351  ;;  %v10253_v24 = vmul.f32 %v7350_v49, %v9809_v3  ;;  %v10999_v6 = vld [vmem:[#allocation12_spill] sm:$0xff] }
 0x593   :  { %v7354_v13 = vpop.eup %7353  ;;  %v7120_v32 = vunpack.i.h.bf16 %v10999_v6 }
 0x594   :  { %v3086_v21 = vpop.xlane.xlu1 %3085  ;;  %v7356_v19 = vpop.eup %7355  ;;  %v10263_v7 = vmul.f32 %v7354_v13, %v9809_v3 }
 0x595   :  { %7359 = vrcp.f32 %v3086_v21  ;;  %v4510_v21 = vmul.f32 1.442695, %v4493_v48  ;;  %v7358_v49 = vpop.eup %7357  ;;  %v10268_v48 = vmul.f32 %v7356_v19, %v9854_v20 }
 0x596   :  { %3109 = vadd.xlane.f32.xlu1 %v10240_v27  ;;  %3111 = vadd.xlane.f32.xlu0 %v10243_v52  ;;  %7361 = vpow2.f32 %v3520_v41  ;;  %v4505_v41 = vsub.f32 %v10986_v55, %v10165_v9  ;;  %10988 = vst [vmem:[#allocation45_spill] sm:$0xff] %v10263_v7  ;;  %v10271_v9 = vmul.f32 %v7358_v49, %v9854_v20 }
 0x597   :  { %7363 = vpow2.f32 %v3065_v56  ;;  %v10260_v56 = vmul.f32 %v7352_v38, %v10983_v54 }
 0x598   :  { %v3539_v31 = vpop.xlane.xlu1 %3538  ;;  %v4534_v11 = vmul.f32 1.442695, %v4505_v41  ;;  %10989 = vst [vmem:[#allocation34_spill] sm:$0xff] %v10271_v9 }
 0x599   :  { %7365 = vrcp.f32 %v3539_v31  ;;  %10987 = vst [vmem:[#allocation41_spill] sm:$0xff] %v10260_v56 }
 0x59a   :  { %3564 = vadd.xlane.f32.xlu0 %v10250_v45  ;;  %3562 = vadd.xlane.f32.xlu1 %v10253_v24  ;;  %7367 = vpow2.f32 %v4508_v2 }
 0x59b   :  { %7369 = vpow2.f32 %v3518_v37 }
 0x59c   :  { %7371 = vpow2.f32 %v4510_v21 }
 0x59d   :  { %7373 = vpow2.f32 %v4534_v11 }
 0x59e   :  { %4081 = vadd.xlane.f32.xlu0 %v10260_v56  ;;  %4079 = vadd.xlane.f32.xlu1 %v10263_v7  ;;  %v10998_v7 = vld [vmem:[#allocation8_spill] sm:$0xff] }
 0x59f   :  { %v7360_v23 = vpop.eup %7359 }
 0x5a0   :  { %v7362_v2 = vpop.eup %7361  ;;  %v3118_v38 = vmul.f32 %v7360_v23, %v9946_v34 }
 0x5a1   :  { %v7364_v37 = vpop.eup %7363  ;;  %v10278_v21 = vmul.f32 %v7362_v2, %v9854_v20 }
 0x5a2   :  { %3115 = vadd.xlane.f32.xlu0 %v10268_v48  ;;  %4085 = vadd.xlane.f32.xlu1 %v10271_v9  ;;  %v10281_v41 = vmul.f32 %v7364_v37, %v9899_v15  ;;  %v10993_v37 = vld [vmem:[#allocation5_spill] sm:$0xff]  ;;  %v10996_v9 = vld [vmem:[#allocation11_spill] sm:$0xff] }
 0x5a3   :  { %v7366_v31 = vpop.eup %7365  ;;  %6523 = vmatprep.mubr.f32.mxu0 %v3118_v38 }
 0x5a4   :  { %v3571_v13 = vmul.f32 %v7366_v31, %v9952_v5  ;;  %v7368_v55 = vpop.eup %7367 }
 0x5a5   :  { %v7370_v19 = vpop.eup %7369  ;;  %v10286_v34 = vmul.f32 %v7368_v55, %v9328_v12  ;;  %v3988_v12 = vpop.xlane.xlu0 %3987 }
 0x5a6   :  { %6579 = vmatprep.mubr.f32.mxu1 %v3571_v13  ;;  %3568 = vadd.xlane.f32.xlu0 %v10278_v21  ;;  %v7372_v49 = vpop.eup %7371  ;;  %v10289_v11 = vmul.f32 %v7370_v19, %v9899_v15  ;;  %v10994_v13 = vld [vmem:[#allocation9_spill] sm:$0xff] }
 0x5a7   :  { %3113 = vadd.xlane.f32.xlu1 %v10281_v41  ;;  %10990 = vst [vmem:[#allocation43_spill] sm:$0xff] %v10286_v34  ;;  %v10294_v5 = vmul.f32 %v7372_v49, %v9316_v46  ;;  %v7374_v23 = vpop.eup %7373  ;;  %v7100_v55 = vunpack.i.h.bf16 %v10994_v13  ;;  %v7099_v46 = vunpack.i.l.bf16 %v10994_v13  ;;  %v4005_v13 = vsub.f32 %v9932_v14, %v3988_v12  ;;  %v11001_v12 = vld [vmem:[#allocation18_spill] sm:$0xff] }
 0x5a8   :  { %v10298_v2 = vmul.f32 %v7374_v23, %v10983_v54  ;;  %v10995_v23 = vld [vmem:[#allocation10_spill] sm:$0xff] }
 0x5a9   :  { %10991 = vst [vmem:[#allocation46_spill] sm:$0xff] %v10294_v5  ;;  %v6983_v56 = vpack.c.bf16 %v7100_v55, %v7099_v46  ;;  %v7130_v55 = vunpack.i.h.bf16 %v11001_v12  ;;  %v7129_v46 = vunpack.i.l.bf16 %v11001_v12 }
 0x5aa   :  { %4556 = vadd.xlane.f32.xlu0 %v10286_v34  ;;  %10992 = vst [vmem:[#allocation44_spill] sm:$0xff] %v10298_v2  ;;  %v7104_v34 = vunpack.i.l.bf16 %v10995_v23 }
 0x5ab   :  { %3566 = vadd.xlane.f32.xlu1 %v10289_v11 }
 0x5ae   :  { %4558 = vadd.xlane.f32.xlu0 %v10294_v5 }
 0x5b2   :  { %4582 = vadd.xlane.f32.xlu0 %v10298_v2  ;;  %v7105_v2 = vunpack.i.h.bf16 %v10995_v23 }
 0x5b4   :  { %v10319_v23 = vpack.c.bf16 %v7105_v2, %v7104_v34  ;;  %v11003_v34 = vld [vmem:[#allocation17_spill] sm:$0xff] }
 0x5bb   :  { %v3088_v38 = vpop.xlane.xlu0 %3087 }
 0x5bc   :  { %7241 = vrot.lane.b32.xlu1 %v10993_v37, %s7575_s26  ;;  %7375 = vrcp.f32 %v3088_v38  ;;  %v7115_v37 = vunpack.i.h.bf16 %v10996_v9  ;;  %v7114_v38 = vunpack.i.l.bf16 %v10996_v9  ;;  %v7119_v9 = vunpack.i.l.bf16 %v10999_v6  ;;  %v11004_v6 = vld [vmem:[#allocation19_spill] sm:$0xff] }
 0x5bd   :  { %v7135_v2 = vunpack.i.h.bf16 %v11004_v6 }
 0x5be   :  { %v6987_v14 = vpack.c.bf16 %v7115_v37, %v7114_v38 }
 0x5bf   :  { %v3541_v31 = vpop.xlane.xlu0 %3540 }
 0x5c0   :  { %7377 = vrcp.f32 %v3541_v31  ;;  %v10997_v31 = vld [vmem:[#allocation6_spill] sm:$0xff] }
 0x5c3   :  { %v10305_v19 = vpop.xlane.xlu0 %4057 }
 0x5c6   :  { %v7376_v49 = vpop.eup %7375 }
 0x5c7   :  { %v10307_v5 = vpop.xlane.xlu1 %4055  ;;  %v3120_v54 = vmul.f32 %v7376_v49, %v9968_v47  ;;  %v3092_v62 = vpop.xlane.xlu0 %3091 }
 0x5c8   :  { %7246 = vrot.lane.b32.xlu0 %v10997_v31, %s7575_s26  ;;  %v11000_v31 = vld [vmem:[#allocation7_spill] sm:$0xff] }
 0x5c9   :  { %6524 = vmatmul.mubr.f32.vlgmr.msra.gmra.mrb[112].mxu0 %v3120_v54  ;;  %v4035_v54 = vmul.f32 1.442695, %v4005_v13 }
 0x5ca   :  { %v7378_v22 = vpop.eup %7377  ;;  %6982 = vmatpush3.bf16.msra.mxu0 %v10998_v7  ;;  %v4504_v7 = vsub.f32 %v9912_v0, %v10190_v51  ;;  %v11005_v0 = vld [vmem:[#allocation13_spill] sm:$0xff] }
 0x5cb   :  { %6984 = vmatprep.subr.bf16.mxu0 %v6983_v56  ;;  %v3545_v47 = vpop.xlane.xlu1 %3544  ;;  %v3573_v49 = vmul.f32 %v7378_v22, %v9977_v50  ;;  %v11002_v50 = vld [vmem:[#allocation28_spill] sm:$0xff]  ;;  %v7145_v51 = vunpack.i.h.bf16 %v11005_v0  ;;  %v7144_v13 = vunpack.i.l.bf16 %v11005_v0  ;;  %7379 = vpow2.f32 %v4035_v54 }
 0x5cc   :  { %7251 = vrot.lane.b32.xlu0 %v11000_v31, %s7575_s26  ;;  %v4494_v22 = vsub.f32 %v11002_v50, %v9955_v53  ;;  %v7134_v31 = vunpack.i.l.bf16 %v11004_v6  ;;  %v4532_v53 = vmul.f32 1.442695, %v4504_v7  ;;  %7381 = vrcp.f32 %v3092_v62  ;;  %v11008_v7 = vld [vmem:[#allocation58_spill] sm:$0xff] }
 0x5cd   :  { %6580 = vmatmul.mubr.f32.vlgmr.msra.gmra.mrb[98].mxu1 %v3573_v49  ;;  %v10341_v49 = vpack.c.bf16 %v7120_v32, %v7119_v9  ;;  %v7150_v0 = vunpack.i.h.bf16 %v11006_v33  ;;  %v7149_v32 = vunpack.i.l.bf16 %v11006_v33  ;;  %v6995_v9 = vpack.c.bf16 %v7145_v51, %v7144_v13  ;;  %v11010_v13 = vld [vmem:[#allocation59_spill] sm:$0xff] }
 0x5ce   :  { %6986 = vmatpush3.bf16.msra.mxu0 %v6983_v56  ;;  %7051 = vmatpush3.bf16.msra.mxu1 %v11003_v34  ;;  %v6991_v56 = vpack.c.bf16 %v7130_v55, %v7129_v46  ;;  %v4512_v12 = vmul.f32 1.442695, %v4494_v22  ;;  %v10344_v50 = vpack.c.bf16 %v7135_v2, %v7134_v31  ;;  %v11007_v55 = vld [vmem:[#allocation15_spill] sm:$0xff]  ;;  %v4506_v62 = vsub.f32 %v11008_v7, %v10226_v30  ;;  %v11009_v2 = vld [vmem:[#allocation16_spill] sm:$0xff] }
 0x5cf   :  { %6988 = vmatprep.subr.bf16.mxu0 %v6987_v14  ;;  %7044 = vmatprep.subr.bf16.mxu1 %v10319_v23  ;;  %v10335_v37 = vpop.xlane.xlu1 %4061  ;;  %v10337_v38 = vpop.xlane.xlu0 %4059  ;;  %v7160_v46 = vunpack.i.h.bf16 %v11007_v55  ;;  %v10357_v22 = vpack.c.bf16 %v7150_v0, %v7149_v32  ;;  %v7170_v31 = vunpack.i.h.bf16 %v11009_v2  ;;  %v7169_v51 = vunpack.i.l.bf16 %v11009_v2  ;;  %v11012_v0 = vld [vmem:[#allocation20_spill] sm:$0xff] }
 0x5d0   :  { %v7180_v32 = vunpack.i.h.bf16 %v11012_v0 }
 0x5d2   :  { %6990 = vmatpush3.bf16.msra.mxu0 %v6987_v14  ;;  %7052 = vmatpush3.bf16.msra.mxu1 %v10319_v23  ;;  %v7159_v14 = vunpack.i.l.bf16 %v11007_v55  ;;  %v7003_v55 = vpack.c.bf16 %v7170_v31, %v7169_v51 }
 0x5d3   :  { %6992 = vmatprep.subr.bf16.mxu0 %v6991_v56  ;;  %7045 = vmatprep.subr.bf16.mxu1 %v10341_v49  ;;  %v3090_v6 = vpop.xlane.xlu1 %3089  ;;  %v10347_v42 = vpop.xlane.xlu0 %3095 }
 0x5d4   :  { %7383 = vrcp.f32 %v3090_v6 }
 0x5d5   :  { %7385 = vpow2.f32 %v4532_v53  ;;  %v11011_v53 = vld [vmem:[#allocation25_spill] sm:$0xff] }
 0x5d6   :  { %7387 = vpow2.f32 %v4512_v12  ;;  %6994 = vmatpush3.bf16.msra.mxu0 %v6991_v56  ;;  %7053 = vmatpush3.bf16.msra.mxu1 %v10341_v49  ;;  %v4495_v30 = vsub.f32 %v11011_v53, %v11010_v13  ;;  %v4536_v12 = vmul.f32 1.442695, %v4506_v62  ;;  %v6999_v56 = vpack.c.bf16 %v7160_v46, %v7159_v14  ;;  %v11013_v62 = vld [vmem:[#allocation57_spill] sm:$0xff] }
 0x5d7   :  { %7389 = vrcp.f32 %v3545_v47  ;;  %6996 = vmatprep.subr.bf16.mxu0 %v6995_v9  ;;  %7046 = vmatprep.subr.bf16.mxu1 %v10344_v50  ;;  %v3543_v54 = vpop.xlane.xlu1 %3542  ;;  %v3547_v33 = vpop.xlane.xlu0 %3546 }
 0x5d8   :  { %7391 = vrcp.f32 %v3543_v54  ;;  %v7380_v47 = vpop.eup %7379  ;;  %v7179_v54 = vunpack.i.l.bf16 %v11012_v0  ;;  %v4514_v2 = vmul.f32 1.442695, %v4495_v30 }
 0x5d9   :  { %7393 = vrcp.f32 %v3547_v33  ;;  %v7382_v7 = vpop.eup %7381  ;;  %v4507_v33 = vsub.f32 %v11013_v62, %v10204_v57  ;;  %v10371_v46 = vmul.f32 %v7380_v47, %v9899_v15 }
 0x5da   :  { %6998 = vmatpush3.bf16.msra.mxu0 %v6995_v9  ;;  %7054 = vmatpush3.bf16.msra.mxu1 %v10344_v50  ;;  %v3124_v30 = vmul.f32 %v7382_v7, %v9994_v39 }
 0x5db   :  { %7000 = vmatprep.subr.bf16.mxu0 %v6999_v56  ;;  %7047 = vmatprep.subr.bf16.mxu1 %v10357_v22  ;;  %v3549_v6 = vpop.xlane.xlu1 %3548  ;;  %v4538_v57 = vmul.f32 1.442695, %v4507_v33 }
 0x5dc   :  { %7395 = vrcp.f32 %v3549_v6 }
 0x5dd   :  { %7397 = vpow2.f32 %v4536_v12  ;;  %v7007_v12 = vpack.c.bf16 %v7180_v32, %v7179_v54 }
 0x5de   :  { %v7384_v9 = vpop.eup %7383  ;;  %7002 = vmatpush3.bf16.msra.mxu0 %v6999_v56  ;;  %7055 = vmatpush3.bf16.msra.mxu1 %v10357_v22  ;;  %7399 = vpow2.f32 %v4514_v2 }
 0x5df   :  { %v7386_v14 = vpop.eup %7385  ;;  %7004 = vmatprep.subr.bf16.mxu0 %v7003_v55  ;;  %v10373_v13 = vpop.xlane.xlu1 %4065  ;;  %v3122_v31 = vmul.f32 %v7384_v9, %v10020_v16  ;;  %7401 = vpow2.f32 %v4538_v57  ;;  %v11014_v57 = vld [vmem:[#allocation42_spill] sm:$0xff] }
 0x5e0   :  { %v7388_v51 = vpop.eup %7387  ;;  %4083 = vadd.xlane.f32.xlu1 %v10371_v46  ;;  %v10379_v47 = vmul.f32 %v7386_v14, %v9809_v3  ;;  %7403 = vrcp.f32 %v10347_v42 }
 0x5e1   :  { %v7390_v53 = vpop.eup %7389  ;;  %6526 = vmatprep.mubr.f32.mxu0 %v3122_v31  ;;  %v10390_v3 = vmul.f32 %v7388_v51, %v10941_v35 }
 0x5e2   :  { %v7392_v56 = vpop.eup %7391  ;;  %7006 = vmatpush3.bf16.msra.mxu0 %v7003_v55  ;;  %v3577_v2 = vmul.f32 %v7390_v53, %v10002_v44 }
 0x5e3   :  { %v7394_v6 = vpop.eup %7393  ;;  %6527 = vmatmul.mubr.f32.gmra.mrb[114].mxu0 %v3124_v30  ;;  %7008 = vmatprep.subr.bf16.mxu0 %v7007_v12  ;;  %v10381_v0 = vpop.xlane.xlu1 %4566  ;;  %v3575_v62 = vmul.f32 %v7392_v56, %v10033_v61 }
 0x5e4   :  { %v10383_v16 = vpop.xlane.xlu0 %4063  ;;  %4580 = vadd.xlane.f32.xlu1 %v10379_v47  ;;  %v3579_v39 = vmul.f32 %v7394_v6, %v10036_v25 }
 0x5e5   :  { %6582 = vmatprep.mubr.f32.mxu1 %v3575_v62 }
 0x5e6   :  { %v7396_v32 = vpop.eup %7395  ;;  %7010 = vmatpush3.bf16.msra.mxu0 %v7007_v12  ;;  %6583 = vmatmul.mubr.f32.gmra.mrb[100].mxu1 %v3577_v2 }
 0x5e7   :  { %v7398_v55 = vpop.eup %7397  ;;  %7012 = vmatprep.subr.bf16.mxu0 %v11003_v34  ;;  %v3094_v61 = vpop.xlane.xlu1 %3093  ;;  %6585 = vmatprep.mubr.f32.mxu1 %v3579_v39  ;;  %v3581_v44 = vmul.f32 %v7396_v32, %v10044_v28  ;;  %v11016_v39 = vld [vmem:[#allocation35_spill] sm:$0xff] }
 0x5e8   :  { %v10394_v7 = vpop.xlane.xlu0 %4564  ;;  %7405 = vrcp.f32 %v3094_v61  ;;  %4560 = vadd.xlane.f32.xlu1 %v10390_v3  ;;  %v10399_v25 = vmul.f32 %v7398_v55, %v9899_v15  ;;  %v7400_v35 = vpop.eup %7399  ;;  %v11017_v32 = vld [vmem:[#allocation31_spill] sm:$0xff] }
 0x5e9   :  { %v10403_v42 = vmul.f32 %v7400_v35, %v10939_v17  ;;  %v7402_v9 = vpop.eup %7401  ;;  %v11015_v17 = vld [vmem:[#allocation22_spill] sm:$0xff] }
 0x5ea   :  { %6586 = vmatmul.mubr.f32.gmra.mrb[102].mxu1 %v3581_v44  ;;  %v7404_v28 = vpop.eup %7403  ;;  %v10409_v15 = vmul.f32 %v7402_v9, %v9854_v20 }
 0x5eb   :  { %v3553_v54 = vpop.xlane.xlu1 %3552  ;;  %v3128_v12 = vmul.f32 %v7404_v28, %v11015_v17 }
 0x5ec   :  { %v3100_v33 = vpop.xlane.xlu0 %3099  ;;  %4584 = vadd.xlane.f32.xlu1 %v10399_v25  ;;  %7407 = vrcp.f32 %v3553_v54 }
 0x5ef   :  { %v10405_v14 = vpop.xlane.xlu1 %4069 }
 0x5f0   :  { %v3551_v31 = vpop.xlane.xlu0 %3550  ;;  %4562 = vadd.xlane.f32.xlu1 %v10403_v42 }
 0x5f1   :  { %7409 = vrcp.f32 %v3551_v31  ;;  %v11018_v31 = vld [vmem:[#allocation60_spill] sm:$0xff] }
 0x5f2   :  { %v7406_v51 = vpop.eup %7405  ;;  %7411 = vrcp.f32 %v3100_v33 }
 0x5f3   :  { %v10411_v53 = vpop.xlane.xlu1 %4570  ;;  %v3126_v30 = vmul.f32 %v7406_v51, %v11014_v57 }
 0x5f4   :  { %4586 = vadd.xlane.f32.xlu1 %v10409_v15 }
 0x5f5   :  { %6529 = vmatprep.mubr.f32.mxu0 %v3126_v30 }
 0x5f6   :  { %6530 = vmatmul.mubr.f32.gmra.mrb[116].mxu0 %v3128_v12  ;;  %v7408_v6 = vpop.eup %7407 }
 0x5f7   :  { %v3098_v56 = vpop.xlane.xlu1 %3097  ;;  %v3585_v55 = vmul.f32 %v7408_v6, %v11017_v32 }
 0x5f8   :  { %7413 = vrcp.f32 %v3098_v56 }
 0x5fb   :  { %v7410_v62 = vpop.eup %7409  ;;  %v10416_v2 = vpop.xlane.xlu0 %4067 }
 0x5fc   :  { %v3583_v20 = vmul.f32 %v7410_v62, %v11016_v39  ;;  %v7412_v44 = vpop.eup %7411 }
 0x5fd   :  { %v3132_v28 = vmul.f32 %v7412_v44, %v11018_v31 }
 0x5fe   :  { %6588 = vmatprep.mubr.f32.mxu1 %v3583_v20 }
 0x5ff   :  { %6589 = vmatmul.mubr.f32.gmra.mrb[104].mxu1 %v3585_v55  ;;  %v10420_v61 = vpop.xlane.xlu0 %4568 }
 0x602   :  { %v7414_v35 = vpop.eup %7413 }
 0x603   :  { %v10422_v54 = vpop.xlane.xlu1 %4574  ;;  %v3104_v9 = vpop.xlane.xlu0 %3103  ;;  %v3130_v33 = vmul.f32 %v7414_v35, %v10115_v10 }
 0x604   :  { %7415 = vrcp.f32 %v3104_v9 }
 0x605   :  { %6532 = vmatprep.mubr.f32.mxu0 %v3130_v33 }
 0x606   :  { %6533 = vmatmul.mubr.f32.gmra.mrb[118].mxu0 %v3132_v28 }
 0x607   :  { %v3102_v51 = vpop.xlane.xlu1 %3101  ;;  %v3557_v57 = vpop.xlane.xlu0 %3556 }
 0x608   :  { %7417 = vrcp.f32 %v3102_v51 }
 0x609   :  { %7419 = vrcp.f32 %v3557_v57 }
 0x60b   :  { %v10426_v30 = vpop.xlane.xlu1 %4071  ;;  %v10428_v17 = vpop.xlane.xlu0 %4073 }
 0x60e   :  { %v7416_v6 = vpop.eup %7415 }
 0x60f   :  { %v10430_v12 = vpop.xlane.xlu1 %4578  ;;  %v3555_v56 = vpop.xlane.xlu0 %3554  ;;  %v3136_v32 = vmul.f32 %v7416_v6, %v10143_v36 }
 0x610   :  { %7421 = vrcp.f32 %v3555_v56 }
 0x612   :  { %v7418_v62 = vpop.eup %7417 }
 0x613   :  { %v3106_v10 = vpop.xlane.xlu1 %3105  ;;  %v10432_v39 = vpop.xlane.xlu0 %4572  ;;  %v3134_v20 = vmul.f32 %v7418_v62, %v10155_v40 }
 0x614   :  { %7423 = vrcp.f32 %v3106_v10  ;;  %v7420_v35 = vpop.eup %7419 }
 0x615   :  { %6535 = vmatprep.mubr.f32.mxu0 %v3134_v20  ;;  %v3589_v51 = vmul.f32 %v7420_v35, %v10158_v26 }
 0x616   :  { %6536 = vmatmul.mubr.f32.gmra.mrb[120].mxu0 %v3136_v32 }
 0x617   :  { %v3559_v55 = vpop.xlane.xlu1 %3558  ;;  %v3108_v44 = vpop.xlane.xlu0 %3107 }
 0x618   :  { %7425 = vrcp.f32 %v3559_v55 }
 0x619   :  { %7427 = vrcp.f32 %v3108_v44 }
 0x61a   :  { %v7422_v9 = vpop.eup %7421 }
 0x61b   :  { %v10436_v33 = vpop.xlane.xlu1 %4075  ;;  %v3561_v31 = vpop.xlane.xlu0 %3560  ;;  %v3587_v28 = vmul.f32 %v7422_v9, %v10178_v59 }
 0x61c   :  { %7429 = vrcp.f32 %v3561_v31 }
 0x61d   :  { %6591 = vmatprep.mubr.f32.mxu1 %v3587_v28 }
 0x61e   :  { %v7424_v40 = vpop.eup %7423  ;;  %6592 = vmatmul.mubr.f32.gmra.mrb[106].mxu1 %v3589_v51 }
 0x61f   :  { %v10440_v36 = vpop.xlane.xlu1 %4576  ;;  %v10442_v57 = vpop.xlane.xlu0 %4077  ;;  %v3138_v56 = vmul.f32 %v7424_v40, %v10196_v18 }
 0x621   :  { %6538 = vmatprep.mubr.f32.mxu0 %v3138_v56 }
 0x622   :  { %v7426_v6 = vpop.eup %7425 }
 0x623   :  { %v7428_v62 = vpop.eup %7427  ;;  %v3110_v10 = vpop.xlane.xlu1 %3109  ;;  %v3591_v32 = vmul.f32 %v7426_v6, %v10210_v60 }
 0x624   :  { %v3112_v20 = vpop.xlane.xlu0 %3111  ;;  %7431 = vrcp.f32 %v3110_v10  ;;  %v3140_v59 = vmul.f32 %v7428_v62, %v10207_v43 }
 0x625   :  { %7433 = vrcp.f32 %v3112_v20  ;;  %6594 = vmatprep.mubr.f32.mxu1 %v3591_v32 }
 0x626   :  { %6539 = vmatmul.mubr.f32.gmra.mrb[122].mxu0 %v3140_v59  ;;  %v7430_v26 = vpop.eup %7429 }
 0x627   :  { %v3563_v55 = vpop.xlane.xlu1 %3562  ;;  %v3593_v35 = vmul.f32 %v7430_v26, %v10217_v4 }
 0x628   :  { %v3565_v44 = vpop.xlane.xlu0 %3564  ;;  %7435 = vrcp.f32 %v3563_v55 }
 0x629   :  { %7437 = vrcp.f32 %v3565_v44  ;;  %6595 = vmatmul.mubr.f32.gmra.mrb[108].mxu1 %v3593_v35 }
 0x62a   :  { %7439 = vrcp.f32 %v10307_v5 }
 0x62b   :  { %v10448_v18 = vpop.xlane.xlu1 %4079 }
 0x62c   :  { %v10450_v9 = vpop.xlane.xlu0 %4081 }
 0x62e   :  { %v7432_v31 = vpop.eup %7431 }
 0x62f   :  { %v7434_v60 = vpop.eup %7433  ;;  %v10452_v28 = vpop.xlane.xlu1 %4085  ;;  %v3142_v51 = vmul.f32 %v7432_v31, %v10240_v27  ;;  %v11019_v31 = vld [vmem:[#allocation29_spill] sm:$0xff] }
 0x630   :  { %v3116_v43 = vpop.xlane.xlu0 %3115  ;;  %v3144_v40 = vmul.f32 %v7434_v60, %v10243_v52 }
 0x631   :  { %6541 = vmatprep.mubr.f32.mxu0 %v3142_v51  ;;  %7441 = vrcp.f32 %v3116_v43 }
 0x632   :  { %v7436_v56 = vpop.eup %7435  ;;  %6542 = vmatmul.mubr.f32.gmra.mrb[124].mxu0 %v3144_v40  ;;  %v11020_v40 = vld [vmem:[#allocation26_spill] sm:$0xff] }
 0x633   :  { %v7438_v6 = vpop.eup %7437  ;;  %v3595_v62 = vmul.f32 %v7436_v56, %v10253_v24 }
 0x634   :  { %v3569_v4 = vpop.xlane.xlu0 %3568  ;;  %v3114_v10 = vpop.xlane.xlu1 %3113  ;;  %v3597_v20 = vmul.f32 %v7438_v6, %v10250_v45 }
 0x635   :  { %7443 = vrcp.f32 %v3114_v10  ;;  %6597 = vmatprep.mubr.f32.mxu1 %v3595_v62  ;;  %v7440_v45 = vpop.eup %7439  ;;  %v11022_v10 = vld [vmem:[#allocation33_spill] sm:$0xff] }
 0x636   :  { %7445 = vrcp.f32 %v10305_v19  ;;  %6598 = vmatmul.mubr.f32.gmra.mrb[110].mxu1 %v3597_v20  ;;  %v4088_v60 = vmul.f32 %v7440_v45, %v11019_v31 }
 0x637   :  { %7447 = vrcp.f32 %v10337_v38 }
 0x638   :  { %v10461_v27 = vpop.xlane.xlu0 %4556  ;;  %7449 = vrcp.f32 %v3569_v4  ;;  %v3567_v52 = vpop.xlane.xlu1 %3566  ;;  %v11021_v4 = vld [vmem:[#allocation27_spill] sm:$0xff] }
 0x639   :  { %7451 = vrcp.f32 %v3567_v52 }
 0x63a   :  { %7453 = vrcp.f32 %v10394_v7 }
 0x63b   :  { %7455 = vrcp.f32 %v10335_v37  ;;  %v7442_v59 = vpop.eup %7441 }
 0x63c   :  { %v10464_v5 = vpop.xlane.xlu0 %4558  ;;  %v7242_v24 = vpop.permute.xlu1 %7241  ;;  %7457 = vrcp.f32 %v10383_v16  ;;  %v3148_v37 = vmul.f32 %v7442_v59, %v10268_v48 }
 0x63d   :  { %v7244_v32 = vunpack.i.h.bf16 %v7242_v24  ;;  %v7243_v19 = vunpack.i.l.bf16 %v7242_v24  ;;  %7459 = vrcp.f32 %v10373_v13 }
 0x63e   :  { %7461 = vrcp.f32 %v10416_v2 }
 0x63f   :  { %v7444_v26 = vpop.eup %7443  ;;  %v10468_v38 = vpack.c.bf16 %v7244_v32, %v7243_v19  ;;  %7463 = vrcp.f32 %v10381_v0 }
 0x640   :  { %v10470_v55 = vpop.xlane.xlu0 %4582  ;;  %v7446_v44 = vpop.eup %7445  ;;  %v3146_v7 = vmul.f32 %v7444_v26, %v10281_v41  ;;  %7465 = vrcp.f32 %v10405_v14 }
 0x641   :  { %v7448_v35 = vpop.eup %7447  ;;  %7048 = vmatprep.subr.bf16.mxu1 %v10468_v38  ;;  %7467 = vrcp.f32 %v10420_v61  ;;  %v4090_v56 = vmul.f32 %v7446_v44, %v11020_v40 }
 0x642   :  { %v7450_v16 = vpop.eup %7449  ;;  %6544 = vmatprep.mubr.f32.mxu0 %v3146_v7  ;;  %7056 = vmatpush3.bf16.msra.mxu1 %v10468_v38  ;;  %7469 = vrcp.f32 %v10426_v30  ;;  %v4092_v62 = vmul.f32 %v7448_v35, %v11021_v4 }
 0x643   :  { %v7452_v43 = vpop.eup %7451  ;;  %6545 = vmatmul.mubr.f32.gmra.mrb[126].mxu0 %v3148_v37  ;;  %v3601_v0 = vmul.f32 %v7450_v16, %v10278_v21  ;;  %7471 = vrcp.f32 %v10411_v53  ;;  %v11023_v53 = vld [vmem:[#allocation30_spill] sm:$0xff] }
 0x644   :  { %v7247_v41 = vpop.permute.xlu0 %7246  ;;  %v7454_v13 = vpop.eup %7453  ;;  %6635 = vmatprep.mubr.f32.mxu0 %v4088_v60  ;;  %v3599_v48 = vmul.f32 %v7452_v43, %v10289_v11  ;;  %7473 = vrcp.f32 %v10428_v17  ;;  %v11028_v60 = vld [vmem:[#allocation36_spill] sm:$0xff] }
 0x645   :  { %v7249_v2 = vunpack.i.h.bf16 %v7247_v41  ;;  %v7248_v51 = vunpack.i.l.bf16 %v7247_v41  ;;  %v7456_v6 = vpop.eup %7455  ;;  %v4597_v30 = vmul.f32 %v7454_v13, %v11022_v10  ;;  %7475 = vrcp.f32 %v10432_v39  ;;  %v11024_v39 = vld [vmem:[#allocation32_spill] sm:$0xff]  ;;  %v11029_v13 = vld [vmem:[#allocation37_spill] sm:$0xff] }
 0x646   :  { %6600 = vmatprep.mubr.f32.mxu1 %v3599_v48  ;;  %v7458_v61 = vpop.eup %7457  ;;  %7477 = vrcp.f32 %v10436_v33  ;;  %v4094_v52 = vmul.f32 %v7456_v6, %v11023_v53  ;;  %v11031_v48 = vld [vmem:[#allocation39_spill] sm:$0xff]  ;;  %v11033_v6 = vld [vmem:[#allocation45_spill] sm:$0xff] }
 0x647   :  { %v10487_v14 = vpack.c.bf16 %v7249_v2, %v7248_v51  ;;  %6601 = vmatmul.mubr.f32.gmra.mrb[112].mxu1 %v3601_v0  ;;  %6636 = vmatmul.mubr.f32.vlgmr.msra.gmra.mrb[128].mxu0 %v4090_v56  ;;  %v7460_v17 = vpop.eup %7459  ;;  %7479 = vrcp.f32 %v10422_v54  ;;  %v4096_v45 = vmul.f32 %v7458_v61, %v11024_v39  ;;  %v11025_v54 = vld [vmem:[#allocation38_spill] sm:$0xff]  ;;  %v11035_v61 = vld [vmem:[#allocation41_spill] sm:$0xff]  ;;  %v11037_v39 = vld [vmem:[#allocation43_spill] sm:$0xff] }
 0x648   :  { %v7252_v11 = vpop.permute.xlu0 %7251  ;;  %7014 = vmatpush3.bf16.msra.mxu0 %v11003_v34  ;;  %6638 = vmatprep.mubr.f32.mxu0 %v4092_v62  ;;  %v7462_v34 = vpop.eup %7461  ;;  %7481 = vrcp.f32 %v10440_v36  ;;  %v4098_v19 = vmul.f32 %v7460_v17, %v11025_v54  ;;  %v11039_v54 = vld [vmem:[#allocation44_spill] sm:$0xff] }
 0x649   :  { %v7254_v21 = vunpack.i.h.bf16 %v7252_v11  ;;  %v7253_v20 = vunpack.i.l.bf16 %v7252_v11  ;;  %7016 = vmatprep.subr.bf16.mxu0 %v10319_v23  ;;  %6697 = vmatprep.mubr.f32.mxu1 %v4597_v30  ;;  %v7464_v33 = vpop.eup %7463  ;;  %7483 = vrcp.f32 %v10442_v57  ;;  %v4100_v36 = vmul.f32 %v7462_v34, %v10124_v1  ;;  %v11026_v57 = vld [vmem:[#allocation24_spill] sm:$0xff] }
 0x64a   :  { %7049 = vmatprep.subr.bf16.mxu1 %v10487_v14  ;;  %v7466_v32 = vpop.eup %7465  ;;  %7485 = vrcp.f32 %v10448_v18  ;;  %v4599_v18 = vmul.f32 %v7464_v33, %v11026_v57  ;;  %v11027_v1 = vld [vmem:[#allocation48_spill] sm:$0xff]  ;;  %v11038_v33 = vld [vmem:[#allocation46_spill] sm:$0xff] }
 0x64b   :  { %v10498_v24 = vpack.c.bf16 %v7254_v21, %v7253_v20  ;;  %7057 = vmatpush3.bf16.msra.mxu1 %v10487_v14  ;;  %6639 = vmatmul.mubr.f32.gmra.mrb[130].mxu0 %v4094_v52  ;;  %v7468_v59 = vpop.eup %7467  ;;  %7487 = vrcp.f32 %v10430_v12  ;;  %v4102_v35 = vmul.f32 %v7466_v32, %v11027_v1 }
 0x64c   :  { %7018 = vmatpush3.bf16.msra.mxu0 %v10319_v23  ;;  %6641 = vmatprep.mubr.f32.mxu0 %v4096_v45  ;;  %v7470_v26 = vpop.eup %7469  ;;  %7489 = vrcp.f32 %v10450_v9  ;;  %v4601_v7 = vmul.f32 %v7468_v59, %v10129_v29 }
 0x64d   :  { %7020 = vmatprep.subr.bf16.mxu0 %v10341_v49  ;;  %7050 = vmatprep.subr.bf16.mxu1 %v10498_v24  ;;  %v7472_v23 = vpop.eup %7471  ;;  %v4104_v12 = vmul.f32 %v7470_v26, %v10171_v63  ;;  %7491 = vrcp.f32 %v10452_v28  ;;  %v11036_v28 = vld [vmem:[#allocation34_spill] sm:$0xff] }
 0x64e   :  { %v7474_v44 = vpop.eup %7473  ;;  %7493 = vrcp.f32 %v10461_v27 }
 0x64f   :  { %7058 = vmatpush3.bf16.msra.mxu1 %v10498_v24  ;;  %6642 = vmatmul.mubr.f32.gmra.mrb[132].mxu0 %v4098_v19  ;;  %v7476_v37 = vpop.eup %7475  ;;  %v4106_v43 = vmul.f32 %v7474_v44, %v11028_v60 }
 0x650   :  { %7022 = vmatpush3.bf16.msra.mxu0 %v10341_v49  ;;  %6644 = vmatprep.mubr.f32.mxu0 %v4100_v36  ;;  %v7478_v16 = vpop.eup %7477  ;;  %v4603_v49 = vmul.f32 %v7472_v23, %v10104_v58  ;;  %v4605_v29 = vmul.f32 %v7476_v37, %v10193_v8  ;;  %v11032_v8 = vld [vmem:[#allocation40_spill] sm:$0xff] }
 0x651   :  { %7024 = vmatprep.subr.bf16.mxu0 %v10344_v50  ;;  %v7480_v9 = vpop.eup %7479  ;;  %v4108_v63 = vmul.f32 %v7478_v16, %v11029_v13 }
 0x652   :  { %6698 = vmatmul.mubr.f32.vlgmr.msra.gmra.mrb[114].mxu1 %v4599_v18  ;;  %v7482_v31 = vpop.eup %7481 }
 0x653   :  { %6700 = vmatprep.mubr.f32.mxu1 %v4601_v7  ;;  %6645 = vmatmul.mubr.f32.gmra.mrb[134].mxu0 %v4102_v35  ;;  %v7484_v41 = vpop.eup %7483  ;;  %v4609_v0 = vmul.f32 %v7482_v31, %v11031_v48 }
 0x654   :  { %7026 = vmatpush3.bf16.msra.mxu0 %v10344_v50  ;;  %6647 = vmatprep.mubr.f32.mxu0 %v4104_v12  ;;  %v7486_v2 = vpop.eup %7485  ;;  %v11030_v50 = vld [vmem:[#allocation49_spill] sm:$0xff]  ;;  %v4110_v40 = vmul.f32 %v7484_v41, %v11032_v8 }
 0x655   :  { %7028 = vmatprep.subr.bf16.mxu0 %v10357_v22  ;;  %v4607_v51 = vmul.f32 %v7480_v9, %v11030_v50  ;;  %v7488_v58 = vpop.eup %7487  ;;  %v4112_v4 = vmul.f32 %v7486_v2, %v11033_v6 }
 0x656   :  { %6701 = vmatmul.mubr.f32.gmra.mrb[116].mxu1 %v4603_v49  ;;  %v7490_v56 = vpop.eup %7489 }
 0x657   :  { %6703 = vmatprep.mubr.f32.mxu1 %v4605_v29  ;;  %6648 = vmatmul.mubr.f32.gmra.mrb[136].mxu0 %v4106_v43  ;;  %v4114_v11 = vmul.f32 %v7490_v56, %v11035_v61  ;;  %v7492_v21 = vpop.eup %7491 }
 0x658   :  { %7030 = vmatpush3.bf16.msra.mxu0 %v10357_v22  ;;  %6650 = vmatprep.mubr.f32.mxu0 %v4108_v63  ;;  %v11034_v22 = vld [vmem:[#allocation51_spill] sm:$0xff]  ;;  %v4118_v27 = vmul.f32 %v7492_v21, %v11036_v28 }
 0x659   :  { %7032 = vmatprep.subr.bf16.mxu0 %v10468_v38  ;;  %v4611_v62 = vmul.f32 %v7488_v58, %v11034_v22 }
 0x65a   :  { %6704 = vmatmul.mubr.f32.gmra.mrb[118].mxu1 %v4607_v51 }
 0x65b   :  { %6706 = vmatprep.mubr.f32.mxu1 %v4609_v0  ;;  %6651 = vmatmul.mubr.f32.gmra.mrb[138].mxu0 %v4110_v40 }
 0x65c   :  { %7034 = vmatpush3.bf16.msra.mxu0 %v10468_v38  ;;  %6653 = vmatprep.mubr.f32.mxu0 %v4112_v4 }
 0x65d   :  { %7036 = vmatprep.subr.bf16.mxu0 %v10487_v14 }
 0x65e   :  { %6707 = vmatmul.mubr.f32.gmra.mrb[120].mxu1 %v4611_v62 }
 0x65f   :  { %6654 = vmatmul.mubr.f32.gmra.mrb[140].mxu0 %v4114_v11 }
 0x660   :  { %7038 = vmatpush3.bf16.msra.mxu0 %v10487_v14  ;;  %v7494_v14 = vpop.eup %7493 }
 0x661   :  { %7040 = vmatprep.subr.bf16.mxu0 %v10498_v24 }
 0x664   :  { %7042 = vmatpush3.bf16.msra.mxu0 %v10498_v24 }
 0x66d   :  { %v4084_v38 = vpop.xlane.xlu1 %4083 }
 0x66e   :  { %7495 = vrcp.f32 %v4084_v38 }
 0x66f   :  { %7497 = vrcp.f32 %v10464_v5  ;;  %v4589_v5 = vmul.f32 %v7494_v14, %v11037_v39 }
 0x670   :  { %7499 = vrcp.f32 %v10470_v55 }
 0x671   :  { %v4581_v10 = vpop.xlane.xlu1 %4580 }
 0x672   :  { %7501 = vrcp.f32 %v4581_v10 }
 0x675   :  { %v4561_v30 = vpop.xlane.xlu1 %4560 }
 0x676   :  { %7503 = vrcp.f32 %v4561_v30 }
 0x678   :  { %v7496_v20 = vpop.eup %7495 }
 0x679   :  { %v4585_v53 = vpop.xlane.xlu1 %4584  ;;  %v4116_v52 = vmul.f32 %v7496_v20, %v10371_v46  ;;  %v7498_v17 = vpop.eup %7497 }
 0x67a   :  { %7505 = vrcp.f32 %v4585_v53  ;;  %v7500_v24 = vpop.eup %7499  ;;  %v4591_v32 = vmul.f32 %v7498_v17, %v11038_v33 }
 0x67b   :  { %6656 = vmatprep.mubr.f32.mxu0 %v4116_v52  ;;  %v4615_v19 = vmul.f32 %v7500_v24, %v11039_v54 }
 0x67c   :  { %v7502_v45 = vpop.eup %7501  ;;  %6657 = vmatmul.mubr.f32.gmra.mrb[142].mxu0 %v4118_v27 }
 0x67d   :  { %v4563_v55 = vpop.xlane.xlu1 %4562  ;;  %6691 = vmatprep.mubr.f32.mxu0 %v4589_v5  ;;  %v4613_v34 = vmul.f32 %v7502_v45, %v10379_v47 }
 0x67e   :  { %7507 = vrcp.f32 %v4563_v55 }
 0x67f   :  { %6709 = vmatprep.mubr.f32.mxu1 %v4613_v34 }
 0x680   :  { %v7504_v46 = vpop.eup %7503  ;;  %6692 = vmatmul.mubr.f32.vlgmr.msra.gmra.mrb[144].mxu0 %v4591_v32  ;;  %6710 = vmatmul.mubr.f32.gmra.mrb[122].mxu1 %v4615_v19 }
 0x681   :  { %v4587_v59 = vpop.xlane.xlu1 %4586  ;;  %v4593_v36 = vmul.f32 %v7504_v46, %v10390_v3 }
 0x682   :  { %7509 = vrcp.f32 %v4587_v59 }
 0x683   :  { %6694 = vmatprep.mubr.f32.mxu0 %v4593_v36 }
 0x684   :  { %v7506_v26 = vpop.eup %7505 }
 0x685   :  { %v4617_v23 = vmul.f32 %v7506_v26, %v10399_v25 }
 0x687   :  { %6712 = vmatprep.mubr.f32.mxu1 %v4617_v23 }
 0x688   :  { %v7508_v57 = vpop.eup %7507 }
 0x689   :  { %v4595_v47 = vmul.f32 %v7508_v57, %v10403_v42 }
 0x68b   :  { %6695 = vmatmul.mubr.f32.gmra.mrb[146].mxu0 %v4595_v47 }
 0x68c   :  { %v7510_v18 = vpop.eup %7509 }
 0x68d   :  { %v4619_v44 = vmul.f32 %v7510_v18, %v10409_v15 }
 0x68f   :  { %6713 = vmatmul.mubr.f32.gmra.mrb[124].mxu1 %v4619_v44 }
 0x69c   :  { %v6525_v7 = vpop.f32.mrb[112].mxu0 }
 0x69d   :  { %v3215_v1 = vpop.f32.mrb[113].mxu0 }
 0x6a0   :  { %v6581_v35 = vpop.f32.mrb[98].mxu1 }
 0x6a1   :  { %4831 = vrot.lane.b32.xlu0 %v6581_v35, %s7575_s26  ;;  %v3732_v3 = vpop.f32.mrb[99].mxu1 }
 0x6a2   :  { %4829 = vrot.lane.b32.xlu1 %v3732_v3, %s7575_s26 }
 0x6b6   :  { %v10555_v37 = vpop.f32.mrb[114].mxu0 }
 0x6b7   :  { %v10557_v25 = vpop.f32.mrb[115].mxu0 }
 0x6b9   :  { %v6584_v12 = vpop.f32.mrb[100].mxu1 }
 0x6ba   :  { %4835 = vrot.lane.b32.xlu0 %v6584_v12, %s7575_s26  ;;  %v3742_v42 = vpop.f32.mrb[101].mxu1 }
 0x6bd   :  { %v6587_v16 = vpop.f32.mrb[102].mxu1 }
 0x6be   :  { %4833 = vrot.lane.b32.xlu0 %v3742_v42, %s7575_s26  ;;  %4839 = vrot.lane.b32.xlu1 %v6587_v16, %s7575_s26  ;;  %v3752_v15 = vpop.f32.mrb[103].mxu1 }
 0x6c2   :  { %4837 = vrot.lane.b32.xlu0 %v3752_v15, %s7575_s26 }
 0x6c9   :  { %v10563_v9 = vpop.f32.mrb[116].mxu0 }
 0x6ca   :  { %v10565_v49 = vpop.f32.mrb[117].mxu0 }
 0x6d2   :  { %v6590_v31 = vpop.f32.mrb[104].mxu1 }
 0x6d3   :  { %4843 = vrot.lane.b32.xlu1 %v6590_v31, %s7575_s26  ;;  %v3762_v29 = vpop.f32.mrb[105].mxu1 }
 0x6d4   :  { %4841 = vrot.lane.b32.xlu0 %v3762_v29, %s7575_s26 }
 0x6d9   :  { %v10569_v60 = vpop.f32.mrb[118].mxu0 }
 0x6da   :  { %v10571_v43 = vpop.f32.mrb[119].mxu0 }
 0x6e9   :  { %v10573_v41 = vpop.f32.mrb[120].mxu0 }
 0x6ea   :  { %v10575_v13 = vpop.f32.mrb[121].mxu0 }
 0x6f1   :  { %v6593_v63 = vpop.f32.mrb[106].mxu1 }
 0x6f2   :  { %4847 = vrot.lane.b32.xlu1 %v6593_v63, %s7575_s26  ;;  %v3772_v2 = vpop.f32.mrb[107].mxu1 }
 0x6f3   :  { %4845 = vrot.lane.b32.xlu0 %v3772_v2, %s7575_s26 }
 0x6f9   :  { %v10579_v50 = vpop.f32.mrb[122].mxu0 }
 0x6fa   :  { %v10581_v51 = vpop.f32.mrb[123].mxu0 }
 0x6fc   :  { %v6596_v58 = vpop.f32.mrb[108].mxu1 }
 0x6fd   :  { %4851 = vrot.lane.b32.xlu1 %v6596_v58, %s7575_s26  ;;  %v3782_v48 = vpop.f32.mrb[109].mxu1 }
 0x6fe   :  { %4849 = vrot.lane.b32.xlu0 %v3782_v48, %s7575_s26 }
 0x705   :  { %v10585_v0 = vpop.f32.mrb[124].mxu0 }
 0x706   :  { %v10587_v8 = vpop.f32.mrb[125].mxu0 }
 0x709   :  { %v6599_v40 = vpop.f32.mrb[110].mxu1 }
 0x70a   :  { %4855 = vrot.lane.b32.xlu1 %v6599_v40, %s7575_s26  ;;  %v3792_v56 = vpop.f32.mrb[111].mxu1 }
 0x70b   :  { %4853 = vrot.lane.b32.xlu0 %v3792_v56, %s7575_s26 }
 0x713   :  { %v4832_v6 = vpop.permute.xlu0 %4831 }
 0x714   :  { %v10592_v4 = vsel %vm5005_vm1, %v6525_v7, %v4832_v6  ;;  %v4830_v22 = vpop.permute.xlu1 %4829 }
 0x715   :  { %v10595_v62 = vsel %vm5005_vm1, %v3215_v1, %v4830_v22 }
 0x716   :  { %v10597_v61 = vpop.f32.mrb[126].mxu0 }
 0x717   :  { %v10599_v11 = vpop.f32.mrb[127].mxu0 }
 0x71a   :  { %v6602_v38 = vpop.f32.mrb[112].mxu1  ;;  %v6637_v10 = vpop.f32.mrb[128].mxu0 }
 0x71b   :  { %v4233_v30 = vpop.f32.mrb[129].mxu0  ;;  %4859 = vrot.lane.b32.xlu1 %v6602_v38, %s7575_s26  ;;  %v3802_v21 = vpop.f32.mrb[113].mxu1 }
 0x71c   :  { %4857 = vrot.lane.b32.xlu0 %v3802_v21, %s7575_s26 }
 0x71e   :  { %v6640_v14 = vpop.f32.mrb[130].mxu0 }
 0x71f   :  { %v4243_v20 = vpop.f32.mrb[131].mxu0  ;;  %4895 = vrot.lane.b32.xlu1 %v6637_v10, %s7573_s5 }
 0x720   :  { %4893 = vrot.lane.b32.xlu0 %v4233_v30, %s7573_s5 }
 0x722   :  { %v6643_v53 = vpop.f32.mrb[132].mxu0 }
 0x723   :  { %v4253_v52 = vpop.f32.mrb[133].mxu0 }
 0x725   :  { %v6699_v17 = vpop.f32.mrb[114].mxu1 }
 0x726   :  { %4967 = vrot.lane.b32.xlu1 %v6699_v17, %s7574_s25  ;;  %v4754_v28 = vpop.f32.mrb[115].mxu1  ;;  %v6646_v27 = vpop.f32.mrb[134].mxu0 }
 0x727   :  { %4965 = vrot.lane.b32.xlu0 %v4754_v28, %s7574_s25  ;;  %v4263_v24 = vpop.f32.mrb[135].mxu0 }
 0x729   :  { %v6702_v39 = vpop.f32.mrb[116].mxu1 }
 0x72a   :  { %4899 = vrot.lane.b32.xlu1 %v6640_v14, %s7573_s5  ;;  %v4764_v5 = vpop.f32.mrb[117].mxu1  ;;  %v6649_v45 = vpop.f32.mrb[136].mxu0 }
 0x72b   :  { %4897 = vrot.lane.b32.xlu0 %v4243_v20, %s7573_s5  ;;  %v4273_v55 = vpop.f32.mrb[137].mxu0 }
 0x72c   :  { %v4836_v34 = vpop.permute.xlu0 %4835 }
 0x72d   :  { %v6705_v33 = vpop.f32.mrb[118].mxu1  ;;  %v10611_v32 = vsel %vm5005_vm1, %v10555_v37, %v4836_v34 }
 0x72e   :  { %4971 = vrot.lane.b32.xlu1 %v6702_v39, %s7574_s25  ;;  %v4774_v54 = vpop.f32.mrb[119].mxu1  ;;  %v6652_v19 = vpop.f32.mrb[138].mxu0 }
 0x72f   :  { %4969 = vrot.lane.b32.xlu0 %v4764_v5, %s7574_s25  ;;  %v4283_v46 = vpop.f32.mrb[139].mxu0 }
 0x730   :  { %v4834_v59 = vpop.permute.xlu0 %4833  ;;  %v4840_v16 = vpop.permute.xlu1 %4839 }
 0x731   :  { %v6708_v36 = vpop.f32.mrb[120].mxu1  ;;  %v10617_v26 = vsel %vm5005_vm1, %v10557_v25, %v4834_v59 }
 0x732   :  { %4903 = vrot.lane.b32.xlu1 %v6643_v53, %s7573_s5  ;;  %v4784_v23 = vpop.f32.mrb[121].mxu1  ;;  %v6655_v57 = vpop.f32.mrb[140].mxu0 }
 0x733   :  { %4901 = vrot.lane.b32.xlu0 %v4253_v52, %s7573_s5  ;;  %v4293_v47 = vpop.f32.mrb[141].mxu0 }
 0x734   :  { %v4838_v15 = vpop.permute.xlu0 %4837 }
 0x736   :  { %4975 = vrot.lane.b32.xlu1 %v6705_v33, %s7574_s25 }
 0x737   :  { %4973 = vrot.lane.b32.xlu0 %v4774_v54, %s7574_s25 }
 0x73a   :  { %4907 = vrot.lane.b32.xlu1 %v6646_v27, %s7573_s5 }
 0x73b   :  { %4905 = vrot.lane.b32.xlu0 %v4263_v24, %s7573_s5 }
 0x73e   :  { %4979 = vrot.lane.b32.xlu1 %v6708_v36, %s7574_s25 }
 0x73f   :  { %4977 = vrot.lane.b32.xlu0 %v4784_v23, %s7574_s25 }
 0x742   :  { %4911 = vrot.lane.b32.xlu1 %v6649_v45, %s7573_s5 }
 0x743   :  { %4909 = vrot.lane.b32.xlu0 %v4273_v55, %s7573_s5 }
 0x745   :  { %v4844_v31 = vpop.permute.xlu1 %4843 }
 0x746   :  { %v4842_v29 = vpop.permute.xlu0 %4841 }
 0x747   :  { %v5012_v23 = vsel %vm5005_vm1, %v10571_v43, %v4842_v29 }
 0x74f   :  { %v6658_v18 = vpop.f32.mrb[142].mxu0 }
 0x750   :  { %v4303_v44 = vpop.f32.mrb[143].mxu0 }
 0x753   :  { %v6693_v7 = vpop.f32.mrb[144].mxu0  ;;  %v6711_v1 = vpop.f32.mrb[122].mxu1 }
 0x754   :  { %v4734_v35 = vpop.f32.mrb[145].mxu0  ;;  %4983 = vrot.lane.b32.xlu1 %v6711_v1, %s7574_s25  ;;  %v4794_v3 = vpop.f32.mrb[123].mxu1 }
 0x755   :  { %4981 = vrot.lane.b32.xlu0 %v4794_v3, %s7574_s25 }
 0x758   :  { %4915 = vrot.lane.b32.xlu1 %v6652_v19, %s7573_s5 }
 0x759   :  { %4913 = vrot.lane.b32.xlu0 %v4283_v46, %s7573_s5 }
 0x75c   :  { %4919 = vrot.lane.b32.xlu1 %v6655_v57, %s7573_s5 }
 0x75d   :  { %4917 = vrot.lane.b32.xlu0 %v4293_v47, %s7573_s5 }
 0x75e   :  { %v6696_v37 = vpop.f32.mrb[146].mxu0 }
 0x75f   :  { %v4744_v25 = vpop.f32.mrb[147].mxu0 }
 0x760   :  { %4923 = vrot.lane.b32.xlu1 %v6658_v18, %s7573_s5 }
 0x761   :  { %4921 = vrot.lane.b32.xlu0 %v4303_v44, %s7573_s5 }
 0x762   :  { %v6714_v12 = vpop.f32.mrb[124].mxu1 }
 0x763   :  { %v4804_v42 = vpop.f32.mrb[125].mxu1 }
 0x764   :  { %4959 = vrot.lane.b32.xlu1 %v6693_v7, %s7574_s25  ;;  %v4848_v63 = vpop.permute.xlu1 %4847 }
 0x765   :  { %4957 = vrot.lane.b32.xlu0 %v4734_v35, %s7574_s25  ;;  %v4846_v2 = vpop.permute.xlu0 %4845  ;;  %v5015_v43 = vsel %vm5005_vm1, %v10573_v41, %v4848_v63 }
 0x768   :  { %4963 = vrot.lane.b32.xlu1 %v6696_v37, %s7574_s25 }
 0x769   :  { %4961 = vrot.lane.b32.xlu0 %v4744_v25, %s7574_s25 }
 0x76c   :  { %4987 = vrot.lane.b32.xlu1 %v6714_v12, %s7574_s25 }
 0x76d   :  { %4985 = vrot.lane.b32.xlu0 %v4804_v42, %s7574_s25 }
 0x76f   :  { %v4852_v58 = vpop.permute.xlu1 %4851 }
 0x770   :  { %v10645_v48 = vsel %vm5005_vm1, %v10579_v50, %v4852_v58  ;;  %v4850_v40 = vpop.permute.xlu0 %4849 }
 0x771   :  { %v10649_v56 = vsel %vm5005_vm1, %v10581_v51, %v4850_v40 }
 0x77c   :  { %v4856_v6 = vpop.permute.xlu1 %4855 }
 0x77d   :  { %v10653_v22 = vsel %vm5005_vm1, %v10585_v0, %v4856_v6  ;;  %v4854_v38 = vpop.permute.xlu0 %4853 }
 0x77e   :  { %v10657_v10 = vsel %vm5005_vm1, %v10587_v8, %v4854_v38 }
 0x78d   :  { %v4860_v30 = vpop.permute.xlu1 %4859 }
 0x78e   :  { %v10661_v50 = vsel %vm5005_vm1, %v10597_v61, %v4860_v30  ;;  %v4858_v21 = vpop.permute.xlu0 %4857 }
 0x78f   :  { %v10665_v51 = vsel %vm5005_vm1, %v10599_v11, %v4858_v21  ;;  %v5011_v11 = vsel %vm5005_vm1, %v10563_v9, %v4840_v16  ;;  %v5014_v16 = vsel %vm5005_vm1, %v10575_v13, %v4846_v2 }
 0x791   :  { %v4896_v14 = vpop.permute.xlu1 %4895 }
 0x792   :  { %v10669_v0 = vsel %vm488_vm0, %v10592_v4, %v4896_v14  ;;  %v4894_v20 = vpop.permute.xlu0 %4893  ;;  %v10684_v4 = vld [vmem:[%s10773_s7] ss:$0 sm:$0xff]  ;;  %s7579_s7 = smov [#allocation2]  }
 0x793   :  { %v10673_v8 = vsel %vm488_vm0, %v10595_v62, %v4894_v20  ;;  %v5010_v62 = vsel %vm5005_vm1, %v10565_v49, %v4838_v15  ;;  %v5013_v49 = vsel %vm5005_vm1, %v10569_v60, %v4844_v31  ;;  %s5179_s30 = sshll.u32 %s7579_s7, 4  ;;  %s5180_s30 = int_to_ptr.vmem [resolvable:$true] %s5179_s30 }
 0x794   :  { %s7543_s9 = scalar_lea.vmem %s5180_s30, 2048  ;;  %p7548_p1 = scmp.lt.s32.totalorder %s5180_s30, %s5180_s30 }
 0x795   :  { %p7544_p0 = scmp.ne.s32.totalorder %s5180_s30, %s7543_s9  ;;  %p7549_p2 = scmp.lt.s32.totalorder %s7543_s9, %s7543_s9 }
 0x797   :  { %p7550_p3 = por %p7549_p2, %p7548_p1 }
 0x798   :  { %v4968_v53 = vpop.permute.xlu1 %4967 }
 0x799   :  { %v4966_v52 = vpop.permute.xlu0 %4965  ;;  %p7551_p4 = pnand %p7550_p3, %p7544_p0 }
 0x79c   :  { %v10675_v17 = vpop.permute.xlu1 %4899 }
 0x79d   :  { %v10677_v61 = vpop.permute.xlu0 %4897 }
 0x7a0   :  { %v4972_v28 = vpop.permute.xlu1 %4971 }
 0x7a1   :  { %v4970_v27 = vpop.permute.xlu0 %4969 }
 0x7a4   :  { %v4904_v24 = vpop.permute.xlu1 %4903 }
 0x7a5   :  { %v5027_v39 = vsel %vm488_vm0, %v5011_v11, %v4904_v24  ;;  %v4902_v5 = vpop.permute.xlu0 %4901 }
 0x7a6   :  { %v5044_v45 = vsel %vm5038_vm15, %v5027_v39, %v4968_v53  ;;  %v5026_v55 = vsel %vm488_vm0, %v5010_v62, %v4902_v5 }
 0x7a7   :  { %v5067_v34 = vadd.f32 %v10684_v4, %v5044_v45  ;;  %v5043_v9 = vsel %vm5038_vm15, %v5026_v55, %v4966_v52 }
 0x7a8   :  { %v5066_v33 = vadd.f32 %v10684_v4, %v5043_v9  ;;  %v4976_v54 = vpop.permute.xlu1 %4975 }
 0x7a9   :  { %v5104_v19 = vmul.f32 1.442695, %v5067_v34  ;;  %v4974_v46 = vpop.permute.xlu0 %4973  ;;  %vm5083_vm10 = vcmp.gt.f32.partialorder %v5067_v34, 0.0 }
 0x7aa   :  { %v5102_v59 = vmul.f32 1.442695, %v5066_v33  ;;  %vm5082_vm8 = vcmp.gt.f32.partialorder %v5066_v33, 0.0 }
 0x7ab   :  { %7511 = vpow2.f32 %v5104_v19 }
 0x7ac   :  { %7513 = vpow2.f32 %v5102_v59  ;;  %v4908_v36 = vpop.permute.xlu1 %4907 }
 0x7ad   :  { %v5029_v57 = vsel %vm488_vm0, %v5013_v49, %v4908_v36  ;;  %v4906_v47 = vpop.permute.xlu0 %4905 }
 0x7ae   :  { %v5046_v18 = vsel %vm5038_vm15, %v5029_v57, %v4972_v28  ;;  %v5028_v44 = vsel %vm488_vm0, %v5012_v23, %v4906_v47 }
 0x7af   :  { %v5069_v7 = vadd.f32 %v10684_v4, %v5046_v18  ;;  %v5045_v1 = vsel %vm5038_vm15, %v5028_v44, %v4970_v27 }
 0x7b0   :  { %v5068_v35 = vadd.f32 %v10684_v4, %v5045_v1  ;;  %v4980_v3 = vpop.permute.xlu1 %4979 }
 0x7b1   :  { %v5108_v60 = vmul.f32 1.442695, %v5069_v7  ;;  %v4978_v37 = vpop.permute.xlu0 %4977  ;;  %vm5085_vm11 = vcmp.gt.f32.partialorder %v5069_v7, 0.0 }
 0x7b2   :  { %v5106_v25 = vmul.f32 1.442695, %v5068_v35  ;;  %vm5084_vm13 = vcmp.gt.f32.partialorder %v5068_v35, 0.0 }
 0x7b3   :  { %7515 = vpow2.f32 %v5108_v60 }
 0x7b4   :  { %7517 = vpow2.f32 %v5106_v25  ;;  %v4912_v12 = vpop.permute.xlu1 %4911 }
 0x7b5   :  { %v7512_v42 = vpop.eup %7511  ;;  %v5031_v15 = vsel %vm488_vm0, %v5015_v43, %v4912_v12  ;;  %v4910_v31 = vpop.permute.xlu0 %4909 }
 0x7b6   :  { %v7514_v29 = vpop.eup %7513  ;;  %v5708_v58 = vadd.f32 -1.0, %v7512_v42  ;;  %v5048_v40 = vsel %vm5038_vm15, %v5031_v15, %v4976_v54  ;;  %v5030_v6 = vsel %vm488_vm0, %v5014_v16, %v4910_v31  ;;  %v5025_v31 = vsel %vm488_vm0, %v10611_v32, %v10675_v17 }
 0x7b7   :  { %v5707_v38 = vadd.f32 -1.0, %v7514_v29  ;;  %v5071_v30 = vadd.f32 %v10684_v4, %v5048_v40  ;;  %v5047_v41 = vsel %vm5038_vm15, %v5030_v6, %v4974_v46  ;;  %v5024_v6 = vsel %vm488_vm0, %v10617_v26, %v10677_v61 }
 0x7b8   :  { %v5147_v63 = vsel %vm5083_vm10, %v5067_v34, %v5708_v58  ;;  %v5070_v21 = vadd.f32 %v10684_v4, %v5047_v41 }
 0x7b9   :  { %5163 = vst [vmem:[#allocation2 + $0x28] sm:$0xff] %v5147_v63  ;;  %v5146_v13 = vsel %vm5082_vm8, %v5066_v33, %v5707_v38  ;;  %v5112_v2 = vmul.f32 1.442695, %v5071_v30  ;;  %vm5087_vm7 = vcmp.gt.f32.partialorder %v5071_v30, 0.0 }
 0x7ba   :  { %5162 = vst [vmem:[#allocation2 + $0x20] sm:$0xff] %v5146_v13  ;;  %v5110_v14 = vmul.f32 1.442695, %v5070_v21  ;;  %vm5086_vm12 = vcmp.gt.f32.partialorder %v5070_v21, 0.0 }
 0x7bb   :  { %7519 = vpow2.f32 %v5112_v2 }
 0x7bc   :  { %7521 = vpow2.f32 %v5110_v14 }
 0x7bd   :  { %v7516_v20 = vpop.eup %7515 }
 0x7be   :  { %v7518_v53 = vpop.eup %7517  ;;  %v5710_v52 = vadd.f32 -1.0, %v7516_v20 }
 0x7bf   :  { %v5709_v28 = vadd.f32 -1.0, %v7518_v53 }
 0x7c0   :  { %v5149_v27 = vsel %vm5085_vm11, %v5069_v7, %v5710_v52 }
 0x7c1   :  { %5165 = vst [vmem:[#allocation2 + $0x38] sm:$0xff] %v5149_v27  ;;  %v5148_v11 = vsel %vm5084_vm13, %v5068_v35, %v5709_v28 }
 0x7c2   :  { %5164 = vst [vmem:[#allocation2 + $0x30] sm:$0xff] %v5148_v11 }
 0x7c5   :  { %v7520_v24 = vpop.eup %7519 }
 0x7c6   :  { %v7522_v62 = vpop.eup %7521  ;;  %v5712_v39 = vadd.f32 -1.0, %v7520_v24  ;;  %v4984_v5 = vpop.permute.xlu1 %4983 }
 0x7c7   :  { %v5711_v45 = vadd.f32 -1.0, %v7522_v62  ;;  %v4982_v55 = vpop.permute.xlu0 %4981 }
 0x7c8   :  { %v5151_v34 = vsel %vm5087_vm7, %v5071_v30, %v5712_v39 }
 0x7c9   :  { %5167 = vst [vmem:[#allocation2 + $0x48] sm:$0xff] %v5151_v34  ;;  %v5150_v9 = vsel %vm5086_vm12, %v5070_v21, %v5711_v45 }
 0x7ca   :  { %5166 = vst [vmem:[#allocation2 + $0x40] sm:$0xff] %v5150_v9  ;;  %v4916_v33 = vpop.permute.xlu1 %4915 }
 0x7cb   :  { %v5033_v54 = vsel %vm488_vm0, %v10645_v48, %v4916_v33  ;;  %v4914_v19 = vpop.permute.xlu0 %4913 }
 0x7cc   :  { %v5050_v46 = vsel %vm5038_vm15, %v5033_v54, %v4980_v3  ;;  %v5032_v59 = vsel %vm488_vm0, %v10649_v56, %v4914_v19 }
 0x7cd   :  { %v5073_v49 = vadd.f32 %v10684_v4, %v5050_v46  ;;  %v5049_v36 = vsel %vm5038_vm15, %v5032_v59, %v4978_v37 }
 0x7ce   :  { %v5072_v23 = vadd.f32 %v10684_v4, %v5049_v36  ;;  %v4920_v57 = vpop.permute.xlu1 %4919 }
 0x7cf   :  { %v5116_v47 = vmul.f32 1.442695, %v5073_v49  ;;  %v5035_v18 = vsel %vm488_vm0, %v10653_v22, %v4920_v57  ;;  %v4918_v44 = vpop.permute.xlu0 %4917  ;;  %vm5089_vm5 = vcmp.gt.f32.partialorder %v5073_v49, 0.0 }
 0x7d0   :  { %v5114_v7 = vmul.f32 1.442695, %v5072_v23  ;;  %v5052_v48 = vsel %vm5038_vm15, %v5035_v18, %v4984_v5  ;;  %v5034_v1 = vsel %vm488_vm0, %v10657_v10, %v4918_v44  ;;  %vm5088_vm14 = vcmp.gt.f32.partialorder %v5072_v23, 0.0 }
 0x7d1   :  { %7523 = vpow2.f32 %v5116_v47  ;;  %v5075_v56 = vadd.f32 %v10684_v4, %v5052_v48  ;;  %v5051_v35 = vsel %vm5038_vm15, %v5034_v1, %v4982_v55 }
 0x7d2   :  { %7525 = vpow2.f32 %v5114_v7  ;;  %v5074_v3 = vadd.f32 %v10684_v4, %v5051_v35  ;;  %v4924_v60 = vpop.permute.xlu1 %4923 }
 0x7d3   :  { %v5120_v37 = vmul.f32 1.442695, %v5075_v56  ;;  %v4922_v25 = vpop.permute.xlu0 %4921  ;;  %v5037_v26 = vsel %vm488_vm0, %v10661_v50, %v4924_v60  ;;  %vm5091_vm2 = vcmp.gt.f32.partialorder %v5075_v56, 0.0 }
 0x7d4   :  { %v5118_v43 = vmul.f32 1.442695, %v5074_v3  ;;  %v5036_v53 = vsel %vm488_vm0, %v10665_v51, %v4922_v25  ;;  %vm5090_vm4 = vcmp.gt.f32.partialorder %v5074_v3, 0.0 }
 0x7d5   :  { %7527 = vpow2.f32 %v5120_v37 }
 0x7d6   :  { %7529 = vpow2.f32 %v5118_v43  ;;  %v4960_v22 = vpop.permute.xlu1 %4959 }
 0x7d7   :  { %v5040_v12 = vsel %vm5038_vm15, %v10669_v0, %v4960_v22  ;;  %v4958_v42 = vpop.permute.xlu0 %4957 }
 0x7d8   :  { %v5063_v10 = vadd.f32 %v10684_v4, %v5040_v12  ;;  %v5039_v16 = vsel %vm5038_vm15, %v10673_v8, %v4958_v42 }
 0x7d9   :  { %v5062_v15 = vadd.f32 %v10684_v4, %v5039_v16 }
 0x7da   :  { %v5096_v29 = vmul.f32 1.442695, %v5063_v10  ;;  %v4964_v58 = vpop.permute.xlu1 %4963  ;;  %vm5079_vm0 = vcmp.gt.f32.partialorder %v5063_v10, 0.0 }
 0x7db   :  { %v7524_v40 = vpop.eup %7523  ;;  %v5094_v0 = vmul.f32 1.442695, %v5062_v15  ;;  %v5042_v38 = vsel %vm5038_vm15, %v5025_v31, %v4964_v58  ;;  %v4962_v30 = vpop.permute.xlu0 %4961  ;;  %vm5078_vm3 = vcmp.gt.f32.partialorder %v5062_v15, 0.0 }
 0x7dc   :  { %v7526_v41 = vpop.eup %7525  ;;  %v5714_v63 = vadd.f32 -1.0, %v7524_v40  ;;  %7531 = vpow2.f32 %v5096_v29  ;;  %v5065_v8 = vadd.f32 %v10684_v4, %v5042_v38  ;;  %v5041_v21 = vsel %vm5038_vm15, %v5024_v6, %v4962_v30 }
 0x7dd   :  { %v5713_v32 = vadd.f32 -1.0, %v7526_v41  ;;  %7533 = vpow2.f32 %v5094_v0  ;;  %v5064_v17 = vadd.f32 %v10684_v4, %v5041_v21 }
 0x7de   :  { %v5153_v13 = vsel %vm5089_vm5, %v5073_v49, %v5714_v63  ;;  %v5100_v61 = vmul.f32 1.442695, %v5065_v8  ;;  %v4988_v2 = vpop.permute.xlu1 %4987  ;;  %vm5081_vm6 = vcmp.gt.f32.partialorder %v5065_v8, 0.0 }
 0x7df   :  { %v7528_v14 = vpop.eup %7527  ;;  %5169 = vst [vmem:[#allocation2 + $0x58] sm:$0xff] %v5153_v13  ;;  %v5152_v20 = vsel %vm5088_vm14, %v5072_v23, %v5713_v32  ;;  %v5098_v52 = vmul.f32 1.442695, %v5064_v17  ;;  %v5054_v28 = vsel %vm5038_vm15, %v5037_v26, %v4988_v2  ;;  %v4986_v27 = vpop.permute.xlu0 %4985  ;;  %vm5080_vm9 = vcmp.gt.f32.partialorder %v5064_v17, 0.0 }
 0x7e0   :  { %v7530_v11 = vpop.eup %7529  ;;  %5168 = vst [vmem:[#allocation2 + $0x50] sm:$0xff] %v5152_v20  ;;  %v5716_v24 = vadd.f32 -1.0, %v7528_v14  ;;  %7535 = vpow2.f32 %v5100_v61  ;;  %v5077_v62 = vadd.f32 %v10684_v4, %v5054_v28  ;;  %v5053_v50 = vsel %vm5038_vm15, %v5036_v53, %v4986_v27 }
 0x7e1   :  { %v5715_v39 = vadd.f32 -1.0, %v7530_v11  ;;  %7537 = vpow2.f32 %v5098_v52  ;;  %v5076_v5 = vadd.f32 %v10684_v4, %v5053_v50 }
 0x7e2   :  { %v5155_v45 = vsel %vm5091_vm2, %v5075_v56, %v5716_v24  ;;  %v5124_v51 = vmul.f32 1.442695, %v5077_v62  ;;  %vm5093_vm1 = vcmp.gt.f32.partialorder %v5077_v62, 0.0 }
 0x7e3   :  { %5171 = vst [vmem:[#allocation2 + $0x68] sm:$0xff] %v5155_v45  ;;  %v5154_v55 = vsel %vm5090_vm4, %v5074_v3, %v5715_v39  ;;  %v5122_v34 = vmul.f32 1.442695, %v5076_v5  ;;  %vm5092_vm15 = vcmp.gt.f32.partialorder %v5076_v5, 0.0 }
 0x7e4   :  { %5170 = vst [vmem:[#allocation2 + $0x60] sm:$0xff] %v5154_v55  ;;  %7539 = vpow2.f32 %v5124_v51 }
 0x7e5   :  { %7541 = vpow2.f32 %v5122_v34 }
 0x7e6   :  { %v7532_v9 = vpop.eup %7531 }
 0x7e7   :  { %v7534_v33 = vpop.eup %7533  ;;  %v5704_v54 = vadd.f32 -1.0, %v7532_v9 }
 0x7e8   :  { %v5703_v19 = vadd.f32 -1.0, %v7534_v33 }
 0x7e9   :  { %v5143_v46 = vsel %vm5079_vm0, %v5063_v10, %v5704_v54 }
 0x7ea   :  { %v7536_v59 = vpop.eup %7535  ;;  %5159 = vst [vmem:[#allocation2 + $0x8] sm:$0xff] %v5143_v46  ;;  %v5142_v49 = vsel %vm5078_vm3, %v5062_v15, %v5703_v19 }
 0x7eb   :  { %v7538_v4 = vpop.eup %7537  ;;  %5158 = vst [vmem:[#allocation2] sm:$0xff] %v5142_v49  ;;  %v5706_v36 = vadd.f32 -1.0, %v7536_v59 }
 0x7ec   :  { %v5705_v23 = vadd.f32 -1.0, %v7538_v4 }
 0x7ed   :  { %v5145_v57 = vsel %vm5081_vm6, %v5065_v8, %v5706_v36 }
 0x7ee   :  { %v7540_v47 = vpop.eup %7539  ;;  %5161 = vst [vmem:[#allocation2 + $0x18] sm:$0xff] %v5145_v57  ;;  %v5144_v18 = vsel %vm5080_vm9, %v5064_v17, %v5705_v23 }
 0x7ef   :  { %v7542_v44 = vpop.eup %7541  ;;  %5160 = vst [vmem:[#allocation2 + $0x10] sm:$0xff] %v5144_v18  ;;  %v5718_v7 = vadd.f32 -1.0, %v7540_v47 }
 0x7f0   :  { %v5717_v48 = vadd.f32 -1.0, %v7542_v44 }
 0x7f1   :  { %v5157_v1 = vsel %vm5093_vm1, %v5077_v62, %v5718_v7 }
 0x7f2   :  { %5173 = vst [vmem:[#allocation2 + $0x78] sm:$0xff] %v5157_v1  ;;  %v5156_v56 = vsel %vm5092_vm15, %v5076_v5, %v5717_v48 }
 0x7f3   :  { %5172 = vst [vmem:[#allocation2 + $0x70] sm:$0xff] %v5156_v56 }
 0x7f4   :  { %7554 = shalt.err (!%p7551_p4)
}
 0x7f5   :  { %s7555_s4 = scalar_lea.hbm %s10774_s8, 2048 }
 0x7f6   :  { %p7556_p5 = scmp.ne.s32.totalorder %s10774_s8, %s7555_s4  ;;  %p7559_p6 = scmp.lt.u32.totalorder %s7555_s4, %s10774_s8 }
 0x7f8   :  { %p7561_p7 = pnand %p7559_p6, %p7556_p5 }
 0x7fa   :  { %7564 = shalt.err (!%p7561_p7)
}
 0x7fb   :  { %s7580_s1 = smov 128   ;;  %s7581_s16 = smov 8  }
 0x7fc   :  { %5185 = dma.vmem_to_hbm [thread:$0]  %s5180_s30, 2048, %s10774_s8, [#allocation3], %s7580_s1, %s7580_s1, %s7581_s16  }
 0x7fd   :  { %7565 = dma.done.wait [#allocation3], 2048  }
 0x7fe   :  { %7566 = vsyncadd [#allocation3], 4294965248 }
 0x7ff   :  { %5189 = vsyncpa [#allocation3], 1 }

</bundles_post_ra>
